<compile_context>
chip_gen: v7x
topology: tpu7x:2x2x1
jax: 0.10.0
libtpu: 0.0.40
codegen_flags: <defaults>
</compile_context>

<pallas_src>
import jax
import jax.numpy as jnp
from jax.experimental import pallas as pl
from jax.experimental.pallas import tpu as pltpu


def se_gate_mul_kernel(xs_ref, w_ref, b_ref, x2_ref, o_ref):
    # 1x1 conv on a 1x1 spatial input == mat-vec.  One MXU pass produces the
    # gate logits already in column (sublane) orientation: (Cb, Cin)@(Cin, 1).
    w = w_ref[...].astype(jnp.float32)                      # (Cb, Cin)
    xs = xs_ref[...].astype(jnp.float32)                    # (Cin, 1)
    logits = jnp.dot(w, xs, preferred_element_type=jnp.float32)   # (Cb, 1)  MXU
    gate = jax.nn.sigmoid(logits + b_ref[...].astype(jnp.float32))  # (Cb, 1) EUP
    # Broadcast multiply along lanes (spatial), in the activation's native dtype.
    o_ref[...] = (x2_ref[...] * gate.astype(x2_ref.dtype)).astype(o_ref.dtype)


def _default_num_blocks():
    """Cout-axis grid steps per generation (perf-review tuned)."""
    try:
        kind = jax.devices()[0].device_kind.lower()
    except Exception:
        return 1
    if ("v7" in kind) or ("7x" in kind) or ("tpu7" in kind):
        return 2   # shard the parallel Cout axis across both TensorCores
    if "v5" in kind:
        return 2   # one overlap step; 3 steps' fixed overhead > DMA it hides
    if "v6" in kind:
        return 1   # overhead-bound: single shot ties or beats 2 steps
    return 1


def se_gate_mul(x205, x202, weight, bias, *, num_blocks=None):
    """x205: (1,Cin,1,1); x202: (1,Cout,H,W); weight: (Cout,Cin,1,1); bias: (Cout,)."""
    N, Cin, _, _ = x205.shape
    _, Cout, H, W = x202.shape
    assert N == 1, "this kernel is written for batch 1 (as in the reference module)"
    HW = H * W

    # Zero-copy views only: no transposes, no dtype casts in the wrapper.
    xs = x205.reshape(Cin, 1)        # (Cin, 1)  column for the MXU mat-vec
    w = weight.reshape(Cout, Cin)    # (Cout, Cin)
    b = bias.reshape(Cout, 1)        # (Cout, 1)
    x2 = x202.reshape(Cout, HW)      # (Cout, HW)  channels on sublanes, spatial on lanes

    if num_blocks is None:
        num_blocks = _default_num_blocks()
    nb = max(1, int(num_blocks))
    # row-block must tile Cout in multiples of 8 sublanes
    while nb > 1 and (Cout % nb != 0 or (Cout // nb) % 8 != 0):
        nb -= 1
    cb = Cout // nb

    act_itemsize = jnp.dtype(x202.dtype).itemsize
    cost = pl.CostEstimate(
        flops=2 * Cout * Cin + 2 * Cout * HW,
        transcendentals=Cout,
        bytes_accessed=(xs.size * jnp.dtype(xs.dtype).itemsize
                        + w.size * jnp.dtype(w.dtype).itemsize
                        + b.size * jnp.dtype(b.dtype).itemsize
                        + 2 * Cout * HW * act_itemsize),
    )

    out = pl.pallas_call(
        se_gate_mul_kernel,
        out_shape=jax.ShapeDtypeStruct((Cout, HW), x202.dtype),
        grid=(nb,),
        in_specs=[
            pl.BlockSpec((Cin, 1), lambda i: (0, 0)),    # xs: constant block -> resident
            pl.BlockSpec((cb, Cin), lambda i: (i, 0)),   # weight rows for this block
            pl.BlockSpec((cb, 1), lambda i: (i, 0)),     # bias rows for this block
            pl.BlockSpec((cb, HW), lambda i: (i, 0)),    # activation rows
        ],
        out_specs=pl.BlockSpec((cb, HW), lambda i: (i, 0)),
        compiler_params=pltpu.CompilerParams(
            dimension_semantics=("parallel",)),
        cost_estimate=cost,
    )(xs, w, b, x2)

    # zero-copy back to NCHW
    return out.reshape(1, Cout, H, W)


if __name__ == "__main__":
    key = jax.random.PRNGKey(0)
    k1, k2, k3, k4 = jax.random.split(key, 4)

    Cin, Cout, H, W = 48, 1152, 7, 7

    # inputs (match the module's shapes)
    x205 = jax.random.normal(k1, (1, Cin, 1, 1), dtype=jnp.float32)
    x202 = jax.random.normal(k2, (1, Cout, H, W), dtype=jnp.float32)

    # deterministic Conv2d(48, 1152, 1x1) params (PyTorch-style uniform init)
    bound = 1.0 / (Cin ** 0.5)
    weight = jax.random.uniform(k3, (Cout, Cin, 1, 1), minval=-bound, maxval=bound,
                                dtype=jnp.float32)
    bias = jax.random.uniform(k4, (Cout,), minval=-bound, maxval=bound,
                              dtype=jnp.float32)

    fn = jax.jit(se_gate_mul)   # jit so the wrapper reshapes become pure bitcasts
    out = jax.block_until_ready(fn(x205, x202, weight, bias))

    # pure-JAX reference check.  Tolerance is set so the check also passes if the
    # MXU evaluates the 48-deep f32 mat-vec with an internal bf16 pass; on the
    # full-precision f32 path the observed error is ~1e-6.
    gate_ref = jax.nn.sigmoid(
        jnp.einsum('oc,nchw->nohw', weight.reshape(Cout, Cin), x205)
        + bias.reshape(1, Cout, 1, 1))
    ref = gate_ref * x202
    assert out.shape == (1, Cout, H, W)
    assert jnp.allclose(out, ref, atol=5e-3, rtol=5e-3)

    print("KERNEL_OK")
</pallas_src>

<mosaic_0001>
module attributes {stable_mosaic.version = 11 : i64} {
  func.func @se_gate_mul_kernel(%arg0: i32, %arg1: memref<48x1xf32, #tpu.memory_space<vmem>>, %arg2: memref<1152x48xf32, #tpu.memory_space<vmem>>, %arg3: memref<1152x1xf32, #tpu.memory_space<vmem>>, %arg4: memref<1152x49xf32, #tpu.memory_space<vmem>>, %arg5: memref<1152x49xf32, #tpu.memory_space<vmem>>) attributes {dimension_semantics = [#tpu.dimension_semantics<parallel>], iteration_bounds = array<i64: 1>, scalar_prefetch = 0 : i64, scratch_operands = 0 : i64, tpu.core_type = #tpu.core_type<tc>, window_params = [{pipeline_mode = #tpu.pipeline_mode<synchronous>, transform_indices = @transform_0, window_bounds = array<i64: 48, 1>}, {transform_indices = @transform_1, window_bounds = array<i64: 1152, 48>}, {transform_indices = @transform_2, window_bounds = array<i64: 1152, 1>}, {transform_indices = @transform_3, window_bounds = array<i64: 1152, 49>}, {transform_indices = @transform_4, window_bounds = array<i64: 1152, 49>}]} {
    %c0 = arith.constant 0 : index
    %c0_0 = arith.constant 0 : index
    %0 = vector.load %arg2[%c0, %c0_0] : memref<1152x48xf32, #tpu.memory_space<vmem>>, vector<1152x48xf32>
    %c0_1 = arith.constant 0 : index
    %c0_2 = arith.constant 0 : index
    %1 = vector.load %arg1[%c0_1, %c0_2] : memref<48x1xf32, #tpu.memory_space<vmem>>, vector<48x1xf32>
    %cst = arith.constant dense<0.000000e+00> : vector<1152x1xf32>
    %2 = tpu.matmul %0, %1, %cst {dimension_numbers = #tpu.dot_dimension_numbers<[1], [0], [0], [1], [0, 0, 1, 1], [], []>} : vector<1152x48xf32>, vector<48x1xf32>, vector<1152x1xf32> -> vector<1152x1xf32>
    %c0_3 = arith.constant 0 : index
    %c0_4 = arith.constant 0 : index
    %3 = vector.load %arg3[%c0_3, %c0_4] : memref<1152x1xf32, #tpu.memory_space<vmem>>, vector<1152x1xf32>
    %4 = arith.addf %2, %3 : vector<1152x1xf32>
    %5 = arith.negf %4 : vector<1152x1xf32>
    %6 = math.exp %5 : vector<1152x1xf32>
    %cst_5 = arith.constant 1.000000e+00 : f32
    %7 = vector.broadcast %cst_5 : f32 to vector<1152x1xf32>
    %8 = arith.addf %7, %6 : vector<1152x1xf32>
    %9 = arith.divf %7, %8 : vector<1152x1xf32>
    %c0_6 = arith.constant 0 : index
    %c0_7 = arith.constant 0 : index
    %10 = vector.load %arg4[%c0_6, %c0_7] : memref<1152x49xf32, #tpu.memory_space<vmem>>, vector<1152x49xf32>
    %11 = vector.broadcast %9 : vector<1152x1xf32> to vector<1152x49xf32>
    %12 = arith.mulf %10, %11 : vector<1152x49xf32>
    %c0_8 = arith.constant 0 : index
    %c0_9 = arith.constant 0 : index
    %13 = vector.load %arg5[%c0_8, %c0_9] : memref<1152x49xf32, #tpu.memory_space<vmem>>, vector<1152x49xf32>
    tpu.vector_store %arg5[%c0_8, %c0_9], %12 {strides = array<i32>} : memref<1152x49xf32, #tpu.memory_space<vmem>>, vector<1152x49xf32>,
    return
  }
  func.func @transform_0(%arg0: i32) -> (i32, i32) {
    %c0_i32 = arith.constant 0 : i32
    %c0_i32_0 = arith.constant 0 : i32
    %c0_i32_1 = arith.constant 0 : i32
    return %c0_i32, %c0_i32_0 : i32, i32
  }
  func.func @transform_1(%arg0: i32) -> (i32, i32) {
    %c0_i32 = arith.constant 0 : i32
    %c0_i32_0 = arith.constant 0 : i32
    return %arg0, %c0_i32 : i32, i32
  }
  func.func @transform_2(%arg0: i32) -> (i32, i32) {
    %c0_i32 = arith.constant 0 : i32
    %c0_i32_0 = arith.constant 0 : i32
    return %arg0, %c0_i32 : i32, i32
  }
  func.func @transform_3(%arg0: i32) -> (i32, i32) {
    %c0_i32 = arith.constant 0 : i32
    %c0_i32_0 = arith.constant 0 : i32
    return %arg0, %c0_i32 : i32, i32
  }
  func.func @transform_4(%arg0: i32) -> (i32, i32) {
    %c0_i32 = arith.constant 0 : i32
    %c0_i32_0 = arith.constant 0 : i32
    return %arg0, %c0_i32 : i32, i32
  }
}

</mosaic_0001>

<bundles_post_ra>
// kernel: se_gate_mul.1
= control target key start
LH: loop header
LB: loop body
LE: loop exit
PB: predicated region body
PF: predicated region fallthrough
CT: control target
= control target key end

     0   :  { %vm311_vm0 = vcmask 392192   ;;  %vm3401_vm1 = vcmask 400384   ;;  %s7302_s0 = inlined_call_operand.vmem [shape: f32[48,1], index: 0, kind: input, shape index: {}]   ;;  %s7303_s1 = inlined_call_operand.vmem [shape: f32[1152,48], index: 1, kind: input, shape index: {}]   ;;  %s7304_s2 = inlined_call_operand.vmem [shape: f32[1152,1], index: 2, kind: input, shape index: {}]   ;;  %s7305_s3 = inlined_call_operand.vmem [shape: f32[1152,49], index: 3, kind: input, shape index: {}]   ;;  %s7306_s4 = inlined_call_operand.vmem [shape: f32[1152,49], index: 4, kind: output, shape index: {}]  }
   0x1   :  { %v161_v0 = vld [vmem:[%s7302_s0] sm:$0xff]  ;;  %v162_v1 = vld [vmem:[%s7302_s0 + $0x8] sm:$0xff]  ;;  %v163_v2 = vld [vmem:[%s7302_s0 + $0x10] sm:$0xff] }
   0x2   :  { %v4216_v3 = vpack.c.bf16 %v162_v1, %v161_v0  ;;  %v164_v4 = vld [vmem:[%s7302_s0 + $0x18] sm:$0xff]  ;;  %v165_v6 = vld [vmem:[%s7302_s0 + $0x20] sm:$0xff]  ;;  %v166_v7 = vld [vmem:[%s7302_s0 + $0x28] sm:$0xff] }
   0x3   :  { %v4220_v5 = vpack.c.bf16 %v164_v4, %v163_v2  ;;  %v17_v8 = vld [vmem:[%s7303_s1] sm:$0xff]  ;;  %v4224_v10 = vpack.c.bf16 %v166_v7, %v165_v6  ;;  %v18_v11 = vld [vmem:[%s7303_s1 + $0x8] sm:$0xff]  ;;  %v19_v13 = vld [vmem:[%s7303_s1 + $0x10] sm:$0xff] }
   0x4   :  { %4217 = vmatprep.subr.bf16.mxu0 %v4216_v3  ;;  %4228 = vmatprep.subr.bf16.mxu1 %v4216_v3  ;;  %v89_v9 = vld [vmem:[%s7303_s1 + $0x240] sm:$0xff]  ;;  %v90_v12 = vld [vmem:[%s7303_s1 + $0x248] sm:$0xff]  ;;  %v91_v14 = vld [vmem:[%s7303_s1 + $0x250] sm:$0xff] }
   0x5   :  { %4219 = vmatpush3.bf16.msra.mxu0 %v4216_v3  ;;  %4231 = vmatpush3.bf16.msra.mxu1 %v4216_v3  ;;  %v20_v15 = vld [vmem:[%s7303_s1 + $0x18] sm:$0xff]  ;;  %v21_v17 = vld [vmem:[%s7303_s1 + $0x20] sm:$0xff]  ;;  %v22_v19 = vld [vmem:[%s7303_s1 + $0x28] sm:$0xff] }
   0x6   :  { %4221 = vmatprep.subr.bf16.mxu0 %v4220_v5  ;;  %4229 = vmatprep.subr.bf16.mxu1 %v4220_v5  ;;  %v92_v16 = vld [vmem:[%s7303_s1 + $0x258] sm:$0xff]  ;;  %v93_v18 = vld [vmem:[%s7303_s1 + $0x260] sm:$0xff]  ;;  %v94_v20 = vld [vmem:[%s7303_s1 + $0x268] sm:$0xff] }
   0x7   :  { %4000 = vmatprep.mubr.msk.f32.mxu0 %vm311_vm0, %v17_v8  ;;  %4108 = vmatprep.mubr.msk.f32.mxu1 %vm311_vm0, %v89_v9  ;;  %v23_v21 = vld [vmem:[%s7303_s1 + $0x30] sm:$0xff]  ;;  %v24_v23 = vld [vmem:[%s7303_s1 + $0x38] sm:$0xff]  ;;  %v25_v25 = vld [vmem:[%s7303_s1 + $0x40] sm:$0xff] }
   0x8   :  { %v95_v22 = vld [vmem:[%s7303_s1 + $0x270] sm:$0xff]  ;;  %v96_v24 = vld [vmem:[%s7303_s1 + $0x278] sm:$0xff]  ;;  %v97_v26 = vld [vmem:[%s7303_s1 + $0x280] sm:$0xff] }
   0x9   :  { %4223 = vmatpush3.bf16.msra.mxu0 %v4220_v5  ;;  %4232 = vmatpush3.bf16.msra.mxu1 %v4220_v5  ;;  %v26_v27 = vld [vmem:[%s7303_s1 + $0x48] sm:$0xff]  ;;  %v27_v29 = vld [vmem:[%s7303_s1 + $0x50] sm:$0xff]  ;;  %v28_v31 = vld [vmem:[%s7303_s1 + $0x58] sm:$0xff] }
   0xa   :  { %4225 = vmatprep.subr.bf16.mxu0 %v4224_v10  ;;  %4230 = vmatprep.subr.bf16.mxu1 %v4224_v10  ;;  %v98_v28 = vld [vmem:[%s7303_s1 + $0x288] sm:$0xff]  ;;  %v99_v30 = vld [vmem:[%s7303_s1 + $0x290] sm:$0xff]  ;;  %v100_v32 = vld [vmem:[%s7303_s1 + $0x298] sm:$0xff] }
   0xb   :  { %v29_v33 = vld [vmem:[%s7303_s1 + $0x60] sm:$0xff]  ;;  %v30_v35 = vld [vmem:[%s7303_s1 + $0x68] sm:$0xff]  ;;  %v31_v37 = vld [vmem:[%s7303_s1 + $0x70] sm:$0xff] }
   0xc   :  { %v101_v34 = vld [vmem:[%s7303_s1 + $0x2a0] sm:$0xff]  ;;  %v102_v36 = vld [vmem:[%s7303_s1 + $0x2a8] sm:$0xff]  ;;  %v103_v38 = vld [vmem:[%s7303_s1 + $0x2b0] sm:$0xff] }
   0xd   :  { %4227 = vmatpush3.bf16.msra.mxu0 %v4224_v10  ;;  %4233 = vmatpush3.bf16.msra.mxu1 %v4224_v10  ;;  %v32_v39 = vld [vmem:[%s7303_s1 + $0x78] sm:$0xff]  ;;  %v33_v41 = vld [vmem:[%s7303_s1 + $0x80] sm:$0xff]  ;;  %v34_v43 = vld [vmem:[%s7303_s1 + $0x88] sm:$0xff] }
   0xe   :  { %v104_v40 = vld [vmem:[%s7303_s1 + $0x2b8] sm:$0xff]  ;;  %v105_v42 = vld [vmem:[%s7303_s1 + $0x2c0] sm:$0xff]  ;;  %v106_v44 = vld [vmem:[%s7303_s1 + $0x2c8] sm:$0xff] }
   0xf   :  { %v35_v45 = vld [vmem:[%s7303_s1 + $0x90] sm:$0xff]  ;;  %v36_v47 = vld [vmem:[%s7303_s1 + $0x98] sm:$0xff]  ;;  %v37_v49 = vld [vmem:[%s7303_s1 + $0xa0] sm:$0xff] }
  0x10   :  { %4001 = vmatmul.mubr.msk.f32.vlgmr.msra.gmra.mrb[0].mxu0 %vm311_vm0, %v18_v11  ;;  %4109 = vmatmul.mubr.msk.f32.vlgmr.msra.gmra.mrb[0].mxu1 %vm311_vm0, %v90_v12  ;;  %v107_v46 = vld [vmem:[%s7303_s1 + $0x2d0] sm:$0xff]  ;;  %v108_v48 = vld [vmem:[%s7303_s1 + $0x2d8] sm:$0xff]  ;;  %v109_v50 = vld [vmem:[%s7303_s1 + $0x2e0] sm:$0xff] }
  0x11   :  { %4003 = vmatprep.mubr.msk.f32.mxu0 %vm311_vm0, %v19_v13  ;;  %4111 = vmatprep.mubr.msk.f32.mxu1 %vm311_vm0, %v91_v14  ;;  %v38_v51 = vld [vmem:[%s7303_s1 + $0xa8] sm:$0xff]  ;;  %v39_v53 = vld [vmem:[%s7303_s1 + $0xb0] sm:$0xff]  ;;  %v40_v55 = vld [vmem:[%s7303_s1 + $0xb8] sm:$0xff] }
  0x12   :  { %v110_v52 = vld [vmem:[%s7303_s1 + $0x2e8] sm:$0xff]  ;;  %v111_v54 = vld [vmem:[%s7303_s1 + $0x2f0] sm:$0xff]  ;;  %v112_v56 = vld [vmem:[%s7303_s1 + $0x2f8] sm:$0xff] }
  0x13   :  { %v41_v57 = vld [vmem:[%s7303_s1 + $0xc0] sm:$0xff]  ;;  %v42_v59 = vld [vmem:[%s7303_s1 + $0xc8] sm:$0xff]  ;;  %v43_v61 = vld [vmem:[%s7303_s1 + $0xd0] sm:$0xff] }
  0x14   :  { %4004 = vmatmul.mubr.msk.f32.gmra.mrb[2].mxu0 %vm311_vm0, %v20_v15  ;;  %4112 = vmatmul.mubr.msk.f32.gmra.mrb[2].mxu1 %vm311_vm0, %v92_v16  ;;  %v113_v58 = vld [vmem:[%s7303_s1 + $0x300] sm:$0xff]  ;;  %v114_v60 = vld [vmem:[%s7303_s1 + $0x308] sm:$0xff]  ;;  %v115_v62 = vld [vmem:[%s7303_s1 + $0x310] sm:$0xff] }
  0x15   :  { %4006 = vmatprep.mubr.msk.f32.mxu0 %vm311_vm0, %v21_v17  ;;  %4114 = vmatprep.mubr.msk.f32.mxu1 %vm311_vm0, %v93_v18  ;;  %v44_v63 = vld [vmem:[%s7303_s1 + $0xd8] sm:$0xff]  ;;  %v45_v1 = vld [vmem:[%s7303_s1 + $0xe0] sm:$0xff]  ;;  %v46_v3 = vld [vmem:[%s7303_s1 + $0xe8] sm:$0xff] }
  0x16   :  { %v116_v0 = vld [vmem:[%s7303_s1 + $0x318] sm:$0xff]  ;;  %v117_v2 = vld [vmem:[%s7303_s1 + $0x320] sm:$0xff]  ;;  %v118_v4 = vld [vmem:[%s7303_s1 + $0x328] sm:$0xff] }
  0x17   :  { %v47_v5 = vld [vmem:[%s7303_s1 + $0xf0] sm:$0xff]  ;;  %v48_v7 = vld [vmem:[%s7303_s1 + $0xf8] sm:$0xff]  ;;  %v49_v9 = vld [vmem:[%s7303_s1 + $0x100] sm:$0xff] }
  0x18   :  { %4007 = vmatmul.mubr.msk.f32.gmra.mrb[4].mxu0 %vm311_vm0, %v22_v19  ;;  %4115 = vmatmul.mubr.msk.f32.gmra.mrb[4].mxu1 %vm311_vm0, %v94_v20  ;;  %v119_v6 = vld [vmem:[%s7303_s1 + $0x330] sm:$0xff]  ;;  %v120_v8 = vld [vmem:[%s7303_s1 + $0x338] sm:$0xff]  ;;  %v121_v10 = vld [vmem:[%s7303_s1 + $0x340] sm:$0xff] }
  0x19   :  { %4009 = vmatprep.mubr.msk.f32.mxu0 %vm311_vm0, %v23_v21  ;;  %4117 = vmatprep.mubr.msk.f32.mxu1 %vm311_vm0, %v95_v22  ;;  %v50_v11 = vld [vmem:[%s7303_s1 + $0x108] sm:$0xff]  ;;  %v51_v13 = vld [vmem:[%s7303_s1 + $0x110] sm:$0xff]  ;;  %v52_v15 = vld [vmem:[%s7303_s1 + $0x118] sm:$0xff] }
  0x1a   :  { %v122_v12 = vld [vmem:[%s7303_s1 + $0x348] sm:$0xff]  ;;  %v123_v14 = vld [vmem:[%s7303_s1 + $0x350] sm:$0xff]  ;;  %v124_v16 = vld [vmem:[%s7303_s1 + $0x358] sm:$0xff] }
  0x1b   :  { %v53_v17 = vld [vmem:[%s7303_s1 + $0x120] sm:$0xff]  ;;  %v54_v19 = vld [vmem:[%s7303_s1 + $0x128] sm:$0xff]  ;;  %v55_v21 = vld [vmem:[%s7303_s1 + $0x130] sm:$0xff] }
  0x1c   :  { %4010 = vmatmul.mubr.msk.f32.gmra.mrb[6].mxu0 %vm311_vm0, %v24_v23  ;;  %4118 = vmatmul.mubr.msk.f32.gmra.mrb[6].mxu1 %vm311_vm0, %v96_v24  ;;  %v125_v18 = vld [vmem:[%s7303_s1 + $0x360] sm:$0xff]  ;;  %v126_v20 = vld [vmem:[%s7303_s1 + $0x368] sm:$0xff]  ;;  %v127_v22 = vld [vmem:[%s7303_s1 + $0x370] sm:$0xff] }
  0x1d   :  { %4012 = vmatprep.mubr.msk.f32.mxu0 %vm311_vm0, %v25_v25  ;;  %4120 = vmatprep.mubr.msk.f32.mxu1 %vm311_vm0, %v97_v26  ;;  %v56_v23 = vld [vmem:[%s7303_s1 + $0x138] sm:$0xff]  ;;  %v57_v25 = vld [vmem:[%s7303_s1 + $0x140] sm:$0xff] }
  0x1e   :  { %v128_v24 = vld [vmem:[%s7303_s1 + $0x378] sm:$0xff]  ;;  %v129_v26 = vld [vmem:[%s7303_s1 + $0x380] sm:$0xff] }
  0x20   :  { %4013 = vmatmul.mubr.msk.f32.gmra.mrb[8].mxu0 %vm311_vm0, %v26_v27  ;;  %4121 = vmatmul.mubr.msk.f32.gmra.mrb[8].mxu1 %vm311_vm0, %v98_v28  ;;  %v58_v27 = vld [vmem:[%s7303_s1 + $0x148] sm:$0xff] }
  0x21   :  { %4015 = vmatprep.mubr.msk.f32.mxu0 %vm311_vm0, %v27_v29  ;;  %4123 = vmatprep.mubr.msk.f32.mxu1 %vm311_vm0, %v99_v30  ;;  %v130_v28 = vld [vmem:[%s7303_s1 + $0x388] sm:$0xff]  ;;  %v59_v29 = vld [vmem:[%s7303_s1 + $0x150] sm:$0xff] }
  0x22   :  { %v131_v30 = vld [vmem:[%s7303_s1 + $0x390] sm:$0xff] }
  0x24   :  { %4016 = vmatmul.mubr.msk.f32.gmra.mrb[10].mxu0 %vm311_vm0, %v28_v31  ;;  %4124 = vmatmul.mubr.msk.f32.gmra.mrb[10].mxu1 %vm311_vm0, %v100_v32  ;;  %v60_v31 = vld [vmem:[%s7303_s1 + $0x158] sm:$0xff] }
  0x25   :  { %4018 = vmatprep.mubr.msk.f32.mxu0 %vm311_vm0, %v29_v33  ;;  %4126 = vmatprep.mubr.msk.f32.mxu1 %vm311_vm0, %v101_v34  ;;  %v132_v32 = vld [vmem:[%s7303_s1 + $0x398] sm:$0xff]  ;;  %v61_v33 = vld [vmem:[%s7303_s1 + $0x160] sm:$0xff] }
  0x26   :  { %v133_v34 = vld [vmem:[%s7303_s1 + $0x3a0] sm:$0xff] }
  0x28   :  { %4019 = vmatmul.mubr.msk.f32.gmra.mrb[12].mxu0 %vm311_vm0, %v30_v35  ;;  %4127 = vmatmul.mubr.msk.f32.gmra.mrb[12].mxu1 %vm311_vm0, %v102_v36  ;;  %v62_v35 = vld [vmem:[%s7303_s1 + $0x168] sm:$0xff] }
  0x29   :  { %4021 = vmatprep.mubr.msk.f32.mxu0 %vm311_vm0, %v31_v37  ;;  %4129 = vmatprep.mubr.msk.f32.mxu1 %vm311_vm0, %v103_v38  ;;  %v134_v36 = vld [vmem:[%s7303_s1 + $0x3a8] sm:$0xff]  ;;  %v63_v37 = vld [vmem:[%s7303_s1 + $0x170] sm:$0xff] }
  0x2a   :  { %v135_v38 = vld [vmem:[%s7303_s1 + $0x3b0] sm:$0xff] }
  0x2c   :  { %4022 = vmatmul.mubr.msk.f32.gmra.mrb[14].mxu0 %vm311_vm0, %v32_v39  ;;  %4130 = vmatmul.mubr.msk.f32.gmra.mrb[14].mxu1 %vm311_vm0, %v104_v40  ;;  %v64_v39 = vld [vmem:[%s7303_s1 + $0x178] sm:$0xff] }
  0x2d   :  { %4024 = vmatprep.mubr.msk.f32.mxu0 %vm311_vm0, %v33_v41  ;;  %4132 = vmatprep.mubr.msk.f32.mxu1 %vm311_vm0, %v105_v42  ;;  %v136_v40 = vld [vmem:[%s7303_s1 + $0x3b8] sm:$0xff]  ;;  %v65_v41 = vld [vmem:[%s7303_s1 + $0x180] sm:$0xff] }
  0x2e   :  { %v137_v42 = vld [vmem:[%s7303_s1 + $0x3c0] sm:$0xff] }
  0x30   :  { %4025 = vmatmul.mubr.msk.f32.gmra.mrb[16].mxu0 %vm311_vm0, %v34_v43  ;;  %4133 = vmatmul.mubr.msk.f32.gmra.mrb[16].mxu1 %vm311_vm0, %v106_v44  ;;  %v66_v43 = vld [vmem:[%s7303_s1 + $0x188] sm:$0xff] }
  0x31   :  { %4027 = vmatprep.mubr.msk.f32.mxu0 %vm311_vm0, %v35_v45  ;;  %4135 = vmatprep.mubr.msk.f32.mxu1 %vm311_vm0, %v107_v46  ;;  %v138_v44 = vld [vmem:[%s7303_s1 + $0x3c8] sm:$0xff]  ;;  %v67_v45 = vld [vmem:[%s7303_s1 + $0x190] sm:$0xff] }
  0x32   :  { %v139_v46 = vld [vmem:[%s7303_s1 + $0x3d0] sm:$0xff] }
  0x34   :  { %4028 = vmatmul.mubr.msk.f32.gmra.mrb[18].mxu0 %vm311_vm0, %v36_v47  ;;  %4136 = vmatmul.mubr.msk.f32.gmra.mrb[18].mxu1 %vm311_vm0, %v108_v48  ;;  %v68_v47 = vld [vmem:[%s7303_s1 + $0x198] sm:$0xff] }
  0x35   :  { %4030 = vmatprep.mubr.msk.f32.mxu0 %vm311_vm0, %v37_v49  ;;  %4138 = vmatprep.mubr.msk.f32.mxu1 %vm311_vm0, %v109_v50  ;;  %v140_v48 = vld [vmem:[%s7303_s1 + $0x3d8] sm:$0xff]  ;;  %v69_v49 = vld [vmem:[%s7303_s1 + $0x1a0] sm:$0xff] }
  0x36   :  { %v141_v50 = vld [vmem:[%s7303_s1 + $0x3e0] sm:$0xff] }
  0x38   :  { %4031 = vmatmul.mubr.msk.f32.gmra.mrb[20].mxu0 %vm311_vm0, %v38_v51  ;;  %4139 = vmatmul.mubr.msk.f32.gmra.mrb[20].mxu1 %vm311_vm0, %v110_v52  ;;  %v70_v51 = vld [vmem:[%s7303_s1 + $0x1a8] sm:$0xff] }
  0x39   :  { %4033 = vmatprep.mubr.msk.f32.mxu0 %vm311_vm0, %v39_v53  ;;  %4141 = vmatprep.mubr.msk.f32.mxu1 %vm311_vm0, %v111_v54  ;;  %v142_v52 = vld [vmem:[%s7303_s1 + $0x3e8] sm:$0xff]  ;;  %v71_v53 = vld [vmem:[%s7303_s1 + $0x1b0] sm:$0xff] }
  0x3a   :  { %v143_v54 = vld [vmem:[%s7303_s1 + $0x3f0] sm:$0xff] }
  0x3c   :  { %4034 = vmatmul.mubr.msk.f32.gmra.mrb[22].mxu0 %vm311_vm0, %v40_v55  ;;  %4142 = vmatmul.mubr.msk.f32.gmra.mrb[22].mxu1 %vm311_vm0, %v112_v56  ;;  %v72_v55 = vld [vmem:[%s7303_s1 + $0x1b8] sm:$0xff] }
  0x3d   :  { %4036 = vmatprep.mubr.msk.f32.mxu0 %vm311_vm0, %v41_v57  ;;  %4144 = vmatprep.mubr.msk.f32.mxu1 %vm311_vm0, %v113_v58  ;;  %v144_v56 = vld [vmem:[%s7303_s1 + $0x3f8] sm:$0xff]  ;;  %v73_v57 = vld [vmem:[%s7303_s1 + $0x1c0] sm:$0xff] }
  0x3e   :  { %v145_v58 = vld [vmem:[%s7303_s1 + $0x400] sm:$0xff] }
  0x40   :  { %4037 = vmatmul.mubr.msk.f32.gmra.mrb[24].mxu0 %vm311_vm0, %v42_v59  ;;  %4145 = vmatmul.mubr.msk.f32.gmra.mrb[24].mxu1 %vm311_vm0, %v114_v60  ;;  %v74_v59 = vld [vmem:[%s7303_s1 + $0x1c8] sm:$0xff] }
  0x41   :  { %4039 = vmatprep.mubr.msk.f32.mxu0 %vm311_vm0, %v43_v61  ;;  %4147 = vmatprep.mubr.msk.f32.mxu1 %vm311_vm0, %v115_v62  ;;  %v146_v60 = vld [vmem:[%s7303_s1 + $0x408] sm:$0xff]  ;;  %v75_v61 = vld [vmem:[%s7303_s1 + $0x1d0] sm:$0xff] }
  0x42   :  { %v147_v62 = vld [vmem:[%s7303_s1 + $0x410] sm:$0xff] }
  0x44   :  { %4040 = vmatmul.mubr.msk.f32.gmra.mrb[26].mxu0 %vm311_vm0, %v44_v63  ;;  %4148 = vmatmul.mubr.msk.f32.gmra.mrb[26].mxu1 %vm311_vm0, %v116_v0  ;;  %v76_v63 = vld [vmem:[%s7303_s1 + $0x1d8] sm:$0xff] }
  0x45   :  { %4042 = vmatprep.mubr.msk.f32.mxu0 %vm311_vm0, %v45_v1  ;;  %4150 = vmatprep.mubr.msk.f32.mxu1 %vm311_vm0, %v117_v2  ;;  %v148_v0 = vld [vmem:[%s7303_s1 + $0x418] sm:$0xff]  ;;  %v77_v1 = vld [vmem:[%s7303_s1 + $0x1e0] sm:$0xff]  ;;  %v4813_v2 = vmov 0  }
  0x46   :  { %4236 = vset.pattern.permute.xlu1 %v4813_v2  ;;  %4235 = vset.pattern.permute.xlu0 %v4813_v2 }
  0x48   :  { %4043 = vmatmul.mubr.msk.f32.gmra.mrb[28].mxu0 %vm311_vm0, %v46_v3  ;;  %4151 = vmatmul.mubr.msk.f32.gmra.mrb[28].mxu1 %vm311_vm0, %v118_v4  ;;  %v149_v3 = vld [vmem:[%s7303_s1 + $0x420] sm:$0xff]  ;;  %v78_v4 = vld [vmem:[%s7303_s1 + $0x1e8] sm:$0xff] }
  0x49   :  { %4045 = vmatprep.mubr.msk.f32.mxu0 %vm311_vm0, %v47_v5  ;;  %4153 = vmatprep.mubr.msk.f32.mxu1 %vm311_vm0, %v119_v6  ;;  %v150_v5 = vld [vmem:[%s7303_s1 + $0x428] sm:$0xff]  ;;  %v79_v6 = vld [vmem:[%s7303_s1 + $0x1f0] sm:$0xff] }
  0x4c   :  { %4046 = vmatmul.mubr.msk.f32.gmra.mrb[30].mxu0 %vm311_vm0, %v48_v7  ;;  %4154 = vmatmul.mubr.msk.f32.gmra.mrb[30].mxu1 %vm311_vm0, %v120_v8  ;;  %v80_v7 = vld [vmem:[%s7303_s1 + $0x1f8] sm:$0xff]  ;;  %v151_v8 = vld [vmem:[%s7303_s1 + $0x430] sm:$0xff] }
  0x4d   :  { %4048 = vmatprep.mubr.msk.f32.mxu0 %vm311_vm0, %v49_v9  ;;  %4156 = vmatprep.mubr.msk.f32.mxu1 %vm311_vm0, %v121_v10  ;;  %v152_v9 = vld [vmem:[%s7303_s1 + $0x438] sm:$0xff]  ;;  %v81_v10 = vld [vmem:[%s7303_s1 + $0x200] sm:$0xff] }
  0x50   :  { %4049 = vmatmul.mubr.msk.f32.gmra.mrb[32].mxu0 %vm311_vm0, %v50_v11  ;;  %4157 = vmatmul.mubr.msk.f32.gmra.mrb[32].mxu1 %vm311_vm0, %v122_v12  ;;  %v82_v11 = vld [vmem:[%s7303_s1 + $0x208] sm:$0xff]  ;;  %v153_v12 = vld [vmem:[%s7303_s1 + $0x440] sm:$0xff] }
  0x51   :  { %4051 = vmatprep.mubr.msk.f32.mxu0 %vm311_vm0, %v51_v13  ;;  %4159 = vmatprep.mubr.msk.f32.mxu1 %vm311_vm0, %v123_v14  ;;  %v154_v13 = vld [vmem:[%s7303_s1 + $0x448] sm:$0xff]  ;;  %v83_v14 = vld [vmem:[%s7303_s1 + $0x210] sm:$0xff] }
  0x54   :  { %4052 = vmatmul.mubr.msk.f32.gmra.mrb[34].mxu0 %vm311_vm0, %v52_v15  ;;  %4160 = vmatmul.mubr.msk.f32.gmra.mrb[34].mxu1 %vm311_vm0, %v124_v16  ;;  %v84_v15 = vld [vmem:[%s7303_s1 + $0x218] sm:$0xff]  ;;  %v155_v16 = vld [vmem:[%s7303_s1 + $0x450] sm:$0xff] }
  0x55   :  { %4054 = vmatprep.mubr.msk.f32.mxu0 %vm311_vm0, %v53_v17  ;;  %4162 = vmatprep.mubr.msk.f32.mxu1 %vm311_vm0, %v125_v18  ;;  %v156_v17 = vld [vmem:[%s7303_s1 + $0x458] sm:$0xff]  ;;  %v85_v18 = vld [vmem:[%s7303_s1 + $0x220] sm:$0xff] }
  0x58   :  { %4055 = vmatmul.mubr.msk.f32.gmra.mrb[36].mxu0 %vm311_vm0, %v54_v19  ;;  %4163 = vmatmul.mubr.msk.f32.gmra.mrb[36].mxu1 %vm311_vm0, %v126_v20  ;;  %v86_v19 = vld [vmem:[%s7303_s1 + $0x228] sm:$0xff]  ;;  %v157_v20 = vld [vmem:[%s7303_s1 + $0x460] sm:$0xff] }
  0x59   :  { %4057 = vmatprep.mubr.msk.f32.mxu0 %vm311_vm0, %v55_v21  ;;  %4165 = vmatprep.mubr.msk.f32.mxu1 %vm311_vm0, %v127_v22  ;;  %v158_v21 = vld [vmem:[%s7303_s1 + $0x468] sm:$0xff]  ;;  %v87_v22 = vld [vmem:[%s7303_s1 + $0x230] sm:$0xff] }
  0x5c   :  { %4058 = vmatmul.mubr.msk.f32.gmra.mrb[38].mxu0 %vm311_vm0, %v56_v23  ;;  %4166 = vmatmul.mubr.msk.f32.gmra.mrb[38].mxu1 %vm311_vm0, %v128_v24  ;;  %v88_v23 = vld [vmem:[%s7303_s1 + $0x238] sm:$0xff]  ;;  %v159_v24 = vld [vmem:[%s7303_s1 + $0x470] sm:$0xff] }
  0x5d   :  { %4060 = vmatprep.mubr.msk.f32.mxu0 %vm311_vm0, %v57_v25  ;;  %4168 = vmatprep.mubr.msk.f32.mxu1 %vm311_vm0, %v129_v26  ;;  %v160_v25 = vld [vmem:[%s7303_s1 + $0x478] sm:$0xff]  ;;  %v168_v26 = vld [vmem:[%s7304_s2 + $0x8] sm:$0xff] }
  0x60   :  { %4061 = vmatmul.mubr.msk.f32.gmra.mrb[40].mxu0 %vm311_vm0, %v58_v27  ;;  %4169 = vmatmul.mubr.msk.f32.gmra.mrb[40].mxu1 %vm311_vm0, %v130_v28  ;;  %v240_v27 = vld [vmem:[%s7304_s2 + $0x248] sm:$0xff]  ;;  %v167_v28 = vld [vmem:[%s7304_s2] sm:$0xff] }
  0x61   :  { %4063 = vmatprep.mubr.msk.f32.mxu0 %vm311_vm0, %v59_v29  ;;  %4171 = vmatprep.mubr.msk.f32.mxu1 %vm311_vm0, %v131_v30  ;;  %v239_v29 = vld [vmem:[%s7304_s2 + $0x240] sm:$0xff] }
  0x64   :  { %4064 = vmatmul.mubr.msk.f32.gmra.mrb[42].mxu0 %vm311_vm0, %v60_v31  ;;  %4172 = vmatmul.mubr.msk.f32.gmra.mrb[42].mxu1 %vm311_vm0, %v132_v32 }
  0x65   :  { %4066 = vmatprep.mubr.msk.f32.mxu0 %vm311_vm0, %v61_v33  ;;  %4174 = vmatprep.mubr.msk.f32.mxu1 %vm311_vm0, %v133_v34 }
  0x68   :  { %4067 = vmatmul.mubr.msk.f32.gmra.mrb[44].mxu0 %vm311_vm0, %v62_v35  ;;  %4175 = vmatmul.mubr.msk.f32.gmra.mrb[44].mxu1 %vm311_vm0, %v134_v36 }
  0x69   :  { %4069 = vmatprep.mubr.msk.f32.mxu0 %vm311_vm0, %v63_v37  ;;  %4177 = vmatprep.mubr.msk.f32.mxu1 %vm311_vm0, %v135_v38  ;;  %v170_v38 = vld [vmem:[%s7304_s2 + $0x18] sm:$0xff] }
  0x6c   :  { %4070 = vmatmul.mubr.msk.f32.gmra.mrb[46].mxu0 %vm311_vm0, %v64_v39  ;;  %4178 = vmatmul.mubr.msk.f32.gmra.mrb[46].mxu1 %vm311_vm0, %v136_v40  ;;  %v242_v39 = vld [vmem:[%s7304_s2 + $0x258] sm:$0xff] }
  0x6d   :  { %4072 = vmatprep.mubr.msk.f32.mxu0 %vm311_vm0, %v65_v41  ;;  %4180 = vmatprep.mubr.msk.f32.mxu1 %vm311_vm0, %v137_v42  ;;  %v169_v42 = vld [vmem:[%s7304_s2 + $0x10] sm:$0xff] }
  0x70   :  { %4073 = vmatmul.mubr.msk.f32.gmra.mrb[48].mxu0 %vm311_vm0, %v66_v43  ;;  %4181 = vmatmul.mubr.msk.f32.gmra.mrb[48].mxu1 %vm311_vm0, %v138_v44  ;;  %v241_v43 = vld [vmem:[%s7304_s2 + $0x250] sm:$0xff] }
  0x71   :  { %4075 = vmatprep.mubr.msk.f32.mxu0 %vm311_vm0, %v67_v45  ;;  %4183 = vmatprep.mubr.msk.f32.mxu1 %vm311_vm0, %v139_v46 }
  0x74   :  { %4076 = vmatmul.mubr.msk.f32.gmra.mrb[50].mxu0 %vm311_vm0, %v68_v47  ;;  %4184 = vmatmul.mubr.msk.f32.gmra.mrb[50].mxu1 %vm311_vm0, %v140_v48 }
  0x75   :  { %4078 = vmatprep.mubr.msk.f32.mxu0 %vm311_vm0, %v69_v49  ;;  %4186 = vmatprep.mubr.msk.f32.mxu1 %vm311_vm0, %v141_v50 }
  0x78   :  { %4079 = vmatmul.mubr.msk.f32.gmra.mrb[52].mxu0 %vm311_vm0, %v70_v51  ;;  %4187 = vmatmul.mubr.msk.f32.gmra.mrb[52].mxu1 %vm311_vm0, %v142_v52 }
  0x79   :  { %4081 = vmatprep.mubr.msk.f32.mxu0 %vm311_vm0, %v71_v53  ;;  %4189 = vmatprep.mubr.msk.f32.mxu1 %vm311_vm0, %v143_v54  ;;  %v172_v54 = vld [vmem:[%s7304_s2 + $0x28] sm:$0xff] }
  0x7c   :  { %4082 = vmatmul.mubr.msk.f32.gmra.mrb[54].mxu0 %vm311_vm0, %v72_v55  ;;  %4190 = vmatmul.mubr.msk.f32.gmra.mrb[54].mxu1 %vm311_vm0, %v144_v56  ;;  %v244_v55 = vld [vmem:[%s7304_s2 + $0x268] sm:$0xff] }
  0x7d   :  { %4084 = vmatprep.mubr.msk.f32.mxu0 %vm311_vm0, %v73_v57  ;;  %4192 = vmatprep.mubr.msk.f32.mxu1 %vm311_vm0, %v145_v58  ;;  %v171_v58 = vld [vmem:[%s7304_s2 + $0x20] sm:$0xff] }
  0x80   :  { %4085 = vmatmul.mubr.msk.f32.gmra.mrb[56].mxu0 %vm311_vm0, %v74_v59  ;;  %4193 = vmatmul.mubr.msk.f32.gmra.mrb[56].mxu1 %vm311_vm0, %v146_v60  ;;  %v243_v59 = vld [vmem:[%s7304_s2 + $0x260] sm:$0xff] }
  0x81   :  { %4087 = vmatprep.mubr.msk.f32.mxu0 %vm311_vm0, %v75_v61  ;;  %4195 = vmatprep.mubr.msk.f32.mxu1 %vm311_vm0, %v147_v62 }
  0x84   :  { %4088 = vmatmul.mubr.msk.f32.gmra.mrb[58].mxu0 %vm311_vm0, %v76_v63  ;;  %4196 = vmatmul.mubr.msk.f32.gmra.mrb[58].mxu1 %vm311_vm0, %v148_v0 }
  0x85   :  { %4090 = vmatprep.mubr.msk.f32.mxu0 %vm311_vm0, %v77_v1  ;;  %4198 = vmatprep.mubr.msk.f32.mxu1 %vm311_vm0, %v149_v3 }
  0x88   :  { %4091 = vmatmul.mubr.msk.f32.gmra.mrb[60].mxu0 %vm311_vm0, %v78_v4  ;;  %4199 = vmatmul.mubr.msk.f32.gmra.mrb[60].mxu1 %vm311_vm0, %v150_v5 }
  0x89   :  { %4093 = vmatprep.mubr.msk.f32.mxu0 %vm311_vm0, %v79_v6  ;;  %4201 = vmatprep.mubr.msk.f32.mxu1 %vm311_vm0, %v151_v8  ;;  %v174_v6 = vld [vmem:[%s7304_s2 + $0x38] sm:$0xff] }
  0x8c   :  { %4094 = vmatmul.mubr.msk.f32.gmra.mrb[62].mxu0 %vm311_vm0, %v80_v7  ;;  %4202 = vmatmul.mubr.msk.f32.gmra.mrb[62].mxu1 %vm311_vm0, %v152_v9 }
  0x8d   :  { %4096 = vmatprep.mubr.msk.f32.mxu0 %vm311_vm0, %v81_v10  ;;  %4204 = vmatprep.mubr.msk.f32.mxu1 %vm311_vm0, %v153_v12 }
  0x90   :  { %4097 = vmatmul.mubr.msk.f32.gmra.mrb[64].mxu0 %vm311_vm0, %v82_v11  ;;  %4205 = vmatmul.mubr.msk.f32.gmra.mrb[64].mxu1 %vm311_vm0, %v154_v13 }
  0x91   :  { %4099 = vmatprep.mubr.msk.f32.mxu0 %vm311_vm0, %v83_v14  ;;  %4207 = vmatprep.mubr.msk.f32.mxu1 %vm311_vm0, %v155_v16 }
  0x94   :  { %4100 = vmatmul.mubr.msk.f32.gmra.mrb[66].mxu0 %vm311_vm0, %v84_v15  ;;  %4208 = vmatmul.mubr.msk.f32.gmra.mrb[66].mxu1 %vm311_vm0, %v156_v17 }
  0x95   :  { %4102 = vmatprep.mubr.msk.f32.mxu0 %vm311_vm0, %v85_v18  ;;  %4210 = vmatprep.mubr.msk.f32.mxu1 %vm311_vm0, %v157_v20 }
  0x98   :  { %4103 = vmatmul.mubr.msk.f32.gmra.mrb[68].mxu0 %vm311_vm0, %v86_v19  ;;  %4211 = vmatmul.mubr.msk.f32.gmra.mrb[68].mxu1 %vm311_vm0, %v158_v21 }
  0x99   :  { %4105 = vmatprep.mubr.msk.f32.mxu0 %vm311_vm0, %v87_v22  ;;  %4213 = vmatprep.mubr.msk.f32.mxu1 %vm311_vm0, %v159_v24 }
  0x9c   :  { %4106 = vmatmul.mubr.msk.f32.gmra.mrb[70].mxu0 %vm311_vm0, %v88_v23  ;;  %4214 = vmatmul.mubr.msk.f32.gmra.mrb[70].mxu1 %vm311_vm0, %v160_v25 }
  0xe3   :  { %v4002_v30 = vpop.f32.mrb[0].mxu0  ;;  %v4110_v31 = vpop.f32.mrb[0].mxu1 }
  0xe4   :  { %v816_v32 = vadd.f32 %v4002_v30, %v168_v26  ;;  %v1176_v33 = vadd.f32 %v4110_v31, %v240_v27  ;;  %v810_v34 = vpop.f32.mrb[1].mxu0  ;;  %v1170_v35 = vpop.f32.mrb[1].mxu1 }
  0xe5   :  { %v811_v36 = vadd.f32 %v810_v34, %v167_v28  ;;  %v1171_v37 = vadd.f32 %v1170_v35, %v239_v29 }
  0xe6   :  { %v3695_v40 = vmul.f32 -1.442695, %v816_v32  ;;  %v3767_v41 = vmul.f32 -1.442695, %v1176_v33  ;;  %v173_v32 = vld [vmem:[%s7304_s2 + $0x30] sm:$0xff] }
  0xe7   :  { %v3694_v44 = vmul.f32 -1.442695, %v811_v36  ;;  %v3766_v45 = vmul.f32 -1.442695, %v1171_v37  ;;  %v4005_v46 = vpop.f32.mrb[2].mxu0  ;;  %v4113_v47 = vpop.f32.mrb[2].mxu1 }
  0xe8   :  { %4237 = vpow2.f32 %v3695_v40  ;;  %v826_v48 = vadd.f32 %v4005_v46, %v170_v38  ;;  %v820_v49 = vpop.f32.mrb[3].mxu0  ;;  %v1186_v50 = vadd.f32 %v4113_v47, %v242_v39  ;;  %v1180_v51 = vpop.f32.mrb[3].mxu1  ;;  %v246_v36 = vld [vmem:[%s7304_s2 + $0x278] sm:$0xff]  ;;  %v176_v46 = vld [vmem:[%s7304_s2 + $0x48] sm:$0xff] }
  0xe9   :  { %4239 = vpow2.f32 %v3767_v41  ;;  %v821_v52 = vadd.f32 %v820_v49, %v169_v42  ;;  %v1181_v53 = vadd.f32 %v1180_v51, %v241_v43  ;;  %v245_v41 = vld [vmem:[%s7304_s2 + $0x270] sm:$0xff] }
  0xea   :  { %4241 = vpow2.f32 %v3694_v44  ;;  %v3697_v56 = vmul.f32 -1.442695, %v826_v48  ;;  %v3769_v57 = vmul.f32 -1.442695, %v1186_v50  ;;  %v175_v50 = vld [vmem:[%s7304_s2 + $0x40] sm:$0xff] }
  0xeb   :  { %4243 = vpow2.f32 %v3766_v45  ;;  %v3696_v60 = vmul.f32 -1.442695, %v821_v52  ;;  %v3768_v61 = vmul.f32 -1.442695, %v1181_v53  ;;  %v4008_v62 = vpop.f32.mrb[4].mxu0  ;;  %v4116_v63 = vpop.f32.mrb[4].mxu1 }
  0xec   :  { %4245 = vpow2.f32 %v3697_v56  ;;  %v836_v0 = vadd.f32 %v4008_v62, %v172_v54  ;;  %v830_v1 = vpop.f32.mrb[5].mxu0  ;;  %v1196_v2 = vadd.f32 %v4116_v63, %v244_v55  ;;  %v1190_v3 = vpop.f32.mrb[5].mxu1  ;;  %v248_v55 = vld [vmem:[%s7304_s2 + $0x288] sm:$0xff] }
  0xed   :  { %4247 = vpow2.f32 %v3696_v60  ;;  %v831_v4 = vadd.f32 %v830_v1, %v171_v58  ;;  %v1191_v5 = vadd.f32 %v1190_v3, %v243_v59  ;;  %v178_v3 = vld [vmem:[%s7304_s2 + $0x58] sm:$0xff] }
  0xee   :  { %4249 = vpow2.f32 %v3769_v57  ;;  %v3699_v7 = vmul.f32 -1.442695, %v836_v0  ;;  %v3771_v8 = vmul.f32 -1.442695, %v1196_v2 }
  0xef   :  { %4251 = vpow2.f32 %v3768_v61  ;;  %v3698_v9 = vmul.f32 -1.442695, %v831_v4  ;;  %v3770_v10 = vmul.f32 -1.442695, %v1191_v5  ;;  %v4011_v11 = vpop.f32.mrb[6].mxu0  ;;  %v4119_v12 = vpop.f32.mrb[6].mxu1 }
  0xf0   :  { %4253 = vpow2.f32 %v3699_v7  ;;  %v846_v13 = vadd.f32 %v4011_v11, %v174_v6  ;;  %v840_v14 = vpop.f32.mrb[7].mxu0  ;;  %v1200_v15 = vpop.f32.mrb[7].mxu1  ;;  %v1206_v49 = vadd.f32 %v4119_v12, %v246_v36  ;;  %v247_v61 = vld [vmem:[%s7304_s2 + $0x280] sm:$0xff] }
  0xf1   :  { %4255 = vpow2.f32 %v3698_v9  ;;  %v841_v45 = vadd.f32 %v840_v14, %v173_v32  ;;  %v1201_v54 = vadd.f32 %v1200_v15, %v245_v41 }
  0xf2   :  { %v4238_v16 = vpop.eup %4237  ;;  %4257 = vpow2.f32 %v3771_v8  ;;  %v3701_v17 = vmul.f32 -1.442695, %v846_v13  ;;  %v3773_v6 = vmul.f32 -1.442695, %v1206_v49  ;;  %v177_v8 = vld [vmem:[%s7304_s2 + $0x50] sm:$0xff]  ;;  %v250_v13 = vld [vmem:[%s7304_s2 + $0x298] sm:$0xff] }
  0xf3   :  { %v4240_v18 = vpop.eup %4239  ;;  %v1962_v19 = vadd.f32 1.0, %v4238_v16  ;;  %4259 = vpow2.f32 %v3770_v10  ;;  %v4014_v20 = vpop.f32.mrb[8].mxu0  ;;  %v3700_v1 = vmul.f32 -1.442695, %v841_v45  ;;  %v3772_v11 = vmul.f32 -1.442695, %v1201_v54 }
  0xf4   :  { %v4242_v21 = vpop.eup %4241  ;;  %v2034_v22 = vadd.f32 1.0, %v4240_v18  ;;  %4261 = vpow2.f32 %v3701_v17  ;;  %v850_v23 = vpop.f32.mrb[9].mxu0  ;;  %v856_v60 = vadd.f32 %v4014_v20, %v176_v46 }
  0xf5   :  { %v4122_v24 = vpop.f32.mrb[8].mxu1  ;;  %v4244_v25 = vpop.eup %4243  ;;  %4263 = vrcp.f32 %v1962_v19  ;;  %v1961_v26 = vadd.f32 1.0, %v4242_v21  ;;  %v851_v2 = vadd.f32 %v850_v23, %v175_v50  ;;  %v249_v19 = vld [vmem:[%s7304_s2 + $0x290] sm:$0xff] }
  0xf6   :  { %v1210_v27 = vpop.f32.mrb[9].mxu1  ;;  %v4246_v28 = vpop.eup %4245  ;;  %4265 = vrcp.f32 %v2034_v22  ;;  %v2033_v29 = vadd.f32 1.0, %v4244_v25  ;;  %v1216_v7 = vadd.f32 %v4122_v24, %v248_v55  ;;  %v3703_v17 = vmul.f32 -1.442695, %v856_v60  ;;  %v180_v24 = vld [vmem:[%s7304_s2 + $0x68] sm:$0xff] }
  0xf7   :  { %v4248_v30 = vpop.eup %4247  ;;  %4267 = vrcp.f32 %v1961_v26  ;;  %v1964_v31 = vadd.f32 1.0, %v4246_v28  ;;  %v4017_v33 = vpop.f32.mrb[10].mxu0  ;;  %v1211_v12 = vadd.f32 %v1210_v27, %v247_v61  ;;  %v3702_v22 = vmul.f32 -1.442695, %v851_v2  ;;  %v179_v28 = vld [vmem:[%s7304_s2 + $0x60] sm:$0xff] }
  0xf8   :  { %v4250_v34 = vpop.eup %4249  ;;  %4269 = vrcp.f32 %v2033_v29  ;;  %v1963_v35 = vadd.f32 1.0, %v4248_v30  ;;  %v860_v37 = vpop.f32.mrb[11].mxu0  ;;  %v866_v18 = vadd.f32 %v4017_v33, %v178_v3  ;;  %v3775_v26 = vmul.f32 -1.442695, %v1216_v7 }
  0xf9   :  { %v5478_v38 = vpop.f32.mrb[10].mxu1  ;;  %v4252_v39 = vpop.eup %4251  ;;  %4271 = vrcp.f32 %v1964_v31  ;;  %v2036_v40 = vadd.f32 1.0, %v4250_v34  ;;  %v861_v23 = vadd.f32 %v860_v37, %v177_v8  ;;  %v3774_v32 = vmul.f32 -1.442695, %v1211_v12  ;;  %v252_v12 = vld [vmem:[%s7304_s2 + $0x2a8] sm:$0xff] }
  0xfa   :  { %v5483_v42 = vpop.f32.mrb[11].mxu1  ;;  %v4254_v43 = vpop.eup %4253  ;;  %4273 = vrcp.f32 %v1963_v35  ;;  %v2035_v44 = vadd.f32 1.0, %v4252_v39  ;;  %v1226_v27 = vadd.f32 %v5478_v38, %v250_v13  ;;  %v3705_v37 = vmul.f32 -1.442695, %v866_v18  ;;  %v251_v18 = vld [vmem:[%s7304_s2 + $0x2a0] sm:$0xff] }
  0xfb   :  { %v4256_v47 = vpop.eup %4255  ;;  %4275 = vrcp.f32 %v2036_v40  ;;  %v1966_v48 = vadd.f32 1.0, %v4254_v43  ;;  %v5491_v51 = vpop.f32.mrb[12].mxu0  ;;  %v1221_v33 = vadd.f32 %v5483_v42, %v249_v19  ;;  %v3704_v40 = vmul.f32 -1.442695, %v861_v23 }
  0xfc   :  { %v4258_v52 = vpop.eup %4257  ;;  %4277 = vrcp.f32 %v2035_v44  ;;  %v1965_v53 = vadd.f32 1.0, %v4256_v47  ;;  %v5496_v56 = vpop.f32.mrb[13].mxu0  ;;  %v876_v38 = vadd.f32 %v5491_v51, %v180_v24  ;;  %v3777_v44 = vmul.f32 -1.442695, %v1226_v27  ;;  %v181_v27 = vld [vmem:[%s7304_s2 + $0x70] sm:$0xff] }
  0xfd   :  { %v5498_v57 = vpop.f32.mrb[12].mxu1  ;;  %v4260_v58 = vpop.eup %4259  ;;  %4279 = vrcp.f32 %v1966_v48  ;;  %v2038_v59 = vadd.f32 1.0, %v4258_v52  ;;  %v871_v41 = vadd.f32 %v5496_v56, %v179_v28  ;;  %v3776_v47 = vmul.f32 -1.442695, %v1221_v33 }
  0xfe   :  { %v5503_v62 = vpop.f32.mrb[13].mxu1  ;;  %v4262_v63 = vpop.eup %4261  ;;  %4281 = vrcp.f32 %v1965_v53  ;;  %v2037_v0 = vadd.f32 1.0, %v4260_v58  ;;  %v3707_v51 = vmul.f32 -1.442695, %v876_v38 }
  0xff   :  { %v4264_v4 = vpop.eup %4263  ;;  %4283 = vrcp.f32 %v2038_v59  ;;  %v1968_v5 = vadd.f32 1.0, %v4262_v63  ;;  %v5511_v9 = vpop.f32.mrb[14].mxu0  ;;  %v3706_v53 = vmul.f32 -1.442695, %v871_v41  ;;  %v253_v41 = vld [vmem:[%s7304_s2 + $0x2b0] sm:$0xff] }
 0x100   :  { %v4266_v10 = vpop.eup %4265  ;;  %4285 = vrcp.f32 %v2037_v0  ;;  %2544 = vperm.xlu0 %4235, %v4264_v4   ;;  %v5516_v14 = vpop.f32.mrb[15].mxu0 }
 0x101   :  { %v5518_v15 = vpop.f32.mrb[14].mxu1  ;;  %v4268_v16 = vpop.eup %4267  ;;  %4287 = vrcp.f32 %v1968_v5  ;;  %2904 = vperm.xlu1 %4236, %v4266_v10  }
 0x102   :  { %v5523_v20 = vpop.f32.mrb[15].mxu1  ;;  %v4270_v21 = vpop.eup %4269  ;;  %4289 = vpow2.f32 %v3700_v1 }
 0x103   :  { %v4272_v25 = vpop.eup %4271  ;;  %4291 = vpow2.f32 %v3773_v6  ;;  %v5532_v29 = vpop.f32.mrb[16].mxu0 }
 0x104   :  { %v5534_v30 = vpop.f32.mrb[16].mxu1  ;;  %v4274_v31 = vpop.eup %4273  ;;  %4293 = vpow2.f32 %v3772_v11  ;;  %2539 = vperm.xlu0 %4235, %v4268_v16  }
 0x105   :  { %v5537_v34 = vpop.f32.mrb[17].mxu0  ;;  %v5539_v35 = vpop.f32.mrb[17].mxu1  ;;  %4295 = vpow2.f32 %v3703_v17  ;;  %2554 = vperm.xlu1 %4236, %v4272_v25  }
 0x106   :  { %v4276_v36 = vpop.eup %4275  ;;  %4297 = vpow2.f32 %v3702_v22  ;;  %v182_v22 = vld [vmem:[%s7304_s2 + $0x78] sm:$0xff] }
 0x107   :  { %v4278_v39 = vpop.eup %4277  ;;  %4299 = vpow2.f32 %v3775_v26  ;;  %v5543_v45 = vpop.f32.mrb[18].mxu0  ;;  %v1236_v26 = vadd.f32 %v5498_v57, %v252_v12  ;;  %v186_v12 = vld [vmem:[%s7304_s2 + $0x98] sm:$0xff] }
 0x108   :  { %v4280_v43 = vpop.eup %4279  ;;  %v5545_v42 = vpop.f32.mrb[18].mxu1  ;;  %4301 = vpow2.f32 %v3774_v32  ;;  %2899 = vperm.xlu0 %4235, %v4270_v21  }
 0x109   :  { %v4282_v46 = vpop.eup %4281  ;;  %v5547_v48 = vpop.f32.mrb[19].mxu0  ;;  %2914 = vperm.xlu1 %4236, %v4276_v36   ;;  %4303 = vpow2.f32 %v3705_v37  ;;  %v1231_v36 = vadd.f32 %v5503_v62, %v251_v18  ;;  %v254_v37 = vld [vmem:[%s7304_s2 + $0x2b8] sm:$0xff]  ;;  %v881_v62 = vadd.f32 %v5516_v14, %v181_v27 }
 0x10a   :  { %v5549_v49 = vpop.f32.mrb[19].mxu1  ;;  %v4284_v50 = vpop.eup %4283  ;;  %4305 = vpow2.f32 %v3704_v40  ;;  %v886_v40 = vadd.f32 %v5511_v9, %v182_v22  ;;  %v1246_v9 = vadd.f32 %v5518_v15, %v254_v37  ;;  %v256_v15 = vld [vmem:[%s7304_s2 + $0x2c8] sm:$0xff]  ;;  %v258_v27 = vld [vmem:[%s7304_s2 + $0x2d8] sm:$0xff] }
 0x10b   :  { %v4286_v52 = vpop.eup %4285  ;;  %4307 = vpow2.f32 %v3777_v44  ;;  %v5553_v55 = vpop.f32.mrb[20].mxu0 }
 0x10c   :  { %v5551_v54 = vpop.eup %4287  ;;  %v5555_v56 = vpop.f32.mrb[20].mxu1  ;;  %2909 = vperm.xlu0 %4235, %v4278_v39   ;;  %4309 = vpow2.f32 %v3776_v47 }
 0x10d   :  { %v4290_v58 = vpop.eup %4289  ;;  %v5557_v59 = vpop.f32.mrb[21].mxu0  ;;  %2549 = vperm.xlu1 %4236, %v4274_v31   ;;  %4311 = vpow2.f32 %v3707_v51 }
 0x10e   :  { %v5559_v60 = vpop.f32.mrb[21].mxu1  ;;  %v4292_v61 = vpop.eup %4291  ;;  %v1967_v63 = vadd.f32 1.0, %v4290_v58  ;;  %4313 = vpow2.f32 %v3706_v53  ;;  %v183_v53 = vld [vmem:[%s7304_s2 + $0x80] sm:$0xff] }
 0x10f   :  { %v4294_v0 = vpop.eup %4293  ;;  %v2040_v1 = vadd.f32 1.0, %v4292_v61  ;;  %v5561_v4 = vpop.f32.mrb[22].mxu0 }
 0x110   :  { %v4296_v2 = vpop.eup %4295  ;;  %4315 = vrcp.f32 %v1967_v63  ;;  %v2039_v3 = vadd.f32 1.0, %v4294_v0  ;;  %2559 = vperm.xlu0 %4235, %v4282_v46   ;;  %v5563_v7 = vpop.f32.mrb[23].mxu0  ;;  %v184_v46 = vld [vmem:[%s7304_s2 + $0x88] sm:$0xff]  ;;  %v3778_v0 = vmul.f32 -1.442695, %v1231_v36 }
 0x111   :  { %v4298_v5 = vpop.eup %4297  ;;  %4317 = vrcp.f32 %v2040_v1  ;;  %v1970_v6 = vadd.f32 1.0, %v4296_v2  ;;  %v5565_v8 = vpop.f32.mrb[22].mxu1  ;;  %2564 = vperm.xlu1 %4236, %v4280_v43   ;;  %v1241_v1 = vadd.f32 %v5523_v20, %v253_v41  ;;  %v891_v20 = vadd.f32 %v5537_v34, %v183_v53 }
 0x112   :  { %v4300_v10 = vpop.eup %4299  ;;  %4319 = vrcp.f32 %v2039_v3  ;;  %v1969_v11 = vadd.f32 1.0, %v4298_v5  ;;  %v5570_v13 = vpop.f32.mrb[23].mxu1  ;;  %v3709_v5 = vmul.f32 -1.442695, %v886_v40 }
 0x113   :  { %v4302_v16 = vpop.eup %4301  ;;  %4321 = vrcp.f32 %v1970_v6  ;;  %v2042_v17 = vadd.f32 1.0, %v4300_v10  ;;  %v5578_v23 = vpop.f32.mrb[24].mxu0  ;;  %v896_v6 = vadd.f32 %v5532_v29, %v184_v46  ;;  %v255_v10 = vld [vmem:[%s7304_s2 + $0x2c0] sm:$0xff]  ;;  %v3781_v29 = vmul.f32 -1.442695, %v1246_v9 }
 0x114   :  { %v4304_v19 = vpop.eup %4303  ;;  %4323 = vrcp.f32 %v1969_v11  ;;  %v2041_v21 = vadd.f32 1.0, %v4302_v16  ;;  %2919 = vperm.xlu0 %4235, %v4286_v52   ;;  %v5584_v28 = vpop.f32.mrb[25].mxu0  ;;  %v3779_v52 = vmul.f32 -1.442695, %v1236_v26  ;;  %v1251_v26 = vadd.f32 %v5539_v35, %v255_v10 }
 0x115   :  { %v4306_v24 = vpop.eup %4305  ;;  %4325 = vrcp.f32 %v2042_v17  ;;  %v1972_v25 = vadd.f32 1.0, %v4304_v19  ;;  %v5586_v31 = vpop.f32.mrb[24].mxu1  ;;  %2924 = vperm.xlu1 %4236, %v4284_v50   ;;  %v1256_v19 = vadd.f32 %v5534_v30, %v256_v15  ;;  %v3711_v30 = vmul.f32 -1.442695, %v896_v6 }
 0x116   :  { %v4308_v32 = vpop.eup %4307  ;;  %4327 = vrcp.f32 %v2041_v21  ;;  %v1971_v33 = vadd.f32 1.0, %v4306_v24  ;;  %v5592_v38 = vpop.f32.mrb[25].mxu1  ;;  %v185_v21 = vld [vmem:[%s7304_s2 + $0x90] sm:$0xff]  ;;  %v3710_v37 = vmul.f32 -1.442695, %v891_v20 }
 0x117   :  { %v4310_v57 = vpop.eup %4309  ;;  %4329 = vrcp.f32 %v1972_v25  ;;  %v2044_v39 = vadd.f32 1.0, %v4308_v32  ;;  %v5602_v47 = vpop.f32.mrb[26].mxu0  ;;  %v3780_v25 = vmul.f32 -1.442695, %v1241_v1  ;;  %v3783_v41 = vmul.f32 -1.442695, %v1256_v19 }
 0x118   :  { %v4312_v43 = vpop.eup %4311  ;;  %4331 = vrcp.f32 %v1971_v33  ;;  %v2043_v44 = vadd.f32 1.0, %v4310_v57  ;;  %v5608_v58 = vpop.f32.mrb[27].mxu0  ;;  %v906_v33 = vadd.f32 %v5543_v45, %v186_v12  ;;  %v901_v57 = vadd.f32 %v5547_v48, %v185_v21 }
 0x119   :  { %v4314_v50 = vpop.eup %4313  ;;  %4333 = vrcp.f32 %v2044_v39  ;;  %v1974_v51 = vadd.f32 1.0, %v4312_v43  ;;  %v5610_v61 = vpop.f32.mrb[26].mxu1  ;;  %2574 = vperm.xlu1 %4236, %v5551_v54   ;;  %v3708_v54 = vmul.f32 -1.442695, %v881_v62  ;;  %v1266_v43 = vadd.f32 %v5545_v42, %v258_v27 }
 0x11a   :  { %v4316_v14 = vpop.eup %4315  ;;  %4335 = vrcp.f32 %v2043_v44  ;;  %v1973_v63 = vadd.f32 1.0, %v4314_v50  ;;  %v5617_v2 = vpop.f32.mrb[27].mxu1  ;;  %v3782_v45 = vmul.f32 -1.442695, %v1251_v26  ;;  %v3713_v48 = vmul.f32 -1.442695, %v906_v33 }
 0x11b   :  { %v4318_v3 = vpop.eup %4317  ;;  %4337 = vrcp.f32 %v1974_v51  ;;  %2569 = vperm.xlu0 %4235, %v4316_v14   ;;  %v5627_v16 = vpop.f32.mrb[28].mxu0  ;;  %v3785_v14 = vmul.f32 -1.442695, %v1266_v43  ;;  %v257_v26 = vld [vmem:[%s7304_s2 + $0x2d0] sm:$0xff]  ;;  %v188_v33 = vld [vmem:[%s7304_s2 + $0xa8] sm:$0xff] }
 0x11c   :  { %v4320_v11 = vpop.eup %4319  ;;  %4339 = vrcp.f32 %v1973_v63  ;;  %v5629_v17 = vpop.f32.mrb[28].mxu1 }
 0x11d   :  { %v4322_v18 = vpop.eup %4321  ;;  %4341 = vpow2.f32 %v3779_v52  ;;  %v5635_v22 = vpop.f32.mrb[29].mxu0  ;;  %2934 = vperm.xlu1 %4236, %v4318_v3   ;;  %v3712_v52 = vmul.f32 -1.442695, %v901_v57 }
 0x11e   :  { %v5637_v34 = vpop.f32.mrb[29].mxu1  ;;  %v4324_v24 = vpop.eup %4323  ;;  %4343 = vpow2.f32 %v3778_v0 }
 0x11f   :  { %v4326_v32 = vpop.eup %4325  ;;  %4345 = vpow2.f32 %v3709_v5  ;;  %2929 = vperm.xlu0 %4235, %v4320_v11   ;;  %v5645_v39 = vpop.f32.mrb[30].mxu0 }
 0x120   :  { %v4328_v36 = vpop.eup %4327  ;;  %4347 = vpow2.f32 %v3708_v54  ;;  %v5647_v40 = vpop.f32.mrb[30].mxu1 }
 0x121   :  { %v4330_v35 = vpop.eup %4329  ;;  %4349 = vpow2.f32 %v3781_v29  ;;  %v5650_v44 = vpop.f32.mrb[31].mxu0  ;;  %2584 = vperm.xlu1 %4236, %v4322_v18  }
 0x122   :  { %v5652_v62 = vpop.f32.mrb[31].mxu1  ;;  %v4332_v46 = vpop.eup %4331  ;;  %4351 = vpow2.f32 %v3780_v25 }
 0x123   :  { %v4334_v50 = vpop.eup %4333  ;;  %2579 = vperm.xlu0 %4235, %v4324_v24   ;;  %4353 = vpow2.f32 %v3711_v30  ;;  %v5654_v9 = vpop.f32.mrb[32].mxu0 }
 0x124   :  { %v4336_v51 = vpop.eup %4335  ;;  %4355 = vpow2.f32 %v3710_v37  ;;  %v5656_v53 = vpop.f32.mrb[32].mxu1 }
 0x125   :  { %v5658_v42 = vpop.eup %4337  ;;  %4357 = vpow2.f32 %v3783_v41  ;;  %v5660_v63 = vpop.f32.mrb[33].mxu0  ;;  %2944 = vperm.xlu1 %4236, %v4326_v32   ;;  %v187_v41 = vld [vmem:[%s7304_s2 + $0xa0] sm:$0xff] }
 0x126   :  { %v5662_v0 = vpop.f32.mrb[33].mxu1  ;;  %v5664_v1 = vpop.eup %4339  ;;  %4359 = vpow2.f32 %v3782_v45 }
 0x127   :  { %v4342_v15 = vpop.eup %4341  ;;  %2939 = vperm.xlu0 %4235, %v4328_v36   ;;  %4361 = vpow2.f32 %v3713_v48  ;;  %v5666_v6 = vpop.f32.mrb[34].mxu0  ;;  %v1261_v48 = vadd.f32 %v5549_v49, %v257_v26  ;;  %v911_v49 = vadd.f32 %v5557_v59, %v187_v41  ;;  %v261_v41 = vld [vmem:[%s7304_s2 + $0x2f0] sm:$0xff] }
 0x128   :  { %v4344_v3 = vpop.eup %4343  ;;  %v2046_v5 = vadd.f32 1.0, %v4342_v15  ;;  %4363 = vpow2.f32 %v3712_v52  ;;  %v5668_v54 = vpop.f32.mrb[35].mxu0  ;;  %v260_v52 = vld [vmem:[%s7304_s2 + $0x2e8] sm:$0xff] }
 0x129   :  { %v4346_v10 = vpop.eup %4345  ;;  %v2045_v11 = vadd.f32 1.0, %v4344_v3  ;;  %4365 = vpow2.f32 %v3785_v14  ;;  %v5670_v20 = vpop.f32.mrb[34].mxu1  ;;  %2594 = vperm.xlu1 %4236, %v4330_v35   ;;  %v259_v3 = vld [vmem:[%s7304_s2 + $0x2e0] sm:$0xff] }
 0x12a   :  { %v4348_v12 = vpop.eup %4347  ;;  %4367 = vrcp.f32 %v2046_v5  ;;  %v1976_v18 = vadd.f32 1.0, %v4346_v10  ;;  %v5672_v29 = vpop.f32.mrb[35].mxu1 }
 0x12b   :  { %v4350_v19 = vpop.eup %4349  ;;  %4369 = vrcp.f32 %v2045_v11  ;;  %v1975_v21 = vadd.f32 1.0, %v4348_v12  ;;  %2589 = vperm.xlu0 %4235, %v4332_v46   ;;  %v5677_v27 = vpop.f32.mrb[36].mxu0  ;;  %v190_v11 = vld [vmem:[%s7304_s2 + $0xb8] sm:$0xff] }
 0x12c   :  { %v4352_v24 = vpop.eup %4351  ;;  %4371 = vrcp.f32 %v1976_v18  ;;  %v2048_v25 = vadd.f32 1.0, %v4350_v19  ;;  %v5682_v36 = vpop.f32.mrb[37].mxu0 }
 0x12d   :  { %v4354_v32 = vpop.eup %4353  ;;  %4373 = vrcp.f32 %v1975_v21  ;;  %v2047_v30 = vadd.f32 1.0, %v4352_v24  ;;  %v5684_v37 = vpop.f32.mrb[36].mxu1  ;;  %2954 = vperm.xlu1 %4236, %v4334_v50   ;;  %v916_v50 = vadd.f32 %v5553_v55, %v188_v33  ;;  %v1276_v21 = vadd.f32 %v5555_v56, %v260_v52  ;;  %v189_v24 = vld [vmem:[%s7304_s2 + $0xb0] sm:$0xff] }
 0x12e   :  { %v4356_v57 = vpop.eup %4355  ;;  %4375 = vrcp.f32 %v2048_v25  ;;  %v1978_v35 = vadd.f32 1.0, %v4354_v32  ;;  %v5689_v43 = vpop.f32.mrb[37].mxu1  ;;  %v3784_v32 = vmul.f32 -1.442695, %v1261_v48  ;;  %v192_v48 = vld [vmem:[%s7304_s2 + $0xc8] sm:$0xff] }
 0x12f   :  { %v4358_v46 = vpop.eup %4357  ;;  %4377 = vrcp.f32 %v2047_v30  ;;  %v1977_v45 = vadd.f32 1.0, %v4356_v57  ;;  %2949 = vperm.xlu0 %4235, %v4336_v51   ;;  %v5699_v5 = vpop.f32.mrb[38].mxu0  ;;  %v1271_v30 = vadd.f32 %v5559_v60, %v259_v3  ;;  %v3715_v57 = vmul.f32 -1.442695, %v916_v50  ;;  %v191_v3 = vld [vmem:[%s7304_s2 + $0xc0] sm:$0xff] }
 0x130   :  { %v4360_v14 = vpop.eup %4359  ;;  %4379 = vrcp.f32 %v1978_v35  ;;  %v2050_v15 = vadd.f32 1.0, %v4358_v46  ;;  %v5705_v12 = vpop.f32.mrb[39].mxu0  ;;  %v926_v35 = vadd.f32 %v5561_v4, %v190_v11  ;;  %v921_v60 = vadd.f32 %v5563_v7, %v189_v24  ;;  %v264_v11 = vld [vmem:[%s7304_s2 + $0x308] sm:$0xff] }
 0x131   :  { %v4362_v10 = vpop.eup %4361  ;;  %4381 = vrcp.f32 %v1977_v45  ;;  %v2049_v51 = vadd.f32 1.0, %v4360_v14  ;;  %v5707_v18 = vpop.f32.mrb[38].mxu1  ;;  %2604 = vperm.xlu1 %4236, %v5658_v42   ;;  %v262_v42 = vld [vmem:[%s7304_s2 + $0x2f8] sm:$0xff] }
 0x132   :  { %v4364_v55 = vpop.eup %4363  ;;  %4383 = vrcp.f32 %v2050_v15  ;;  %v1980_v19 = vadd.f32 1.0, %v4362_v10  ;;  %v5714_v59 = vpop.f32.mrb[39].mxu1  ;;  %v3787_v15 = vmul.f32 -1.442695, %v1276_v21  ;;  %v1286_v50 = vadd.f32 %v5565_v8, %v262_v42  ;;  %v263_v21 = vld [vmem:[%s7304_s2 + $0x300] sm:$0xff] }
 0x133   :  { %v4366_v25 = vpop.eup %4365  ;;  %4385 = vrcp.f32 %v2049_v51  ;;  %v1979_v26 = vadd.f32 1.0, %v4364_v55  ;;  %2599 = vperm.xlu0 %4235, %v5664_v1   ;;  %v5725_v46 = vpop.f32.mrb[40].mxu0  ;;  %v3714_v1 = vmul.f32 -1.442695, %v911_v49  ;;  %v3786_v51 = vmul.f32 -1.442695, %v1271_v30 }
 0x134   :  { %v4368_v33 = vpop.eup %4367  ;;  %4387 = vrcp.f32 %v1980_v19  ;;  %v2052_v56 = vadd.f32 1.0, %v4366_v25  ;;  %v5731_v52 = vpop.f32.mrb[41].mxu0  ;;  %v1281_v49 = vadd.f32 %v5570_v13, %v261_v41  ;;  %v3717_v19 = vmul.f32 -1.442695, %v926_v35 }
 0x135   :  { %v4370_v45 = vpop.eup %4369  ;;  %4389 = vrcp.f32 %v1979_v26  ;;  %v5733_v14 = vpop.f32.mrb[40].mxu1  ;;  %2964 = vperm.xlu1 %4236, %v4368_v33   ;;  %v936_v8 = vadd.f32 %v5578_v23, %v192_v48  ;;  %v3716_v13 = vmul.f32 -1.442695, %v921_v60  ;;  %v3789_v23 = vmul.f32 -1.442695, %v1286_v50 }
 0x136   :  { %v4372_v4 = vpop.eup %4371  ;;  %4391 = vrcp.f32 %v2052_v56  ;;  %v5739_v10 = vpop.f32.mrb[41].mxu1  ;;  %v1296_v56 = vadd.f32 %v5586_v31, %v264_v11  ;;  %v3788_v35 = vmul.f32 -1.442695, %v1281_v49  ;;  %v1291_v41 = vadd.f32 %v5592_v38, %v263_v21 }
 0x137   :  { %v4374_v7 = vpop.eup %4373  ;;  %4393 = vpow2.f32 %v3784_v32  ;;  %2959 = vperm.xlu0 %4235, %v4370_v45   ;;  %v5749_v24 = vpop.f32.mrb[42].mxu0  ;;  %v931_v32 = vadd.f32 %v5584_v28, %v191_v3 }
 0x138   :  { %v4376_v55 = vpop.eup %4375  ;;  %4395 = vpow2.f32 %v3715_v57  ;;  %v5751_v25 = vpop.f32.mrb[42].mxu1  ;;  %v3791_v3 = vmul.f32 -1.442695, %v1296_v56  ;;  %v3790_v38 = vmul.f32 -1.442695, %v1291_v41 }
 0x139   :  { %v4378_v26 = vpop.eup %4377  ;;  %4397 = vpow2.f32 %v3714_v1  ;;  %v5754_v30 = vpop.f32.mrb[43].mxu0  ;;  %2614 = vperm.xlu1 %4236, %v4372_v4   ;;  %v3719_v1 = vmul.f32 -1.442695, %v936_v8 }
 0x13a   :  { %v5756_v42 = vpop.f32.mrb[43].mxu1  ;;  %v4380_v33 = vpop.eup %4379  ;;  %4399 = vpow2.f32 %v3787_v15  ;;  %v3718_v15 = vmul.f32 -1.442695, %v931_v32 }
 0x13b   :  { %v4382_v57 = vpop.eup %4381  ;;  %4401 = vpow2.f32 %v3786_v51  ;;  %2609 = vperm.xlu0 %4235, %v4374_v7   ;;  %v5760_v28 = vpop.f32.mrb[44].mxu0 }
 0x13c   :  { %v4384_v45 = vpop.eup %4383  ;;  %4403 = vpow2.f32 %v3717_v19  ;;  %v5762_v60 = vpop.f32.mrb[44].mxu1 }
 0x13d   :  { %v4386_v48 = vpop.eup %4385  ;;  %4405 = vpow2.f32 %v3716_v13  ;;  %v5764_v4 = vpop.f32.mrb[45].mxu0  ;;  %2974 = vperm.xlu1 %4236, %v4376_v55  }
 0x13e   :  { %v5766_v50 = vpop.f32.mrb[45].mxu1  ;;  %v4388_v31 = vpop.eup %4387  ;;  %4407 = vpow2.f32 %v3789_v23 }
 0x13f   :  { %v4390_v7 = vpop.eup %4389  ;;  %2969 = vperm.xlu0 %4235, %v4378_v26   ;;  %4409 = vpow2.f32 %v3788_v35  ;;  %v5770_v49 = vpop.f32.mrb[46].mxu0 }
 0x140   :  { %v5768_v51 = vpop.eup %4391  ;;  %4411 = vpow2.f32 %v3719_v1  ;;  %v5772_v11 = vpop.f32.mrb[46].mxu1 }
 0x141   :  { %7307 = vst [vmem:[#allocation2_spill] sm:$0xff] %v5772_v11  ;;  %v4394_v19 = vpop.eup %4393  ;;  %4413 = vpow2.f32 %v3718_v15  ;;  %v5774_v8 = vpop.f32.mrb[47].mxu0  ;;  %2624 = vperm.xlu1 %4236, %v4380_v33  }
 0x142   :  { %v5776_v21 = vpop.f32.mrb[47].mxu1  ;;  %v4396_v55 = vpop.eup %4395  ;;  %v2051_v13 = vadd.f32 1.0, %v4394_v19  ;;  %4415 = vpow2.f32 %v3791_v3 }
 0x143   :  { %7308 = vst [vmem:[#allocation3_spill] sm:$0xff] %v5776_v21  ;;  %v4398_v26 = vpop.eup %4397  ;;  %v1982_v32 = vadd.f32 1.0, %v4396_v55  ;;  %2619 = vperm.xlu0 %4235, %v4382_v57   ;;  %4417 = vpow2.f32 %v3790_v38  ;;  %v5778_v35 = vpop.f32.mrb[48].mxu0  ;;  %v194_v57 = vld [vmem:[%s7304_s2 + $0xd8] sm:$0xff]  ;;  %v193_v55 = vld [vmem:[%s7304_s2 + $0xd0] sm:$0xff] }
 0x144   :  { %v4400_v23 = vpop.eup %4399  ;;  %4419 = vrcp.f32 %v2051_v13  ;;  %v1981_v56 = vadd.f32 1.0, %v4398_v26  ;;  %v5780_v15 = vpop.f32.mrb[49].mxu0 }
 0x145   :  { %v4402_v41 = vpop.eup %4401  ;;  %4421 = vrcp.f32 %v1982_v32  ;;  %v2054_v1 = vadd.f32 1.0, %v4400_v23  ;;  %v5782_v11 = vpop.f32.mrb[48].mxu1  ;;  %2984 = vperm.xlu1 %4236, %v4384_v45   ;;  %v266_v45 = vld [vmem:[%s7304_s2 + $0x318] sm:$0xff] }
 0x146   :  { %v4404_v21 = vpop.eup %4403  ;;  %4423 = vrcp.f32 %v1981_v56  ;;  %v2053_v33 = vadd.f32 1.0, %v4402_v41  ;;  %v5787_v3 = vpop.f32.mrb[49].mxu1  ;;  %v946_v41 = vadd.f32 %v5602_v47, %v194_v57 }
 0x147   :  { %7309 = vst [vmem:[#allocation4_spill] sm:$0xff] %v5787_v3  ;;  %v4406_v38 = vpop.eup %4405  ;;  %4425 = vrcp.f32 %v2054_v1  ;;  %v1984_v19 = vadd.f32 1.0, %v4404_v21  ;;  %2979 = vperm.xlu0 %4235, %v4386_v48   ;;  %v5795_v32 = vpop.f32.mrb[50].mxu0  ;;  %v265_v48 = vld [vmem:[%s7304_s2 + $0x310] sm:$0xff]  ;;  %v941_v3 = vadd.f32 %v5608_v58, %v193_v55  ;;  %v268_v55 = vld [vmem:[%s7304_s2 + $0x328] sm:$0xff] }
 0x148   :  { %v4408_v13 = vpop.eup %4407  ;;  %4427 = vrcp.f32 %v2053_v33  ;;  %v1983_v26 = vadd.f32 1.0, %v4406_v38  ;;  %v5801_v21 = vpop.f32.mrb[51].mxu0  ;;  %v1301_v58 = vadd.f32 %v5617_v2, %v265_v48 }
 0x149   :  { %v4410_v23 = vpop.eup %4409  ;;  %4429 = vrcp.f32 %v1984_v19  ;;  %v2056_v56 = vadd.f32 1.0, %v4408_v13  ;;  %7310 = vst [vmem:[#allocation5_spill] sm:$0xff] %v5801_v21  ;;  %v5803_v1 = vpop.f32.mrb[50].mxu1  ;;  %2634 = vperm.xlu1 %4236, %v4388_v31   ;;  %v196_v19 = vld [vmem:[%s7304_s2 + $0xe8] sm:$0xff]  ;;  %v1306_v21 = vadd.f32 %v5610_v61, %v266_v45  ;;  %v267_v45 = vld [vmem:[%s7304_s2 + $0x320] sm:$0xff] }
 0x14a   :  { %7311 = vst [vmem:[#allocation6_spill] sm:$0xff] %v5803_v1  ;;  %v4412_v33 = vpop.eup %4411  ;;  %4431 = vrcp.f32 %v1983_v26  ;;  %v2055_v38 = vadd.f32 1.0, %v4410_v23  ;;  %v5809_v13 = vpop.f32.mrb[51].mxu1  ;;  %v195_v26 = vld [vmem:[%s7304_s2 + $0xe0] sm:$0xff]  ;;  %v956_v61 = vadd.f32 %v5627_v16, %v196_v19  ;;  %v3720_v1 = vmul.f32 -1.442695, %v941_v3 }
 0x14b   :  { %7312 = vst [vmem:[#allocation7_spill] sm:$0xff] %v5809_v13  ;;  %v4414_v47 = vpop.eup %4413  ;;  %4433 = vrcp.f32 %v2056_v56  ;;  %v1986_v57 = vadd.f32 1.0, %v4412_v33  ;;  %2629 = vperm.xlu0 %4235, %v4390_v7   ;;  %v5819_v13 = vpop.f32.mrb[52].mxu0  ;;  %v3721_v33 = vmul.f32 -1.442695, %v946_v41  ;;  %v198_v16 = vld [vmem:[%s7304_s2 + $0xf8] sm:$0xff] }
 0x14c   :  { %v4416_v23 = vpop.eup %4415  ;;  %4435 = vrcp.f32 %v2055_v38  ;;  %v1985_v31 = vadd.f32 1.0, %v4414_v47  ;;  %v5825_v38 = vpop.f32.mrb[53].mxu0  ;;  %v197_v3 = vld [vmem:[%s7304_s2 + $0xf0] sm:$0xff] }
 0x14d   :  { %v4418_v56 = vpop.eup %4417  ;;  %4437 = vrcp.f32 %v1986_v57  ;;  %v2058_v7 = vadd.f32 1.0, %v4416_v23  ;;  %v5827_v47 = vpop.f32.mrb[52].mxu1  ;;  %2994 = vperm.xlu1 %4236, %v5768_v51   ;;  %v951_v57 = vadd.f32 %v5635_v22, %v195_v26  ;;  %v3793_v23 = vmul.f32 -1.442695, %v1306_v21  ;;  %v270_v26 = vld [vmem:[%s7304_s2 + $0x338] sm:$0xff] }
 0x14e   :  { %7313 = vst [vmem:[#allocation8_spill] sm:$0xff] %v5827_v47  ;;  %v4420_v2 = vpop.eup %4419  ;;  %4439 = vrcp.f32 %v1985_v31  ;;  %v2057_v48 = vadd.f32 1.0, %v4418_v56  ;;  %v5834_v41 = vpop.f32.mrb[53].mxu1  ;;  %v1316_v47 = vadd.f32 %v5629_v17, %v268_v55  ;;  %v3792_v51 = vmul.f32 -1.442695, %v1301_v58 }
 0x14f   :  { %7314 = vst [vmem:[#allocation9_spill] sm:$0xff] %v5834_v41  ;;  %v4422_v19 = vpop.eup %4421  ;;  %4441 = vrcp.f32 %v2058_v7  ;;  %2989 = vperm.xlu0 %4235, %v4420_v2   ;;  %v1311_v22 = vadd.f32 %v5637_v34, %v267_v45  ;;  %v5844_v56 = vpop.f32.mrb[54].mxu0  ;;  %v3723_v17 = vmul.f32 -1.442695, %v956_v61  ;;  %v966_v55 = vadd.f32 %v5645_v39, %v198_v16  ;;  %v269_v2 = vld [vmem:[%s7304_s2 + $0x330] sm:$0xff] }
 0x150   :  { %v4424_v31 = vpop.eup %4423  ;;  %4443 = vrcp.f32 %v2057_v48  ;;  %7315 = vst [vmem:[#allocation10_spill] sm:$0xff] %v5844_v56  ;;  %v5846_v7 = vpop.f32.mrb[54].mxu1  ;;  %v3722_v48 = vmul.f32 -1.442695, %v951_v57  ;;  %v961_v56 = vadd.f32 %v5650_v44, %v197_v3  ;;  %v3795_v39 = vmul.f32 -1.442695, %v1316_v47 }
 0x151   :  { %7316 = vst [vmem:[#allocation11_spill] sm:$0xff] %v5846_v7  ;;  %v4426_v21 = vpop.eup %4425  ;;  %4445 = vpow2.f32 %v3721_v33  ;;  %v5852_v58 = vpop.f32.mrb[55].mxu0  ;;  %2644 = vperm.xlu1 %4236, %v4422_v19   ;;  %v200_v33 = vld [vmem:[%s7304_s2 + $0x108] sm:$0xff]  ;;  %v1326_v16 = vadd.f32 %v5647_v40, %v270_v26  ;;  %v3725_v19 = vmul.f32 -1.442695, %v966_v55 }
 0x152   :  { %7317 = vst [vmem:[#allocation12_spill] sm:$0xff] %v5852_v58  ;;  %v5854_v34 = vpop.f32.mrb[55].mxu1  ;;  %v4428_v45 = vpop.eup %4427  ;;  %4447 = vpow2.f32 %v3720_v1  ;;  %v3794_v58 = vmul.f32 -1.442695, %v1311_v22  ;;  %v976_v3 = vadd.f32 %v5654_v9, %v200_v33  ;;  %v3724_v40 = vmul.f32 -1.442695, %v961_v56 }
 0x153   :  { %7318 = vst [vmem:[#allocation13_spill] sm:$0xff] %v5854_v34  ;;  %v4430_v61 = vpop.eup %4429  ;;  %4449 = vpow2.f32 %v3793_v23  ;;  %2639 = vperm.xlu0 %4235, %v4424_v31   ;;  %v1321_v34 = vadd.f32 %v5652_v62, %v269_v2  ;;  %v5862_v1 = vpop.f32.mrb[56].mxu0  ;;  %v3797_v62 = vmul.f32 -1.442695, %v1326_v16 }
 0x154   :  { %v4432_v7 = vpop.eup %4431  ;;  %4451 = vpow2.f32 %v3792_v51  ;;  %v5864_v57 = vpop.f32.mrb[56].mxu1  ;;  %v3727_v55 = vmul.f32 -1.442695, %v976_v3 }
 0x155   :  { %v4434_v44 = vpop.eup %4433  ;;  %4453 = vpow2.f32 %v3723_v17  ;;  %v5867_v41 = vpop.f32.mrb[57].mxu0  ;;  %3004 = vperm.xlu1 %4236, %v4426_v21   ;;  %v3796_v22 = vmul.f32 -1.442695, %v1321_v34 }
 0x156   :  { %v5869_v23 = vpop.f32.mrb[57].mxu1  ;;  %v4436_v47 = vpop.eup %4435  ;;  %4455 = vpow2.f32 %v3722_v48 }
 0x157   :  { %v4438_v31 = vpop.eup %4437  ;;  %2999 = vperm.xlu0 %4235, %v4428_v45   ;;  %4457 = vpow2.f32 %v3795_v39  ;;  %v5871_v26 = vpop.f32.mrb[58].mxu0 }
 0x158   :  { %v4440_v51 = vpop.eup %4439  ;;  %4459 = vpow2.f32 %v3794_v58  ;;  %v5873_v17 = vpop.f32.mrb[58].mxu1 }
 0x159   :  { %v5875_v9 = vpop.eup %4441  ;;  %4461 = vpow2.f32 %v3725_v19  ;;  %v5877_v2 = vpop.f32.mrb[59].mxu0  ;;  %2654 = vperm.xlu1 %4236, %v4430_v61  }
 0x15a   :  { %v5879_v48 = vpop.f32.mrb[59].mxu1  ;;  %v5881_v56 = vpop.eup %4443  ;;  %4463 = vpow2.f32 %v3724_v40 }
 0x15b   :  { %7319 = vst [vmem:[#allocation14_spill] sm:$0xff] %v5879_v48  ;;  %v4446_v21 = vpop.eup %4445  ;;  %2649 = vperm.xlu0 %4235, %v4432_v7   ;;  %4465 = vpow2.f32 %v3797_v62  ;;  %v5883_v45 = vpop.f32.mrb[60].mxu0 }
 0x15c   :  { %v4448_v58 = vpop.eup %4447  ;;  %v1988_v34 = vadd.f32 1.0, %v4446_v21  ;;  %4467 = vpow2.f32 %v3796_v22  ;;  %v5885_v16 = vpop.f32.mrb[61].mxu0 }
 0x15d   :  { %v4450_v33 = vpop.eup %4449  ;;  %v1987_v39 = vadd.f32 1.0, %v4448_v58  ;;  %4469 = vpow2.f32 %v3727_v55  ;;  %v5887_v19 = vpop.f32.mrb[60].mxu1  ;;  %3014 = vperm.xlu1 %4236, %v4434_v44   ;;  %v199_v55 = vld [vmem:[%s7304_s2 + $0x100] sm:$0xff]  ;;  %v272_v44 = vld [vmem:[%s7304_s2 + $0x348] sm:$0xff] }
 0x15e   :  { %v4452_v3 = vpop.eup %4451  ;;  %4471 = vrcp.f32 %v1988_v34  ;;  %v2060_v48 = vadd.f32 1.0, %v4450_v33  ;;  %v5889_v61 = vpop.f32.mrb[61].mxu1 }
 0x15f   :  { %v4454_v7 = vpop.eup %4453  ;;  %4473 = vrcp.f32 %v1987_v39  ;;  %v2059_v40 = vadd.f32 1.0, %v4452_v3  ;;  %3009 = vperm.xlu0 %4235, %v4436_v47   ;;  %v5894_v21 = vpop.f32.mrb[62].mxu0  ;;  %v271_v3 = vld [vmem:[%s7304_s2 + $0x340] sm:$0xff] }
 0x160   :  { %v4456_v62 = vpop.eup %4455  ;;  %4475 = vrcp.f32 %v2060_v48  ;;  %v1990_v22 = vadd.f32 1.0, %v4454_v7  ;;  %7320 = vst [vmem:[#allocation15_spill] sm:$0xff] %v5894_v21  ;;  %v5899_v33 = vpop.f32.mrb[63].mxu0  ;;  %v971_v21 = vadd.f32 %v5660_v63, %v199_v55  ;;  %v274_v63 = vld [vmem:[%s7304_s2 + $0x358] sm:$0xff] }
 0x161   :  { %v4458_v58 = vpop.eup %4457  ;;  %4477 = vrcp.f32 %v2059_v40  ;;  %v1989_v34 = vadd.f32 1.0, %v4456_v62  ;;  %7321 = vst [vmem:[#allocation16_spill] sm:$0xff] %v5899_v33  ;;  %v5901_v39 = vpop.f32.mrb[62].mxu1  ;;  %2664 = vperm.xlu1 %4236, %v4438_v31   ;;  %v1336_v31 = vadd.f32 %v5656_v53, %v272_v44  ;;  %v273_v44 = vld [vmem:[%s7304_s2 + $0x350] sm:$0xff] }
 0x162   :  { %7322 = vst [vmem:[#allocation17_spill] sm:$0xff] %v5901_v39  ;;  %v4460_v47 = vpop.eup %4459  ;;  %4479 = vrcp.f32 %v1990_v22  ;;  %v2062_v48 = vadd.f32 1.0, %v4458_v58  ;;  %v5906_v7 = vpop.f32.mrb[63].mxu1  ;;  %v202_v39 = vld [vmem:[%s7304_s2 + $0x118] sm:$0xff]  ;;  %v201_v58 = vld [vmem:[%s7304_s2 + $0x110] sm:$0xff] }
 0x163   :  { %7323 = vst [vmem:[#allocation18_spill] sm:$0xff] %v5906_v7  ;;  %v4462_v40 = vpop.eup %4461  ;;  %4481 = vrcp.f32 %v1989_v34  ;;  %v2061_v62 = vadd.f32 1.0, %v4460_v47  ;;  %2659 = vperm.xlu0 %4235, %v4440_v51   ;;  %v1331_v51 = vadd.f32 %v5662_v0, %v271_v3  ;;  %v5920_v55 = vpop.f32.mrb[64].mxu0  ;;  %v986_v53 = vadd.f32 %v5666_v6, %v202_v39 }
 0x164   :  { %v4464_v33 = vpop.eup %4463  ;;  %4483 = vrcp.f32 %v2062_v48  ;;  %v1992_v22 = vadd.f32 1.0, %v4462_v40  ;;  %v3726_v40 = vmul.f32 -1.442695, %v971_v21  ;;  %v3799_v39 = vmul.f32 -1.442695, %v1336_v31 }
 0x165   :  { %v4466_v7 = vpop.eup %4465  ;;  %4485 = vrcp.f32 %v2061_v62  ;;  %v1991_v34 = vadd.f32 1.0, %v4464_v33  ;;  %3024 = vperm.xlu1 %4236, %v5875_v9   ;;  %v5927_v33 = vpop.f32.mrb[65].mxu0  ;;  %v981_v62 = vadd.f32 %v5668_v54, %v201_v58  ;;  %v204_v9 = vld [vmem:[%s7304_s2 + $0x128] sm:$0xff]  ;;  %v3798_v21 = vmul.f32 -1.442695, %v1331_v51 }
 0x166   :  { %v4468_v47 = vpop.eup %4467  ;;  %4487 = vrcp.f32 %v1992_v22  ;;  %v2064_v48 = vadd.f32 1.0, %v4466_v7  ;;  %v1346_v22 = vadd.f32 %v5670_v20, %v274_v63  ;;  %v276_v54 = vld [vmem:[%s7304_s2 + $0x368] sm:$0xff]  ;;  %v5942_v58 = vpop.f32.mrb[64].mxu1  ;;  %v3729_v31 = vmul.f32 -1.442695, %v986_v53  ;;  %v275_v63 = vld [vmem:[%s7304_s2 + $0x360] sm:$0xff] }
 0x167   :  { %v4470_v0 = vpop.eup %4469  ;;  %4489 = vrcp.f32 %v1991_v34  ;;  %v2063_v3 = vadd.f32 1.0, %v4468_v47  ;;  %3019 = vperm.xlu0 %4235, %v5881_v56   ;;  %v203_v34 = vld [vmem:[%s7304_s2 + $0x120] sm:$0xff]  ;;  %v1341_v56 = vadd.f32 %v5672_v29, %v273_v44  ;;  %v996_v20 = vadd.f32 %v5677_v27, %v204_v9  ;;  %v205_v9 = vld [vmem:[%s7304_s2 + $0x130] sm:$0xff] }
 0x168   :  { %v4472_v7 = vpop.eup %4471  ;;  %4491 = vrcp.f32 %v2064_v48  ;;  %v1994_v6 = vadd.f32 1.0, %v4470_v0  ;;  %v5948_v0 = vpop.f32.mrb[65].mxu1  ;;  %v3728_v29 = vmul.f32 -1.442695, %v981_v62  ;;  %v991_v44 = vadd.f32 %v5682_v36, %v203_v34 }
 0x169   :  { %v4474_v47 = vpop.eup %4473  ;;  %4493 = vrcp.f32 %v2063_v3  ;;  %2674 = vperm.xlu1 %4236, %v4472_v7   ;;  %7324 = vst [vmem:[#allocation19_spill] sm:$0xff] %v5948_v0  ;;  %v206_v3 = vld [vmem:[%s7304_s2 + $0x138] sm:$0xff]  ;;  %v3801_v53 = vmul.f32 -1.442695, %v1346_v22  ;;  %v1356_v27 = vadd.f32 %v5684_v37, %v276_v54  ;;  %v1351_v62 = vadd.f32 %v5689_v43, %v275_v63 }
 0x16a   :  { %v4476_v48 = vpop.eup %4475  ;;  %4495 = vrcp.f32 %v1994_v6  ;;  %v3731_v34 = vmul.f32 -1.442695, %v996_v20  ;;  %v3730_v54 = vmul.f32 -1.442695, %v991_v44  ;;  %v1001_v0 = vadd.f32 %v5705_v12, %v205_v9 }
 0x16b   :  { %v4478_v51 = vpop.eup %4477  ;;  %4497 = vpow2.f32 %v3726_v40  ;;  %2669 = vperm.xlu0 %4235, %v4474_v47   ;;  %v3800_v40 = vmul.f32 -1.442695, %v1341_v56  ;;  %v5959_v47 = vpop.f32.mrb[66].mxu0  ;;  %v3803_v56 = vmul.f32 -1.442695, %v1356_v27 }
 0x16c   :  { %v4480_v7 = vpop.eup %4479  ;;  %4499 = vpow2.f32 %v3799_v39  ;;  %7325 = vst [vmem:[#allocation20_spill] sm:$0xff] %v5959_v47  ;;  %v1006_v39 = vadd.f32 %v5699_v5, %v206_v3  ;;  %v5962_v22 = vpop.f32.mrb[67].mxu0  ;;  %v3802_v63 = vmul.f32 -1.442695, %v1351_v62 }
 0x16d   :  { %v4482_v6 = vpop.eup %4481  ;;  %4501 = vpow2.f32 %v3798_v21  ;;  %3034 = vperm.xlu1 %4236, %v4476_v48   ;;  %v5965_v47 = vpop.f32.mrb[66].mxu1 }
 0x16e   :  { %v4484_v36 = vpop.eup %4483  ;;  %4503 = vpow2.f32 %v3729_v31  ;;  %v3733_v5 = vmul.f32 -1.442695, %v1006_v39  ;;  %v5967_v31 = vpop.f32.mrb[67].mxu1 }
 0x16f   :  { %v4486_v37 = vpop.eup %4485  ;;  %4505 = vpow2.f32 %v3728_v29  ;;  %3029 = vperm.xlu0 %4235, %v4478_v51   ;;  %v3732_v51 = vmul.f32 -1.442695, %v1001_v0  ;;  %v5971_v44 = vpop.f32.mrb[68].mxu0 }
 0x170   :  { %v4488_v21 = vpop.eup %4487  ;;  %4507 = vpow2.f32 %v3801_v53  ;;  %v5981_v39 = vpop.f32.mrb[68].mxu1 }
 0x171   :  { %v4490_v43 = vpop.eup %4489  ;;  %4509 = vpow2.f32 %v3800_v40  ;;  %2684 = vperm.xlu1 %4236, %v4480_v7   ;;  %v5973_v7 = vpop.f32.mrb[69].mxu0  ;;  %v278_v40 = vld [vmem:[%s7304_s2 + $0x378] sm:$0xff] }
 0x172   :  { %v4492_v48 = vpop.eup %4491  ;;  %4511 = vpow2.f32 %v3731_v34 }
 0x173   :  { %v4494_v20 = vpop.eup %4493  ;;  %2679 = vperm.xlu0 %4235, %v4482_v6   ;;  %4513 = vpow2.f32 %v3730_v54 }
 0x174   :  { %v5969_v29 = vpop.eup %4495  ;;  %4515 = vpow2.f32 %v3803_v56  ;;  %v5983_v56 = vpop.f32.mrb[69].mxu1 }
 0x175   :  { %v4498_v12 = vpop.eup %4497  ;;  %4517 = vpow2.f32 %v3802_v63  ;;  %3044 = vperm.xlu1 %4236, %v4484_v36   ;;  %v277_v36 = vld [vmem:[%s7304_s2 + $0x370] sm:$0xff] }
 0x176   :  { %v4500_v3 = vpop.eup %4499  ;;  %v1993_v53 = vadd.f32 1.0, %v4498_v12  ;;  %4519 = vpow2.f32 %v3733_v5 }
 0x177   :  { %v4502_v27 = vpop.eup %4501  ;;  %v2066_v9 = vadd.f32 1.0, %v4500_v3  ;;  %3039 = vperm.xlu0 %4235, %v4486_v37   ;;  %4521 = vpow2.f32 %v3732_v51  ;;  %v1366_v51 = vadd.f32 %v5707_v18, %v278_v40  ;;  %v280_v40 = vld [vmem:[%s7304_s2 + $0x388] sm:$0xff] }
 0x178   :  { %v4504_v6 = vpop.eup %4503  ;;  %4523 = vrcp.f32 %v1993_v53  ;;  %v2065_v0 = vadd.f32 1.0, %v4502_v27  ;;  %v1361_v53 = vadd.f32 %v5714_v59, %v277_v36  ;;  %v208_v27 = vld [vmem:[%s7304_s2 + $0x148] sm:$0xff] }
 0x179   :  { %v4506_v62 = vpop.eup %4505  ;;  %4525 = vrcp.f32 %v2066_v9  ;;  %v1996_v34 = vadd.f32 1.0, %v4504_v6  ;;  %2694 = vperm.xlu1 %4236, %v4488_v21   ;;  %v207_v6 = vld [vmem:[%s7304_s2 + $0x140] sm:$0xff]  ;;  %v2394_v59 = vld [vmem:[%s7305_s3 + $0x8] sm:$0xff] }
 0x17a   :  { %v4508_v54 = vpop.eup %4507  ;;  %4527 = vrcp.f32 %v2065_v0  ;;  %v1995_v37 = vadd.f32 1.0, %v4506_v62  ;;  %v5993_v0 = vpop.f32.mrb[70].mxu0 }
 0x17b   :  { %v4510_v63 = vpop.eup %4509  ;;  %4529 = vrcp.f32 %v1996_v34  ;;  %v2068_v5 = vadd.f32 1.0, %v4508_v54  ;;  %2689 = vperm.xlu0 %4235, %v4490_v43   ;;  %v6001_v62 = vpop.f32.mrb[71].mxu0  ;;  %v3805_v54 = vmul.f32 -1.442695, %v1366_v51 }
 0x17c   :  { %v4512_v12 = vpop.eup %4511  ;;  %4531 = vrcp.f32 %v1995_v37  ;;  %v2067_v3 = vadd.f32 1.0, %v4510_v63  ;;  %7326 = vst [vmem:[#allocation21_spill] sm:$0xff] %v6001_v62  ;;  %v1016_v37 = vadd.f32 %v5725_v46, %v208_v27  ;;  %v279_v63 = vld [vmem:[%s7304_s2 + $0x380] sm:$0xff]  ;;  %v1376_v27 = vadd.f32 %v5733_v14, %v280_v40  ;;  %v282_v14 = vld [vmem:[%s7304_s2 + $0x398] sm:$0xff] }
 0x17d   :  { %v4514_v9 = vpop.eup %4513  ;;  %4533 = vrcp.f32 %v2068_v5  ;;  %v1998_v21 = vadd.f32 1.0, %v4512_v12  ;;  %3054 = vperm.xlu1 %4236, %v4492_v48   ;;  %v2466_v48 = vld [vmem:[%s7305_s3 + $0x248] sm:$0xff] }
 0x17e   :  { %v4516_v43 = vpop.eup %4515  ;;  %4535 = vrcp.f32 %v2067_v3  ;;  %v1997_v18 = vadd.f32 1.0, %v4514_v9  ;;  %v3804_v3 = vmul.f32 -1.442695, %v1361_v53 }
 0x17f   :  { %v4518_v34 = vpop.eup %4517  ;;  %4537 = vrcp.f32 %v1998_v21  ;;  %v2070_v36 = vadd.f32 1.0, %v4516_v43  ;;  %3049 = vperm.xlu0 %4235, %v4494_v20   ;;  %v2545_v9 = vpop.permute.xlu0 %2544  ;;  %v1011_v21 = vadd.f32 %v5731_v52, %v207_v6  ;;  %v210_v20 = vld [vmem:[%s7304_s2 + $0x158] sm:$0xff] }
 0x180   :  { %v4520_v5 = vpop.eup %4519  ;;  %4539 = vrcp.f32 %v1997_v18  ;;  %v2069_v12 = vadd.f32 1.0, %v4518_v34  ;;  %v2905_v62 = vpop.permute.xlu1 %2904  ;;  %v3258_v46 = vmul.f32 %v2545_v9, %v2394_v59  ;;  %v209_v18 = vld [vmem:[%s7304_s2 + $0x150] sm:$0xff]  ;;  %v1371_v59 = vadd.f32 %v5739_v10, %v279_v63 }
 0x181   :  { %v4522_v51 = vpop.eup %4521  ;;  %4541 = vrcp.f32 %v2070_v36  ;;  %v2000_v43 = vadd.f32 1.0, %v4520_v5  ;;  %v6018_v34 = vpop.f32.mrb[70].mxu1  ;;  %v3330_v6 = vmul.f32 %v2905_v62, %v2466_v48  ;;  %2704 = vperm.xlu1 %4236, %v5969_v29   ;;  %v2393_v36 = vld [vmem:[%s7305_s3] sm:$0xff]  ;;  %v3735_v29 = vmul.f32 -1.442695, %v1016_v37  ;;  %v2396_v62 = vld [vmem:[%s7305_s3 + $0x18] sm:$0xff] }
 0x182   :  { %v4524_v53 = vpop.eup %4523  ;;  %4543 = vrcp.f32 %v2069_v12  ;;  %v1999_v52 = vadd.f32 1.0, %v4522_v51  ;;  %v6028_v40 = vpop.f32.mrb[71].mxu1  ;;  %3403 = vst.msk [vmem:[%s7306_s4 + $0x8] sm:$0xff] %vm3401_vm1, %v3258_v46  ;;  %v1026_v10 = vadd.f32 %v5749_v24, %v210_v20  ;;  %v281_v48 = vld [vmem:[%s7304_s2 + $0x390] sm:$0xff]  ;;  %v3734_v12 = vmul.f32 -1.442695, %v1011_v21 }
 0x183   :  { %v4526_v5 = vpop.eup %4525  ;;  %4545 = vrcp.f32 %v2000_v43  ;;  %2699 = vperm.xlu0 %4235, %v4524_v53   ;;  %3475 = vst.msk [vmem:[%s7306_s4 + $0x248] sm:$0xff] %vm3401_vm1, %v3330_v6  ;;  %v2540_v9 = vpop.permute.xlu0 %2539  ;;  %v1021_v37 = vadd.f32 %v5754_v30, %v209_v18  ;;  %v212_v51 = vld [vmem:[%s7304_s2 + $0x168] sm:$0xff]  ;;  %v3807_v46 = vmul.f32 -1.442695, %v1376_v27  ;;  %v1386_v53 = vadd.f32 %v5751_v25, %v282_v14  ;;  %v2465_v18 = vld [vmem:[%s7305_s3 + $0x240] sm:$0xff] }
 0x184   :  { %v4528_v63 = vpop.eup %4527  ;;  %4547 = vrcp.f32 %v1999_v52  ;;  %v2555_v20 = vpop.permute.xlu1 %2554  ;;  %v3257_v43 = vmul.f32 %v2540_v9, %v2393_v36  ;;  %v211_v52 = vld [vmem:[%s7304_s2 + $0x160] sm:$0xff]  ;;  %v3806_v30 = vmul.f32 -1.442695, %v1371_v59  ;;  %v284_v27 = vld [vmem:[%s7304_s2 + $0x3a8] sm:$0xff]  ;;  %v3737_v36 = vmul.f32 -1.442695, %v1026_v10 }
 0x185   :  { %v4530_v24 = vpop.eup %4529  ;;  %4549 = vpow2.f32 %v3805_v54  ;;  %v3260_v21 = vmul.f32 %v2555_v20, %v2396_v62  ;;  %3064 = vperm.xlu1 %4236, %v4526_v5   ;;  %v1381_v54 = vadd.f32 %v5756_v42, %v281_v48  ;;  %v1036_v59 = vadd.f32 %v5760_v28, %v212_v51 }
 0x186   :  { %v4532_v6 = vpop.eup %4531  ;;  %4551 = vpow2.f32 %v3804_v3  ;;  %3402 = vst.msk [vmem:[%s7306_s4] sm:$0xff] %vm3401_vm1, %v3257_v43  ;;  %v2468_v3 = vld [vmem:[%s7305_s3 + $0x258] sm:$0xff]  ;;  %v3736_v5 = vmul.f32 -1.442695, %v1021_v37  ;;  %v3809_v9 = vmul.f32 -1.442695, %v1386_v53  ;;  %v1396_v10 = vadd.f32 %v5762_v60, %v284_v27 }
 0x187   :  { %v4534_v25 = vpop.eup %4533  ;;  %4553 = vpow2.f32 %v3735_v29  ;;  %3059 = vperm.xlu0 %4235, %v4528_v63   ;;  %3405 = vst.msk [vmem:[%s7306_s4 + $0x18] sm:$0xff] %vm3401_vm1, %v3260_v21  ;;  %v2900_v14 = vpop.permute.xlu0 %2899  ;;  %v1031_v29 = vadd.f32 %v5764_v4, %v211_v52  ;;  %v3808_v51 = vmul.f32 -1.442695, %v1381_v54  ;;  %v2395_v60 = vld [vmem:[%s7305_s3 + $0x10] sm:$0xff]  ;;  %v3739_v4 = vmul.f32 -1.442695, %v1036_v59 }
 0x188   :  { %v4536_v42 = vpop.eup %4535  ;;  %4555 = vpow2.f32 %v3734_v12  ;;  %v2915_v48 = vpop.permute.xlu1 %2914  ;;  %v3329_v63 = vmul.f32 %v2900_v14, %v2465_v18  ;;  %v2467_v12 = vld [vmem:[%s7305_s3 + $0x250] sm:$0xff]  ;;  %v3811_v21 = vmul.f32 -1.442695, %v1396_v10  ;;  %v2397_v54 = vld [vmem:[%s7305_s3 + $0x20] sm:$0xff] }
 0x189   :  { %v4538_v62 = vpop.eup %4537  ;;  %4557 = vpow2.f32 %v3807_v46  ;;  %v3332_v28 = vmul.f32 %v2915_v48, %v2468_v3  ;;  %2714 = vperm.xlu1 %4236, %v4530_v24   ;;  %v3738_v46 = vmul.f32 -1.442695, %v1031_v29  ;;  %v2398_v3 = vld [vmem:[%s7305_s3 + $0x28] sm:$0xff]  ;;  %v2469_v10 = vld [vmem:[%s7305_s3 + $0x260] sm:$0xff] }
 0x18a   :  { %v4540_v20 = vpop.eup %4539  ;;  %4559 = vpow2.f32 %v3806_v30  ;;  %3474 = vst.msk [vmem:[%s7306_s4 + $0x240] sm:$0xff] %vm3401_vm1, %v3329_v63 }
 0x18b   :  { %v6077_v43 = vpop.eup %4541  ;;  %2709 = vperm.xlu0 %4235, %v4532_v6   ;;  %4561 = vpow2.f32 %v3737_v36  ;;  %3477 = vst.msk [vmem:[%s7306_s4 + $0x258] sm:$0xff] %vm3401_vm1, %v3332_v28  ;;  %v2910_v24 = vpop.permute.xlu0 %2909  ;;  %v283_v28 = vld [vmem:[%s7304_s2 + $0x3a0] sm:$0xff] }
 0x18c   :  { %v6086_v37 = vpop.eup %4543  ;;  %4563 = vpow2.f32 %v3736_v5  ;;  %v2550_v52 = vpop.permute.xlu1 %2549  ;;  %v3331_v6 = vmul.f32 %v2910_v24, %v2467_v12 }
 0x18d   :  { %v6092_v53 = vpop.eup %4545  ;;  %4565 = vpow2.f32 %v3809_v9  ;;  %v3259_v18 = vmul.f32 %v2550_v52, %v2395_v60  ;;  %3074 = vperm.xlu1 %4236, %v4534_v25  }
 0x18e   :  { %v6094_v30 = vpop.eup %4547  ;;  %4567 = vpow2.f32 %v3808_v51  ;;  %3476 = vst.msk [vmem:[%s7306_s4 + $0x250] sm:$0xff] %vm3401_vm1, %v3331_v6 }
 0x18f   :  { %v4550_v27 = vpop.eup %4549  ;;  %3069 = vperm.xlu0 %4235, %v4536_v42   ;;  %4569 = vpow2.f32 %v3739_v4  ;;  %3404 = vst.msk [vmem:[%s7306_s4 + $0x10] sm:$0xff] %vm3401_vm1, %v3259_v18  ;;  %v2560_v25 = vpop.permute.xlu0 %2559  ;;  %v214_v18 = vld [vmem:[%s7304_s2 + $0x178] sm:$0xff] }
 0x190   :  { %v4552_v36 = vpop.eup %4551  ;;  %v2072_v59 = vadd.f32 1.0, %v4550_v27  ;;  %4571 = vpow2.f32 %v3738_v46  ;;  %v2565_v29 = vpop.permute.xlu1 %2564  ;;  %v3261_v48 = vmul.f32 %v2560_v25, %v2397_v54 }
 0x191   :  { %v4554_v14 = vpop.eup %4553  ;;  %v2071_v5 = vadd.f32 1.0, %v4552_v36  ;;  %4573 = vpow2.f32 %v3811_v21  ;;  %v3262_v9 = vmul.f32 %v2565_v29, %v2398_v3  ;;  %2724 = vperm.xlu1 %4236, %v4538_v62   ;;  %v2470_v62 = vld [vmem:[%s7305_s3 + $0x268] sm:$0xff]  ;;  %v213_v36 = vld [vmem:[%s7304_s2 + $0x170] sm:$0xff]  ;;  %v1046_v29 = vadd.f32 %v5770_v49, %v214_v18 }
 0x192   :  { %v4556_v42 = vpop.eup %4555  ;;  %4575 = vrcp.f32 %v2072_v59  ;;  %v2002_v63 = vadd.f32 1.0, %v4554_v14  ;;  %3406 = vst.msk [vmem:[%s7306_s4 + $0x20] sm:$0xff] %vm3401_vm1, %v3261_v48  ;;  %v285_v48 = vld [vmem:[%s7304_s2 + $0x3b0] sm:$0xff] }
 0x193   :  { %v4558_v12 = vpop.eup %4557  ;;  %4577 = vrcp.f32 %v2071_v5  ;;  %v2001_v51 = vadd.f32 1.0, %v4556_v42  ;;  %2719 = vperm.xlu0 %4235, %v4540_v20   ;;  %3407 = vst.msk [vmem:[%s7306_s4 + $0x28] sm:$0xff] %vm3401_vm1, %v3262_v9  ;;  %v2920_v24 = vpop.permute.xlu0 %2919  ;;  %v1391_v20 = vadd.f32 %v5766_v50, %v283_v28  ;;  %v2400_v50 = vld [vmem:[%s7305_s3 + $0x38] sm:$0xff]  ;;  %v1041_v28 = vadd.f32 %v5774_v8, %v213_v36 }
 0x194   :  { %v4560_v60 = vpop.eup %4559  ;;  %4579 = vrcp.f32 %v2002_v63  ;;  %v2074_v4 = vadd.f32 1.0, %v4558_v12  ;;  %v2925_v6 = vpop.permute.xlu1 %2924  ;;  %v3333_v21 = vmul.f32 %v2920_v24, %v2469_v10  ;;  %v216_v12 = vld [vmem:[%s7304_s2 + $0x188] sm:$0xff] }
 0x195   :  { %v4562_v46 = vpop.eup %4561  ;;  %4581 = vrcp.f32 %v2001_v51  ;;  %v2073_v52 = vadd.f32 1.0, %v4560_v60  ;;  %v3334_v3 = vmul.f32 %v2925_v6, %v2470_v62  ;;  %3084 = vperm.xlu1 %4236, %v6077_v43   ;;  %v286_v43 = vld [vmem:[%s7304_s2 + $0x3b8] sm:$0xff]  ;;  %v3810_v9 = vmul.f32 -1.442695, %v1391_v20  ;;  %v7328_v20 = vld [vmem:[#allocation3_spill] sm:$0xff] }
 0x196   :  { %v4564_v54 = vpop.eup %4563  ;;  %4583 = vrcp.f32 %v2074_v4  ;;  %v2004_v27 = vadd.f32 1.0, %v4562_v46  ;;  %3478 = vst.msk [vmem:[%s7306_s4 + $0x260] sm:$0xff] %vm3401_vm1, %v3333_v21  ;;  %v7327_v4 = vld [vmem:[#allocation2_spill] sm:$0xff]  ;;  %v2472_v21 = vld [vmem:[%s7305_s3 + $0x278] sm:$0xff]  ;;  %v1401_v18 = vadd.f32 %v7328_v20, %v285_v48  ;;  %v1056_v36 = vadd.f32 %v5778_v35, %v216_v12  ;;  %v2402_v12 = vld [vmem:[%s7305_s3 + $0x48] sm:$0xff] }
 0x197   :  { %v4566_v59 = vpop.eup %4565  ;;  %4585 = vrcp.f32 %v2073_v52  ;;  %v2003_v25 = vadd.f32 1.0, %v4564_v54  ;;  %3079 = vperm.xlu0 %4235, %v6086_v37   ;;  %3479 = vst.msk [vmem:[%s7306_s4 + $0x268] sm:$0xff] %vm3401_vm1, %v3334_v3  ;;  %v2399_v37 = vld [vmem:[%s7305_s3 + $0x30] sm:$0xff]  ;;  %v1406_v24 = vadd.f32 %v7327_v4, %v286_v43  ;;  %v215_v46 = vld [vmem:[%s7304_s2 + $0x180] sm:$0xff]  ;;  %v3741_v3 = vmul.f32 -1.442695, %v1046_v29 }
 0x198   :  { %v4568_v14 = vpop.eup %4567  ;;  %4587 = vrcp.f32 %v2004_v27  ;;  %v2076_v5 = vadd.f32 1.0, %v4566_v59  ;;  %v2575_v10 = vpop.permute.xlu1 %2574  ;;  %v287_v59 = vld [vmem:[%s7304_s2 + $0x3c0] sm:$0xff] }
 0x199   :  { %v4570_v42 = vpop.eup %4569  ;;  %4589 = vrcp.f32 %v2003_v25  ;;  %v2075_v63 = vadd.f32 1.0, %v4568_v14  ;;  %v3264_v60 = vmul.f32 %v2575_v10, %v2400_v50  ;;  %2734 = vperm.xlu1 %4236, %v6092_v53   ;;  %v288_v53 = vld [vmem:[%s7304_s2 + $0x3c8] sm:$0xff]  ;;  %v3740_v50 = vmul.f32 -1.442695, %v1041_v28 }
 0x19a   :  { %v4572_v51 = vpop.eup %4571  ;;  %4591 = vrcp.f32 %v2076_v5  ;;  %v2006_v62 = vadd.f32 1.0, %v4570_v42  ;;  %v2570_v49 = vpop.permute.xlu0 %2569  ;;  %v1051_v14 = vadd.f32 %v5780_v15, %v215_v46  ;;  %v218_v5 = vld [vmem:[%s7304_s2 + $0x198] sm:$0xff]  ;;  %v3813_v48 = vmul.f32 -1.442695, %v1406_v24  ;;  %v289_v24 = vld [vmem:[%s7304_s2 + $0x3d0] sm:$0xff] }
 0x19b   :  { %v4574_v52 = vpop.eup %4573  ;;  %4593 = vrcp.f32 %v2075_v63  ;;  %v2005_v8 = vadd.f32 1.0, %v4572_v51  ;;  %v3263_v6 = vmul.f32 %v2570_v49, %v2399_v37  ;;  %2729 = vperm.xlu0 %4235, %v6094_v30   ;;  %3409 = vst.msk [vmem:[%s7306_s4 + $0x38] sm:$0xff] %vm3401_vm1, %v3264_v60  ;;  %v2471_v30 = vld [vmem:[%s7305_s3 + $0x270] sm:$0xff]  ;;  %v1416_v42 = vadd.f32 %v5782_v11, %v288_v53  ;;  %v290_v60 = vld [vmem:[%s7304_s2 + $0x3d8] sm:$0xff] }
 0x19c   :  { %v4576_v54 = vpop.eup %4575  ;;  %4595 = vrcp.f32 %v2006_v62  ;;  %v2078_v27 = vadd.f32 1.0, %v4574_v52  ;;  %v2935_v43 = vpop.permute.xlu1 %2934  ;;  %v217_v63 = vld [vmem:[%s7304_s2 + $0x190] sm:$0xff]  ;;  %v3812_v15 = vmul.f32 -1.442695, %v1401_v18  ;;  %v3743_v49 = vmul.f32 -1.442695, %v1056_v36 }
 0x19d   :  { %v4578_v25 = vpop.eup %4577  ;;  %4597 = vrcp.f32 %v2005_v8  ;;  %3408 = vst.msk [vmem:[%s7306_s4 + $0x30] sm:$0xff] %vm3401_vm1, %v3263_v6  ;;  %v3336_v37 = vmul.f32 %v2935_v43, %v2472_v21  ;;  %3094 = vperm.xlu1 %4236, %v4576_v54   ;;  %v7329_v51 = vld [vmem:[#allocation4_spill] sm:$0xff]  ;;  %v1066_v4 = vadd.f32 %v5795_v32, %v218_v5  ;;  %v3742_v8 = vmul.f32 -1.442695, %v1051_v14  ;;  %v7330_v6 = vld [vmem:[#allocation5_spill] sm:$0xff]  ;;  %v7331_v54 = vld [vmem:[#allocation6_spill] sm:$0xff] }
 0x19e   :  { %v4580_v35 = vpop.eup %4579  ;;  %4599 = vrcp.f32 %v2078_v27  ;;  %v2930_v29 = vpop.permute.xlu0 %2929  ;;  %v1411_v62 = vadd.f32 %v7329_v51, %v287_v59  ;;  %v1061_v21 = vadd.f32 %v7330_v6, %v217_v63  ;;  %v3815_v32 = vmul.f32 -1.442695, %v1416_v42  ;;  %v2474_v36 = vld [vmem:[%s7305_s3 + $0x288] sm:$0xff]  ;;  %v2473_v14 = vld [vmem:[%s7305_s3 + $0x280] sm:$0xff] }
 0x19f   :  { %v4582_v10 = vpop.eup %4581  ;;  %4601 = vpow2.f32 %v3810_v9  ;;  %v3335_v28 = vmul.f32 %v2930_v29, %v2471_v30  ;;  %3089 = vperm.xlu0 %4235, %v4578_v25   ;;  %3481 = vst.msk [vmem:[%s7306_s4 + $0x278] sm:$0xff] %vm3401_vm1, %v3336_v37  ;;  %v2401_v9 = vld [vmem:[%s7305_s3 + $0x40] sm:$0xff]  ;;  %v1426_v27 = vadd.f32 %v7331_v54, %v290_v60  ;;  %v7332_v25 = vld [vmem:[#allocation7_spill] sm:$0xff]  ;;  %v3745_v5 = vmul.f32 -1.442695, %v1066_v4  ;;  %v2403_v60 = vld [vmem:[%s7305_s3 + $0x50] sm:$0xff] }
 0x1a0   :  { %v4584_v11 = vpop.eup %4583  ;;  %4603 = vpow2.f32 %v3741_v3  ;;  %v2585_v52 = vpop.permute.xlu1 %2584  ;;  %v3814_v59 = vmul.f32 -1.442695, %v1411_v62  ;;  %v3744_v29 = vmul.f32 -1.442695, %v1061_v21  ;;  %v2476_v21 = vld [vmem:[%s7305_s3 + $0x298] sm:$0xff] }
 0x1a1   :  { %v4586_v46 = vpop.eup %4585  ;;  %4605 = vpow2.f32 %v3740_v50  ;;  %3480 = vst.msk [vmem:[%s7306_s4 + $0x270] sm:$0xff] %vm3401_vm1, %v3335_v28  ;;  %v3266_v18 = vmul.f32 %v2585_v52, %v2402_v12  ;;  %2744 = vperm.xlu1 %4236, %v4580_v35   ;;  %v1421_v50 = vadd.f32 %v7332_v25, %v289_v24  ;;  %v2404_v12 = vld [vmem:[%s7305_s3 + $0x58] sm:$0xff] }
 0x1a2   :  { %v4588_v20 = vpop.eup %4587  ;;  %4607 = vpow2.f32 %v3813_v48  ;;  %v2580_v53 = vpop.permute.xlu0 %2579 }
 0x1a3   :  { %v4590_v3 = vpop.eup %4589  ;;  %4609 = vpow2.f32 %v3812_v15  ;;  %v3265_v30 = vmul.f32 %v2580_v53, %v2401_v9  ;;  %2739 = vperm.xlu0 %4235, %v4582_v10   ;;  %3411 = vst.msk [vmem:[%s7306_s4 + $0x48] sm:$0xff] %vm3401_vm1, %v3266_v18  ;;  %v3817_v10 = vmul.f32 -1.442695, %v1426_v27  ;;  %v3816_v51 = vmul.f32 -1.442695, %v1421_v50  ;;  %v219_v50 = vld [vmem:[%s7304_s2 + $0x1a0] sm:$0xff] }
 0x1a4   :  { %v4592_v43 = vpop.eup %4591  ;;  %4611 = vpow2.f32 %v3743_v49  ;;  %v2945_v37 = vpop.permute.xlu1 %2944 }
 0x1a5   :  { %v4594_v35 = vpop.eup %4593  ;;  %3410 = vst.msk [vmem:[%s7306_s4 + $0x40] sm:$0xff] %vm3401_vm1, %v3265_v30  ;;  %4613 = vpow2.f32 %v3742_v8  ;;  %v3338_v42 = vmul.f32 %v2945_v37, %v2474_v36  ;;  %3104 = vperm.xlu1 %4236, %v4584_v11  }
 0x1a6   :  { %v6236_v48 = vpop.eup %4595  ;;  %v2940_v63 = vpop.permute.xlu0 %2939  ;;  %4615 = vpow2.f32 %v3815_v32 }
 0x1a7   :  { %v6238_v28 = vpop.eup %4597  ;;  %v3337_v15 = vmul.f32 %v2940_v63, %v2473_v14  ;;  %3099 = vperm.xlu0 %4235, %v4586_v46   ;;  %4617 = vpow2.f32 %v3814_v59  ;;  %3483 = vst.msk [vmem:[%s7306_s4 + $0x288] sm:$0xff] %vm3401_vm1, %v3338_v42 }
 0x1a8   :  { %v6243_v62 = vpop.eup %4599  ;;  %4619 = vpow2.f32 %v3745_v5  ;;  %v2595_v9 = vpop.permute.xlu1 %2594 }
 0x1a9   :  { %v4602_v11 = vpop.eup %4601  ;;  %3482 = vst.msk [vmem:[%s7306_s4 + $0x280] sm:$0xff] %vm3401_vm1, %v3337_v15  ;;  %4621 = vpow2.f32 %v3744_v29  ;;  %v3268_v24 = vmul.f32 %v2595_v9, %v2404_v12  ;;  %2754 = vperm.xlu1 %4236, %v4588_v20   ;;  %v2475_v20 = vld [vmem:[%s7305_s3 + $0x290] sm:$0xff]  ;;  %v2406_v29 = vld [vmem:[%s7305_s3 + $0x68] sm:$0xff] }
 0x1aa   :  { %v4604_v49 = vpop.eup %4603  ;;  %v2077_v4 = vadd.f32 1.0, %v4602_v11  ;;  %v2590_v46 = vpop.permute.xlu0 %2589  ;;  %4623 = vpow2.f32 %v3817_v10  ;;  %v291_v11 = vld [vmem:[%s7304_s2 + $0x3e0] sm:$0xff] }
 0x1ab   :  { %v4606_v52 = vpop.eup %4605  ;;  %v2008_v8 = vadd.f32 1.0, %v4604_v49  ;;  %v3267_v6 = vmul.f32 %v2590_v46, %v2403_v60  ;;  %2749 = vperm.xlu0 %4235, %v4590_v3   ;;  %4625 = vpow2.f32 %v3816_v51  ;;  %3413 = vst.msk [vmem:[%s7306_s4 + $0x58] sm:$0xff] %vm3401_vm1, %v3268_v24  ;;  %v220_v3 = vld [vmem:[%s7304_s2 + $0x1a8] sm:$0xff]  ;;  %v1071_v60 = vadd.f32 %v5825_v38, %v219_v50  ;;  %v222_v24 = vld [vmem:[%s7304_s2 + $0x1b8] sm:$0xff] }
 0x1ac   :  { %v4608_v18 = vpop.eup %4607  ;;  %4627 = vrcp.f32 %v2077_v4  ;;  %v2007_v53 = vadd.f32 1.0, %v4606_v52  ;;  %v2955_v27 = vpop.permute.xlu1 %2954  ;;  %v1076_v10 = vadd.f32 %v5819_v13, %v220_v3  ;;  %v2478_v38 = vld [vmem:[%s7305_s3 + $0x2a8] sm:$0xff] }
 0x1ad   :  { %v4610_v32 = vpop.eup %4609  ;;  %4629 = vrcp.f32 %v2008_v8  ;;  %v2080_v54 = vadd.f32 1.0, %v4608_v18  ;;  %3412 = vst.msk [vmem:[%s7306_s4 + $0x50] sm:$0xff] %vm3401_vm1, %v3267_v6  ;;  %v3340_v59 = vmul.f32 %v2955_v27, %v2476_v21  ;;  %3114 = vperm.xlu1 %4236, %v4592_v43   ;;  %v2405_v43 = vld [vmem:[%s7305_s3 + $0x60] sm:$0xff]  ;;  %v7333_v6 = vld [vmem:[#allocation8_spill] sm:$0xff]  ;;  %v294_v27 = vld [vmem:[%s7304_s2 + $0x3f8] sm:$0xff] }
 0x1ae   :  { %v4612_v30 = vpop.eup %4611  ;;  %4631 = vrcp.f32 %v2007_v53  ;;  %v2079_v36 = vadd.f32 1.0, %v4610_v32  ;;  %v2950_v25 = vpop.permute.xlu0 %2949  ;;  %v7334_v32 = vld [vmem:[#allocation9_spill] sm:$0xff] }
 0x1af   :  { %v4614_v14 = vpop.eup %4613  ;;  %4633 = vrcp.f32 %v2080_v54  ;;  %v2010_v5 = vadd.f32 1.0, %v4612_v30  ;;  %v3339_v37 = vmul.f32 %v2950_v25, %v2475_v20  ;;  %3109 = vperm.xlu0 %4235, %v4594_v35   ;;  %3485 = vst.msk [vmem:[%s7306_s4 + $0x298] sm:$0xff] %vm3401_vm1, %v3340_v59  ;;  %v292_v35 = vld [vmem:[%s7304_s2 + $0x3e8] sm:$0xff]  ;;  %v3747_v20 = vmul.f32 -1.442695, %v1076_v10  ;;  %v7335_v25 = vld [vmem:[#allocation10_spill] sm:$0xff] }
 0x1b0   :  { %v4616_v42 = vpop.eup %4615  ;;  %4635 = vrcp.f32 %v2079_v36  ;;  %v2009_v63 = vadd.f32 1.0, %v4614_v14  ;;  %v2605_v51 = vpop.permute.xlu1 %2604  ;;  %v1436_v21 = vadd.f32 %v7333_v6, %v292_v35  ;;  %v1431_v54 = vadd.f32 %v7334_v32, %v291_v11  ;;  %v293_v14 = vld [vmem:[%s7304_s2 + $0x3f0] sm:$0xff]  ;;  %v224_v10 = vld [vmem:[%s7304_s2 + $0x1c8] sm:$0xff]  ;;  %v226_v32 = vld [vmem:[%s7304_s2 + $0x1d8] sm:$0xff] }
 0x1b1   :  { %v4618_v15 = vpop.eup %4617  ;;  %4637 = vrcp.f32 %v2010_v5  ;;  %v2082_v12 = vadd.f32 1.0, %v4616_v42  ;;  %3484 = vst.msk [vmem:[%s7306_s4 + $0x290] sm:$0xff] %vm3401_vm1, %v3339_v37  ;;  %v3270_v49 = vmul.f32 %v2605_v51, %v2406_v29  ;;  %2764 = vperm.xlu1 %4236, %v6236_v48   ;;  %v221_v48 = vld [vmem:[%s7304_s2 + $0x1b0] sm:$0xff]  ;;  %v3746_v36 = vmul.f32 -1.442695, %v1071_v60  ;;  %v2408_v51 = vld [vmem:[%s7305_s3 + $0x78] sm:$0xff] }
 0x1b2   :  { %v4620_v13 = vpop.eup %4619  ;;  %4639 = vrcp.f32 %v2009_v63  ;;  %v2081_v9 = vadd.f32 1.0, %v4618_v15  ;;  %v2600_v4 = vpop.permute.xlu0 %2599  ;;  %v1086_v50 = vadd.f32 %v7335_v25, %v222_v24  ;;  %v7336_v63 = vld [vmem:[#allocation12_spill] sm:$0xff]  ;;  %v7337_v60 = vld [vmem:[#allocation11_spill] sm:$0xff]  ;;  %v1096_v6 = vadd.f32 %v5862_v1, %v224_v10  ;;  %v2480_v1 = vld [vmem:[%s7305_s3 + $0x2b8] sm:$0xff] }
 0x1b3   :  { %v4622_v46 = vpop.eup %4621  ;;  %4641 = vrcp.f32 %v2082_v12  ;;  %v2012_v52 = vadd.f32 1.0, %v4620_v13  ;;  %v3269_v8 = vmul.f32 %v2600_v4, %v2405_v43  ;;  %2759 = vperm.xlu0 %4235, %v6238_v28   ;;  %3415 = vst.msk [vmem:[%s7306_s4 + $0x68] sm:$0xff] %vm3401_vm1, %v3270_v49  ;;  %v2477_v28 = vld [vmem:[%s7305_s3 + $0x2a0] sm:$0xff]  ;;  %v1081_v43 = vadd.f32 %v7336_v63, %v221_v48  ;;  %v2407_v49 = vld [vmem:[%s7305_s3 + $0x70] sm:$0xff]  ;;  %v7338_v4 = vld [vmem:[#allocation13_spill] sm:$0xff] }
 0x1b4   :  { %v4624_v18 = vpop.eup %4623  ;;  %4643 = vrcp.f32 %v2081_v9  ;;  %v2011_v53 = vadd.f32 1.0, %v4622_v46  ;;  %v2965_v59 = vpop.permute.xlu1 %2964  ;;  %v3819_v12 = vmul.f32 -1.442695, %v1436_v21  ;;  %v1446_v11 = vadd.f32 %v7337_v60, %v294_v27  ;;  %v296_v46 = vld [vmem:[%s7304_s2 + $0x408] sm:$0xff]  ;;  %v295_v21 = vld [vmem:[%s7304_s2 + $0x400] sm:$0xff] }
 0x1b5   :  { %v4626_v3 = vpop.eup %4625  ;;  %4645 = vrcp.f32 %v2012_v52  ;;  %v2084_v30 = vadd.f32 1.0, %v4624_v18  ;;  %3414 = vst.msk [vmem:[%s7306_s4 + $0x60] sm:$0xff] %vm3401_vm1, %v3269_v8  ;;  %v3342_v29 = vmul.f32 %v2965_v59, %v2478_v38  ;;  %3124 = vperm.xlu1 %4236, %v6243_v62   ;;  %v223_v62 = vld [vmem:[%s7304_s2 + $0x1c0] sm:$0xff]  ;;  %v3818_v9 = vmul.f32 -1.442695, %v1431_v54  ;;  %v2410_v10 = vld [vmem:[%s7305_s3 + $0x88] sm:$0xff] }
 0x1b6   :  { %v4628_v5 = vpop.eup %4627  ;;  %4647 = vrcp.f32 %v2011_v53  ;;  %v2083_v37 = vadd.f32 1.0, %v4626_v3  ;;  %v2960_v42 = vpop.permute.xlu0 %2959  ;;  %v1441_v24 = vadd.f32 %v7338_v4, %v293_v14  ;;  %v3749_v38 = vmul.f32 -1.442695, %v1086_v50 }
 0x1b7   :  { %v4630_v35 = vpop.eup %4629  ;;  %4649 = vrcp.f32 %v2084_v30  ;;  %v3341_v15 = vmul.f32 %v2960_v42, %v2477_v28  ;;  %3119 = vperm.xlu0 %4235, %v4628_v5   ;;  %3487 = vst.msk [vmem:[%s7306_s4 + $0x2a8] sm:$0xff] %vm3401_vm1, %v3342_v29  ;;  %v3748_v28 = vmul.f32 -1.442695, %v1081_v43  ;;  %v3821_v3 = vmul.f32 -1.442695, %v1446_v11 }
 0x1b8   :  { %v4632_v13 = vpop.eup %4631  ;;  %4651 = vrcp.f32 %v2083_v37  ;;  %v2615_v8 = vpop.permute.xlu1 %2614  ;;  %v1456_v30 = vadd.f32 %v5864_v57, %v296_v46  ;;  %v3820_v59 = vmul.f32 -1.442695, %v1441_v24  ;;  %v1451_v25 = vadd.f32 %v5869_v23, %v295_v21  ;;  %v2482_v24 = vld [vmem:[%s7305_s3 + $0x2c8] sm:$0xff] }
 0x1b9   :  { %v4634_v52 = vpop.eup %4633  ;;  %4653 = vpow2.f32 %v3747_v20  ;;  %3486 = vst.msk [vmem:[%s7306_s4 + $0x2a0] sm:$0xff] %vm3401_vm1, %v3341_v15  ;;  %v3272_v18 = vmul.f32 %v2615_v8, %v2408_v51  ;;  %2774 = vperm.xlu1 %4236, %v4630_v35   ;;  %v1091_v20 = vadd.f32 %v5867_v41, %v223_v62  ;;  %v2479_v41 = vld [vmem:[%s7305_s3 + $0x2b0] sm:$0xff]  ;;  %v3751_v14 = vmul.f32 -1.442695, %v1096_v6  ;;  %v2481_v8 = vld [vmem:[%s7305_s3 + $0x2c0] sm:$0xff] }
 0x1ba   :  { %v4636_v48 = vpop.eup %4635  ;;  %4655 = vpow2.f32 %v3746_v36  ;;  %v2610_v53 = vpop.permute.xlu0 %2609  ;;  %v1106_v5 = vadd.f32 %v5871_v26, %v226_v32  ;;  %v3823_v35 = vmul.f32 -1.442695, %v1456_v30  ;;  %v2409_v26 = vld [vmem:[%s7305_s3 + $0x80] sm:$0xff] }
 0x1bb   :  { %v4638_v54 = vpop.eup %4637  ;;  %4657 = vpow2.f32 %v3819_v12  ;;  %v3271_v27 = vmul.f32 %v2610_v53, %v2407_v49  ;;  %2769 = vperm.xlu0 %4235, %v4632_v13   ;;  %3417 = vst.msk [vmem:[%s7306_s4 + $0x78] sm:$0xff] %vm3401_vm1, %v3272_v18  ;;  %v3750_v63 = vmul.f32 -1.442695, %v1091_v20  ;;  %v3822_v12 = vmul.f32 -1.442695, %v1451_v25  ;;  %v225_v20 = vld [vmem:[%s7304_s2 + $0x1d0] sm:$0xff] }
 0x1bc   :  { %v4640_v36 = vpop.eup %4639  ;;  %4659 = vpow2.f32 %v3818_v9  ;;  %v2975_v57 = vpop.permute.xlu1 %2974  ;;  %v3753_v11 = vmul.f32 -1.442695, %v1106_v5 }
 0x1bd   :  { %v4642_v50 = vpop.eup %4641  ;;  %3416 = vst.msk [vmem:[%s7306_s4 + $0x70] sm:$0xff] %vm3401_vm1, %v3271_v27  ;;  %4661 = vpow2.f32 %v3749_v38  ;;  %v3344_v29 = vmul.f32 %v2975_v57, %v2480_v1  ;;  %3134 = vperm.xlu1 %4236, %v4634_v52   ;;  %v2412_v1 = vld [vmem:[%s7305_s3 + $0x98] sm:$0xff] }
 0x1be   :  { %v4644_v37 = vpop.eup %4643  ;;  %4663 = vpow2.f32 %v3748_v28  ;;  %v2970_v42 = vpop.permute.xlu0 %2969  ;;  %v298_v57 = vld [vmem:[%s7304_s2 + $0x418] sm:$0xff] }
 0x1bf   :  { %v6381_v43 = vpop.eup %4645  ;;  %v3343_v23 = vmul.f32 %v2970_v42, %v2479_v41  ;;  %3129 = vperm.xlu0 %4235, %v4636_v48   ;;  %4665 = vpow2.f32 %v3821_v3  ;;  %3489 = vst.msk [vmem:[%s7306_s4 + $0x2b8] sm:$0xff] %vm3401_vm1, %v3344_v29  ;;  %v297_v42 = vld [vmem:[%s7304_s2 + $0x410] sm:$0xff] }
 0x1c0   :  { %v6386_v15 = vpop.eup %4647  ;;  %4667 = vpow2.f32 %v3820_v59  ;;  %v2625_v60 = vpop.permute.xlu1 %2624 }
 0x1c1   :  { %v6395_v51 = vpop.eup %4649  ;;  %3488 = vst.msk [vmem:[%s7306_s4 + $0x2b0] sm:$0xff] %vm3401_vm1, %v3343_v23  ;;  %4669 = vpow2.f32 %v3751_v14  ;;  %v3274_v13 = vmul.f32 %v2625_v60, %v2410_v10  ;;  %2784 = vperm.xlu1 %4236, %v4638_v54   ;;  %v227_v60 = vld [vmem:[%s7304_s2 + $0x1e0] sm:$0xff] }
 0x1c2   :  { %v6401_v62 = vpop.eup %4651  ;;  %v2620_v9 = vpop.permute.xlu0 %2619  ;;  %4671 = vpow2.f32 %v3750_v63 }
 0x1c3   :  { %v4654_v49 = vpop.eup %4653  ;;  %v3273_v4 = vmul.f32 %v2620_v9, %v2409_v26  ;;  %2779 = vperm.xlu0 %4235, %v4640_v36   ;;  %4673 = vpow2.f32 %v3823_v35  ;;  %3419 = vst.msk [vmem:[%s7306_s4 + $0x88] sm:$0xff] %vm3401_vm1, %v3274_v13  ;;  %v2411_v36 = vld [vmem:[%s7305_s3 + $0x90] sm:$0xff]  ;;  %v228_v35 = vld [vmem:[%s7304_s2 + $0x1e8] sm:$0xff] }
 0x1c4   :  { %v4656_v46 = vpop.eup %4655  ;;  %v2014_v52 = vadd.f32 1.0, %v4654_v49  ;;  %4675 = vpow2.f32 %v3822_v12  ;;  %v2985_v21 = vpop.permute.xlu1 %2984  ;;  %v1466_v12 = vadd.f32 %v5873_v17, %v298_v57  ;;  %v300_v17 = vld [vmem:[%s7304_s2 + $0x428] sm:$0xff] }
 0x1c5   :  { %v4658_v38 = vpop.eup %4657  ;;  %v2013_v6 = vadd.f32 1.0, %v4656_v46  ;;  %3418 = vst.msk [vmem:[%s7306_s4 + $0x80] sm:$0xff] %vm3401_vm1, %v3273_v4  ;;  %4677 = vpow2.f32 %v3753_v11  ;;  %v3346_v53 = vmul.f32 %v2985_v21, %v2482_v24  ;;  %3144 = vperm.xlu1 %4236, %v4642_v50   ;;  %v1101_v50 = vadd.f32 %v5877_v2, %v225_v20  ;;  %v2484_v2 = vld [vmem:[%s7305_s3 + $0x2d8] sm:$0xff]  ;;  %v7339_v4 = vld [vmem:[#allocation14_spill] sm:$0xff]  ;;  %v7340_v57 = vld [vmem:[#allocation15_spill] sm:$0xff] }
 0x1c6   :  { %v4660_v48 = vpop.eup %4659  ;;  %4679 = vrcp.f32 %v2014_v52  ;;  %v2086_v18 = vadd.f32 1.0, %v4658_v38  ;;  %v2980_v28 = vpop.permute.xlu0 %2979  ;;  %v1461_v24 = vadd.f32 %v7339_v4, %v297_v42  ;;  %v299_v21 = vld [vmem:[%s7304_s2 + $0x420] sm:$0xff]  ;;  %v1111_v20 = vadd.f32 %v5885_v16, %v227_v60  ;;  %v229_v16 = vld [vmem:[%s7304_s2 + $0x1f0] sm:$0xff]  ;;  %v2486_v42 = vld [vmem:[%s7305_s3 + $0x2e8] sm:$0xff] }
 0x1c7   :  { %v4662_v32 = vpop.eup %4661  ;;  %4681 = vrcp.f32 %v2013_v6  ;;  %v2085_v54 = vadd.f32 1.0, %v4660_v48  ;;  %v3345_v27 = vmul.f32 %v2980_v28, %v2481_v8  ;;  %3139 = vperm.xlu0 %4235, %v4644_v37   ;;  %3491 = vst.msk [vmem:[%s7306_s4 + $0x2c8] sm:$0xff] %vm3401_vm1, %v3346_v53  ;;  %v3752_v9 = vmul.f32 -1.442695, %v1101_v50  ;;  %v2414_v28 = vld [vmem:[%s7305_s3 + $0xa8] sm:$0xff] }
 0x1c8   :  { %v4664_v3 = vpop.eup %4663  ;;  %4683 = vrcp.f32 %v2086_v18  ;;  %v2016_v30 = vadd.f32 1.0, %v4662_v32  ;;  %v2635_v25 = vpop.permute.xlu1 %2634  ;;  %v1116_v6 = vadd.f32 %v5883_v45, %v228_v35  ;;  %v230_v45 = vld [vmem:[%s7304_s2 + $0x1f8] sm:$0xff] }
 0x1c9   :  { %v4666_v41 = vpop.eup %4665  ;;  %4685 = vrcp.f32 %v2085_v54  ;;  %v2015_v59 = vadd.f32 1.0, %v4664_v3  ;;  %3490 = vst.msk [vmem:[%s7306_s4 + $0x2c0] sm:$0xff] %vm3401_vm1, %v3345_v27  ;;  %v3276_v37 = vmul.f32 %v2635_v25, %v2412_v1  ;;  %2794 = vperm.xlu1 %4236, %v6381_v43   ;;  %v3825_v54 = vmul.f32 -1.442695, %v1466_v12 }
 0x1ca   :  { %v4668_v14 = vpop.eup %4667  ;;  %4687 = vrcp.f32 %v2016_v30  ;;  %v2088_v5 = vadd.f32 1.0, %v4666_v41  ;;  %v2630_v29 = vpop.permute.xlu0 %2629  ;;  %v1476_v27 = vadd.f32 %v5887_v19, %v300_v17  ;;  %v3824_v3 = vmul.f32 -1.442695, %v1461_v24  ;;  %v302_v41 = vld [vmem:[%s7304_s2 + $0x438] sm:$0xff] }
 0x1cb   :  { %v4670_v63 = vpop.eup %4669  ;;  %4689 = vrcp.f32 %v2015_v59  ;;  %v2087_v23 = vadd.f32 1.0, %v4668_v14  ;;  %v3275_v10 = vmul.f32 %v2630_v29, %v2411_v36  ;;  %2789 = vperm.xlu0 %4235, %v6386_v15   ;;  %3421 = vst.msk [vmem:[%s7306_s4 + $0x98] sm:$0xff] %vm3401_vm1, %v3276_v37  ;;  %v2483_v15 = vld [vmem:[%s7305_s3 + $0x2d0] sm:$0xff]  ;;  %v1471_v36 = vadd.f32 %v5889_v61, %v299_v21 }
 0x1cc   :  { %v4672_v26 = vpop.eup %4671  ;;  %4691 = vrcp.f32 %v2088_v5  ;;  %v2018_v43 = vadd.f32 1.0, %v4670_v63  ;;  %v2995_v49 = vpop.permute.xlu1 %2994  ;;  %v3755_v50 = vmul.f32 -1.442695, %v1116_v6  ;;  %v1126_v14 = vadd.f32 %v7340_v57, %v230_v45  ;;  %v301_v5 = vld [vmem:[%s7304_s2 + $0x430] sm:$0xff] }
 0x1cd   :  { %v4674_v11 = vpop.eup %4673  ;;  %4693 = vrcp.f32 %v2087_v23  ;;  %v2017_v13 = vadd.f32 1.0, %v4672_v26  ;;  %3420 = vst.msk [vmem:[%s7306_s4 + $0x90] sm:$0xff] %vm3401_vm1, %v3275_v10  ;;  %v3348_v8 = vmul.f32 %v2995_v49, %v2484_v2  ;;  %3154 = vperm.xlu1 %4236, %v6395_v51   ;;  %v3754_v61 = vmul.f32 -1.442695, %v1111_v20  ;;  %v7341_v63 = vld [vmem:[#allocation16_spill] sm:$0xff]  ;;  %v2485_v2 = vld [vmem:[%s7305_s3 + $0x2e0] sm:$0xff] }
 0x1ce   :  { %v4676_v46 = vpop.eup %4675  ;;  %4695 = vrcp.f32 %v2018_v43  ;;  %v2090_v52 = vadd.f32 1.0, %v4674_v11  ;;  %v2990_v38 = vpop.permute.xlu0 %2989  ;;  %v1121_v23 = vadd.f32 %v7341_v63, %v229_v16  ;;  %v3827_v35 = vmul.f32 -1.442695, %v1476_v27  ;;  %v7342_v26 = vld [vmem:[#allocation17_spill] sm:$0xff]  ;;  %v231_v20 = vld [vmem:[%s7304_s2 + $0x200] sm:$0xff] }
 0x1cf   :  { %v4678_v48 = vpop.eup %4677  ;;  %4697 = vrcp.f32 %v2017_v13  ;;  %v2089_v18 = vadd.f32 1.0, %v4676_v46  ;;  %v3347_v53 = vmul.f32 %v2990_v38, %v2483_v15  ;;  %3149 = vperm.xlu0 %4235, %v6401_v62   ;;  %3493 = vst.msk [vmem:[%s7306_s4 + $0x2d8] sm:$0xff] %vm3401_vm1, %v3348_v8  ;;  %v2413_v62 = vld [vmem:[%s7305_s3 + $0xa0] sm:$0xff]  ;;  %v1486_v43 = vadd.f32 %v7342_v26, %v302_v41  ;;  %v232_v15 = vld [vmem:[%s7304_s2 + $0x208] sm:$0xff]  ;;  %v2416_v8 = vld [vmem:[%s7305_s3 + $0xb8] sm:$0xff] }
 0x1d0   :  { %v4680_v51 = vpop.eup %4679  ;;  %4699 = vrcp.f32 %v2090_v52  ;;  %v2020_v32 = vadd.f32 1.0, %v4678_v48  ;;  %v2645_v30 = vpop.permute.xlu1 %2644  ;;  %v3826_v11 = vmul.f32 -1.442695, %v1471_v36  ;;  %v7343_v13 = vld [vmem:[#allocation18_spill] sm:$0xff]  ;;  %v3757_v17 = vmul.f32 -1.442695, %v1126_v14 }
 0x1d1   :  { %v4682_v1 = vpop.eup %4681  ;;  %4701 = vrcp.f32 %v2089_v18  ;;  %3492 = vst.msk [vmem:[%s7306_s4 + $0x2d0] sm:$0xff] %vm3401_vm1, %v3347_v53  ;;  %v3278_v59 = vmul.f32 %v2645_v30, %v2414_v28  ;;  %2804 = vperm.xlu1 %4236, %v4680_v51   ;;  %v3756_v38 = vmul.f32 -1.442695, %v1121_v23  ;;  %v1136_v6 = vadd.f32 %v5920_v55, %v232_v15  ;;  %v2415_v48 = vld [vmem:[%s7305_s3 + $0xb0] sm:$0xff]  ;;  %v2488_v27 = vld [vmem:[%s7305_s3 + $0x2f8] sm:$0xff]  ;;  %v304_v15 = vld [vmem:[%s7304_s2 + $0x448] sm:$0xff] }
 0x1d2   :  { %v4684_v19 = vpop.eup %4683  ;;  %4703 = vrcp.f32 %v2020_v32  ;;  %v2640_v25 = vpop.permute.xlu0 %2639  ;;  %v3829_v18 = vmul.f32 -1.442695, %v1486_v43  ;;  %v1131_v30 = vadd.f32 %v5927_v33, %v231_v20  ;;  %v2418_v33 = vld [vmem:[%s7305_s3 + $0xc8] sm:$0xff]  ;;  %v306_v20 = vld [vmem:[%s7304_s2 + $0x458] sm:$0xff] }
 0x1d3   :  { %v4686_v37 = vpop.eup %4685  ;;  %4705 = vpow2.f32 %v3752_v9  ;;  %v3277_v29 = vmul.f32 %v2640_v25, %v2413_v62  ;;  %2799 = vperm.xlu0 %4235, %v4682_v1   ;;  %3423 = vst.msk [vmem:[%s7306_s4 + $0xa8] sm:$0xff] %vm3401_vm1, %v3278_v59  ;;  %v1481_v9 = vadd.f32 %v7343_v13, %v301_v5  ;;  %v3759_v16 = vmul.f32 -1.442695, %v1136_v6  ;;  %v2490_v13 = vld [vmem:[%s7305_s3 + $0x308] sm:$0xff]  ;;  %v233_v6 = vld [vmem:[%s7304_s2 + $0x210] sm:$0xff] }
 0x1d4   :  { %v4688_v10 = vpop.eup %4687  ;;  %4707 = vpow2.f32 %v3825_v54  ;;  %v3005_v60 = vpop.permute.xlu1 %3004 }
 0x1d5   :  { %v4690_v12 = vpop.eup %4689  ;;  %4709 = vpow2.f32 %v3824_v3  ;;  %3422 = vst.msk [vmem:[%s7306_s4 + $0xa0] sm:$0xff] %vm3401_vm1, %v3277_v29  ;;  %v3350_v4 = vmul.f32 %v3005_v60, %v2486_v42  ;;  %3164 = vperm.xlu1 %4236, %v4684_v19   ;;  %v3828_v28 = vmul.f32 -1.442695, %v1481_v9  ;;  %v2487_v3 = vld [vmem:[%s7305_s3 + $0x2f0] sm:$0xff]  ;;  %v3758_v42 = vmul.f32 -1.442695, %v1131_v30 }
 0x1d6   :  { %v4692_v49 = vpop.eup %4691  ;;  %4711 = vpow2.f32 %v3755_v50  ;;  %v3000_v24 = vpop.permute.xlu0 %2999  ;;  %v303_v9 = vld [vmem:[%s7304_s2 + $0x440] sm:$0xff]  ;;  %v1141_v30 = vadd.f32 %v5962_v22, %v233_v6  ;;  %v237_v6 = vld [vmem:[%s7304_s2 + $0x230] sm:$0xff] }
 0x1d7   :  { %v4694_v46 = vpop.eup %4693  ;;  %4713 = vpow2.f32 %v3754_v61  ;;  %v3349_v52 = vmul.f32 %v3000_v24, %v2485_v2  ;;  %3159 = vperm.xlu0 %4235, %v4686_v37   ;;  %3495 = vst.msk [vmem:[%s7306_s4 + $0x2e8] sm:$0xff] %vm3401_vm1, %v3350_v4  ;;  %v2417_v61 = vld [vmem:[%s7305_s3 + $0xc0] sm:$0xff] }
 0x1d8   :  { %v4696_v21 = vpop.eup %4695  ;;  %4715 = vpow2.f32 %v3827_v35  ;;  %v2655_v55 = vpop.permute.xlu1 %2654  ;;  %v2489_v24 = vld [vmem:[%s7305_s3 + $0x300] sm:$0xff] }
 0x1d9   :  { %v4698_v53 = vpop.eup %4697  ;;  %3494 = vst.msk [vmem:[%s7306_s4 + $0x2e0] sm:$0xff] %vm3401_vm1, %v3349_v52  ;;  %4717 = vpow2.f32 %v3826_v11  ;;  %v3280_v51 = vmul.f32 %v2655_v55, %v2416_v8  ;;  %2814 = vperm.xlu1 %4236, %v4688_v10   ;;  %v7344_v55 = vld [vmem:[#allocation19_spill] sm:$0xff] }
 0x1da   :  { %v6542_v45 = vpop.eup %4699  ;;  %v2650_v32 = vpop.permute.xlu0 %2649  ;;  %4719 = vpow2.f32 %v3757_v17  ;;  %v234_v17 = vld [vmem:[%s7304_s2 + $0x218] sm:$0xff] }
 0x1db   :  { %v6544_v54 = vpop.eup %4701  ;;  %v3279_v62 = vmul.f32 %v2650_v32, %v2415_v48  ;;  %2809 = vperm.xlu0 %4235, %v4690_v12   ;;  %4721 = vpow2.f32 %v3756_v38  ;;  %3425 = vst.msk [vmem:[%s7306_s4 + $0xb8] sm:$0xff] %vm3401_vm1, %v3280_v51  ;;  %v1496_v38 = vadd.f32 %v5942_v58, %v304_v15 }
 0x1dc   :  { %v6549_v1 = vpop.eup %4703  ;;  %4723 = vpow2.f32 %v3829_v18  ;;  %v3015_v41 = vpop.permute.xlu1 %3014 }
 0x1dd   :  { %v4706_v36 = vpop.eup %4705  ;;  %3424 = vst.msk [vmem:[%s7306_s4 + $0xb0] sm:$0xff] %vm3401_vm1, %v3279_v62  ;;  %4725 = vpow2.f32 %v3828_v28  ;;  %v3352_v25 = vmul.f32 %v3015_v41, %v2488_v27  ;;  %3174 = vperm.xlu1 %4236, %v4692_v49   ;;  %v1491_v28 = vadd.f32 %v7344_v55, %v303_v9  ;;  %v2420_v62 = vld [vmem:[%s7305_s3 + $0xd8] sm:$0xff]  ;;  %v7345_v27 = vld [vmem:[#allocation20_spill] sm:$0xff]  ;;  %v3831_v41 = vmul.f32 -1.442695, %v1496_v38 }
 0x1de   :  { %v4708_v19 = vpop.eup %4707  ;;  %v2019_v59 = vadd.f32 1.0, %v4706_v36  ;;  %v3010_v50 = vpop.permute.xlu0 %3009  ;;  %4727 = vpow2.f32 %v3759_v16  ;;  %v1146_v16 = vadd.f32 %v7345_v27, %v234_v17 }
 0x1df   :  { %v4710_v57 = vpop.eup %4709  ;;  %v2092_v14 = vadd.f32 1.0, %v4708_v19  ;;  %v3351_v5 = vmul.f32 %v3010_v50, %v2487_v3  ;;  %3169 = vperm.xlu0 %4235, %v4694_v46   ;;  %3497 = vst.msk [vmem:[%s7306_s4 + $0x2f8] sm:$0xff] %vm3401_vm1, %v3352_v25  ;;  %v236_v25 = vld [vmem:[%s7304_s2 + $0x228] sm:$0xff] }
 0x1e0   :  { %v4712_v37 = vpop.eup %4711  ;;  %4729 = vrcp.f32 %v2019_v59  ;;  %v2091_v29 = vadd.f32 1.0, %v4710_v57  ;;  %v2665_v10 = vpop.permute.xlu1 %2664  ;;  %v1506_v59 = vadd.f32 %v5965_v47, %v306_v20  ;;  %v3830_v57 = vmul.f32 -1.442695, %v1491_v28  ;;  %v2494_v28 = vld [vmem:[%s7305_s3 + $0x328] sm:$0xff] }
 0x1e1   :  { %v4714_v63 = vpop.eup %4713  ;;  %4731 = vrcp.f32 %v2092_v14  ;;  %v2022_v23 = vadd.f32 1.0, %v4712_v37  ;;  %3496 = vst.msk [vmem:[%s7306_s4 + $0x2f0] sm:$0xff] %vm3401_vm1, %v3351_v5  ;;  %v3282_v26 = vmul.f32 %v2665_v10, %v2418_v33  ;;  %2824 = vperm.xlu1 %4236, %v4696_v21   ;;  %v235_v33 = vld [vmem:[%s7304_s2 + $0x220] sm:$0xff] }
 0x1e2   :  { %v4716_v2 = vpop.eup %4715  ;;  %4733 = vrcp.f32 %v2091_v29  ;;  %v2021_v35 = vadd.f32 1.0, %v4714_v63  ;;  %v2660_v43 = vpop.permute.xlu0 %2659  ;;  %v3761_v29 = vmul.f32 -1.442695, %v1146_v16  ;;  %v1156_v63 = vadd.f32 %v5971_v44, %v236_v25 }
 0x1e3   :  { %v4718_v12 = vpop.eup %4717  ;;  %v2094_v60 = vadd.f32 1.0, %v4716_v2  ;;  %v3281_v11 = vmul.f32 %v2660_v43, %v2417_v61  ;;  %2819 = vperm.xlu0 %4235, %v4698_v53   ;;  %3427 = vst.msk [vmem:[%s7306_s4 + $0xc8] sm:$0xff] %vm3401_vm1, %v3282_v26  ;;  %4735 = vpow2.f32 %v3758_v42  ;;  %v2492_v61 = vld [vmem:[%s7305_s3 + $0x318] sm:$0xff]  ;;  %v3833_v2 = vmul.f32 -1.442695, %v1506_v59  ;;  %v307_v26 = vld [vmem:[%s7304_s2 + $0x460] sm:$0xff] }
 0x1e4   :  { %v4720_v49 = vpop.eup %4719  ;;  %v2093_v4 = vadd.f32 1.0, %v4718_v12  ;;  %4737 = vrcp.f32 %v2022_v23  ;;  %v3025_v8 = vpop.permute.xlu1 %3024  ;;  %v308_v23 = vld [vmem:[%s7304_s2 + $0x468] sm:$0xff]  ;;  %v3763_v17 = vmul.f32 -1.442695, %v1156_v63  ;;  %v2424_v59 = vld [vmem:[%s7305_s3 + $0xf8] sm:$0xff] }
 0x1e5   :  { %v4722_v46 = vpop.eup %4721  ;;  %v2024_v52 = vadd.f32 1.0, %v4720_v49  ;;  %3426 = vst.msk [vmem:[%s7306_s4 + $0xc0] sm:$0xff] %vm3401_vm1, %v3281_v11  ;;  %4739 = vrcp.f32 %v2021_v35  ;;  %v3354_v18 = vmul.f32 %v3025_v8, %v2490_v13  ;;  %3184 = vperm.xlu1 %4236, %v6542_v45   ;;  %v305_v45 = vld [vmem:[%s7304_s2 + $0x450] sm:$0xff]  ;;  %v1151_v35 = vadd.f32 %v5973_v7, %v235_v33  ;;  %v2422_v7 = vld [vmem:[%s7305_s3 + $0xe8] sm:$0xff] }
 0x1e6   :  { %v4724_v21 = vpop.eup %4723  ;;  %v2023_v48 = vadd.f32 1.0, %v4722_v46  ;;  %v3020_v53 = vpop.permute.xlu0 %3019  ;;  %4741 = vrcp.f32 %v2094_v60  ;;  %v1501_v5 = vadd.f32 %v5967_v31, %v305_v45  ;;  %v3760_v31 = vmul.f32 -1.442695, %v1141_v30  ;;  %v238_v60 = vld [vmem:[%s7304_s2 + $0x238] sm:$0xff] }
 0x1e7   :  { %v4726_v51 = vpop.eup %4725  ;;  %v2096_v58 = vadd.f32 1.0, %v4724_v21  ;;  %v3353_v32 = vmul.f32 %v3020_v53, %v2489_v24  ;;  %3179 = vperm.xlu0 %4235, %v6544_v54   ;;  %4743 = vrcp.f32 %v2093_v4  ;;  %3499 = vst.msk [vmem:[%s7306_s4 + $0x308] sm:$0xff] %vm3401_vm1, %v3354_v18  ;;  %v2419_v54 = vld [vmem:[%s7305_s3 + $0xd0] sm:$0xff]  ;;  %v1516_v49 = vadd.f32 %v5981_v39, %v308_v23  ;;  %v2421_v24 = vld [vmem:[%s7305_s3 + $0xe0] sm:$0xff] }
 0x1e8   :  { %v2095_v3 = vadd.f32 1.0, %v4726_v51  ;;  %v4728_v36 = vpop.eup %4727  ;;  %4745 = vrcp.f32 %v2024_v52  ;;  %v2675_v19 = vpop.permute.xlu1 %2674  ;;  %v3832_v12 = vmul.f32 -1.442695, %v1501_v5  ;;  %v1511_v46 = vadd.f32 %v5983_v56, %v307_v26  ;;  %v2493_v51 = vld [vmem:[%s7305_s3 + $0x320] sm:$0xff] }
 0x1e9   :  { %3498 = vst.msk [vmem:[%s7306_s4 + $0x300] sm:$0xff] %vm3401_vm1, %v3353_v32  ;;  %4747 = vrcp.f32 %v2023_v48  ;;  %v3284_v14 = vmul.f32 %v2675_v19, %v2420_v62  ;;  %2834 = vperm.xlu1 %4236, %v6549_v1   ;;  %v2491_v1 = vld [vmem:[%s7305_s3 + $0x310] sm:$0xff]  ;;  %v2026_v13 = vadd.f32 1.0, %v4728_v36  ;;  %v3762_v8 = vmul.f32 -1.442695, %v1151_v35  ;;  %v7346_v32 = vld [vmem:[#allocation21_spill] sm:$0xff] }
 0x1ea   :  { %v4730_v50 = vpop.eup %4729  ;;  %v2670_v22 = vpop.permute.xlu0 %2669  ;;  %4749 = vrcp.f32 %v2096_v58  ;;  %v1166_v38 = vadd.f32 %v5993_v0, %v238_v60  ;;  %v3835_v20 = vmul.f32 -1.442695, %v1516_v49  ;;  %v3834_v58 = vmul.f32 -1.442695, %v1511_v46  ;;  %v309_v35 = vld [vmem:[%s7304_s2 + $0x470] sm:$0xff]  ;;  %v2426_v49 = vld [vmem:[%s7305_s3 + $0x108] sm:$0xff] }
 0x1eb   :  { %v4732_v37 = vpop.eup %4731  ;;  %v3283_v47 = vmul.f32 %v2670_v22, %v2419_v54  ;;  %2829 = vperm.xlu0 %4235, %v4730_v50   ;;  %4751 = vrcp.f32 %v2095_v3  ;;  %3429 = vst.msk [vmem:[%s7306_s4 + $0xd8] sm:$0xff] %vm3401_vm1, %v3284_v14  ;;  %v1161_v62 = vadd.f32 %v7346_v32, %v237_v6  ;;  %v310_v3 = vld [vmem:[%s7304_s2 + $0x478] sm:$0xff] }
 0x1ec   :  { %v4734_v42 = vpop.eup %4733  ;;  %4753 = vpow2.f32 %v3831_v41  ;;  %v3035_v10 = vpop.permute.xlu1 %3034  ;;  %v3765_v45 = vmul.f32 -1.442695, %v1166_v38  ;;  %v1526_v22 = vadd.f32 %v6018_v34, %v310_v3  ;;  %v2496_v34 = vld [vmem:[%s7305_s3 + $0x338] sm:$0xff]  ;;  %v2427_v3 = vld [vmem:[%s7305_s3 + $0x110] sm:$0xff] }
 0x1ed   :  { %3428 = vst.msk [vmem:[%s7306_s4 + $0xd0] sm:$0xff] %vm3401_vm1, %v3283_v47  ;;  %v4736_v43 = vpop.eup %4735  ;;  %4755 = vpow2.f32 %v3830_v57  ;;  %v3356_v44 = vmul.f32 %v3035_v10, %v2492_v61  ;;  %3194 = vperm.xlu1 %4236, %v4732_v37   ;;  %v2423_v57 = vld [vmem:[%s7305_s3 + $0xf0] sm:$0xff]  ;;  %v3764_v14 = vmul.f32 -1.442695, %v1161_v62 }
 0x1ee   :  { %v3030_v15 = vpop.permute.xlu0 %3029  ;;  %v4738_v11 = vpop.eup %4737  ;;  %4757 = vpow2.f32 %v3761_v29  ;;  %v2025_v48 = vadd.f32 1.0, %v4736_v43  ;;  %v2495_v10 = vld [vmem:[%s7305_s3 + $0x330] sm:$0xff] }
 0x1ef   :  { %v3355_v9 = vmul.f32 %v3030_v15, %v2491_v1  ;;  %3189 = vperm.xlu0 %4235, %v4734_v42   ;;  %v4740_v4 = vpop.eup %4739  ;;  %4759 = vpow2.f32 %v3760_v31  ;;  %3501 = vst.msk [vmem:[%s7306_s4 + $0x318] sm:$0xff] %vm3401_vm1, %v3356_v44 }
 0x1f0   :  { %v4742_v52 = vpop.eup %4741  ;;  %4761 = vpow2.f32 %v3833_v2  ;;  %v2685_v39 = vpop.permute.xlu1 %2684  ;;  %v3837_v2 = vmul.f32 -1.442695, %v1526_v22  ;;  %v2499_v22 = vld [vmem:[%s7305_s3 + $0x350] sm:$0xff] }
 0x1f1   :  { %3500 = vst.msk [vmem:[%s7306_s4 + $0x310] sm:$0xff] %vm3401_vm1, %v3355_v9  ;;  %v4744_v21 = vpop.eup %4743  ;;  %4763 = vpow2.f32 %v3832_v12  ;;  %v3286_v18 = vmul.f32 %v2685_v39, %v2422_v7  ;;  %2844 = vperm.xlu1 %4236, %v4738_v11   ;;  %v1521_v7 = vadd.f32 %v6028_v40, %v309_v35 }
 0x1f2   :  { %v2680_v56 = vpop.permute.xlu0 %2679  ;;  %v4746_v53 = vpop.eup %4745  ;;  %4765 = vrcp.f32 %v2026_v13 }
 0x1f3   :  { %v3285_v55 = vmul.f32 %v2680_v56, %v2421_v24  ;;  %2839 = vperm.xlu0 %4235, %v4740_v4   ;;  %v4748_v0 = vpop.eup %4747  ;;  %3431 = vst.msk [vmem:[%s7306_s4 + $0xe8] sm:$0xff] %vm3401_vm1, %v3286_v18  ;;  %4767 = vpow2.f32 %v3763_v17  ;;  %v2425_v24 = vld [vmem:[%s7305_s3 + $0x100] sm:$0xff]  ;;  %v2498_v18 = vld [vmem:[%s7305_s3 + $0x348] sm:$0xff] }
 0x1f4   :  { %v4750_v27 = vpop.eup %4749  ;;  %4769 = vpow2.f32 %v3762_v8  ;;  %v3045_v16 = vpop.permute.xlu1 %3044 }
 0x1f5   :  { %3430 = vst.msk [vmem:[%s7306_s4 + $0xe0] sm:$0xff] %vm3401_vm1, %v3285_v55  ;;  %v4752_v54 = vpop.eup %4751  ;;  %4771 = vrcp.f32 %v2025_v48  ;;  %v3358_v30 = vmul.f32 %v3045_v16, %v2494_v28  ;;  %3204 = vperm.xlu1 %4236, %v4742_v52   ;;  %v2428_v16 = vld [vmem:[%s7305_s3 + $0x118] sm:$0xff] }
 0x1f6   :  { %v3040_v36 = vpop.permute.xlu0 %3039  ;;  %v4754_v41 = vpop.eup %4753  ;;  %4773 = vpow2.f32 %v3835_v20 }
 0x1f7   :  { %v3357_v19 = vmul.f32 %v3040_v36, %v2493_v51  ;;  %3199 = vperm.xlu0 %4235, %v4744_v21   ;;  %v4756_v25 = vpop.eup %4755  ;;  %v2098_v50 = vadd.f32 1.0, %v4754_v41  ;;  %3503 = vst.msk [vmem:[%s7306_s4 + $0x328] sm:$0xff] %vm3401_vm1, %v3358_v30  ;;  %4775 = vpow2.f32 %v3834_v58  ;;  %v3836_v21 = vmul.f32 -1.442695, %v1521_v7  ;;  %v2432_v7 = vld [vmem:[%s7305_s3 + $0x138] sm:$0xff] }
 0x1f8   :  { %v4758_v5 = vpop.eup %4757  ;;  %v2097_v33 = vadd.f32 1.0, %v4756_v25  ;;  %v2695_v37 = vpop.permute.xlu1 %2694  ;;  %4777 = vpow2.f32 %v3765_v45 }
 0x1f9   :  { %3502 = vst.msk [vmem:[%s7306_s4 + $0x320] sm:$0xff] %vm3401_vm1, %v3357_v19  ;;  %v4760_v47 = vpop.eup %4759  ;;  %4779 = vrcp.f32 %v2098_v50  ;;  %v2028_v29 = vadd.f32 1.0, %v4758_v5  ;;  %v3288_v61 = vmul.f32 %v2695_v37, %v2424_v59  ;;  %2854 = vperm.xlu1 %4236, %v4746_v53   ;;  %v2497_v53 = vld [vmem:[%s7305_s3 + $0x340] sm:$0xff] }
 0x1fa   :  { %v2690_v42 = vpop.permute.xlu0 %2689  ;;  %v4762_v31 = vpop.eup %4761  ;;  %4781 = vrcp.f32 %v2097_v33  ;;  %v2027_v1 = vadd.f32 1.0, %v4760_v47 }
 0x1fb   :  { %v3287_v63 = vmul.f32 %v2690_v42, %v2423_v57  ;;  %2849 = vperm.xlu0 %4235, %v4748_v0   ;;  %v4764_v23 = vpop.eup %4763  ;;  %3433 = vst.msk [vmem:[%s7306_s4 + $0xf8] sm:$0xff] %vm3401_vm1, %v3288_v61  ;;  %4783 = vpow2.f32 %v3764_v14  ;;  %v2100_v43 = vadd.f32 1.0, %v4762_v31  ;;  %v2500_v57 = vld [vmem:[%s7305_s3 + $0x358] sm:$0xff]  ;;  %v2430_v42 = vld [vmem:[%s7305_s3 + $0x128] sm:$0xff] }
 0x1fc   :  { %v4766_v26 = vpop.eup %4765  ;;  %4785 = vrcp.f32 %v2028_v29  ;;  %v3055_v44 = vpop.permute.xlu1 %3054  ;;  %v2099_v12 = vadd.f32 1.0, %v4764_v23 }
 0x1fd   :  { %3432 = vst.msk [vmem:[%s7306_s4 + $0xf0] sm:$0xff] %vm3401_vm1, %v3287_v63  ;;  %v4768_v15 = vpop.eup %4767  ;;  %4787 = vrcp.f32 %v2027_v1  ;;  %v3360_v60 = vmul.f32 %v3055_v44, %v2496_v34  ;;  %3214 = vperm.xlu1 %4236, %v4750_v27   ;;  %v2429_v1 = vld [vmem:[%s7305_s3 + $0x120] sm:$0xff] }
 0x1fe   :  { %v3050_v11 = vpop.permute.xlu0 %3049  ;;  %v4770_v13 = vpop.eup %4769  ;;  %4789 = vpow2.f32 %v3837_v2  ;;  %v2030_v46 = vadd.f32 1.0, %v4768_v15  ;;  %v2501_v15 = vld [vmem:[%s7305_s3 + $0x360] sm:$0xff] }
 0x1ff   :  { %v3359_v9 = vmul.f32 %v3050_v11, %v2495_v10  ;;  %3209 = vperm.xlu0 %4235, %v4752_v54   ;;  %v4772_v4 = vpop.eup %4771  ;;  %3505 = vst.msk [vmem:[%s7306_s4 + $0x338] sm:$0xff] %vm3401_vm1, %v3360_v60  ;;  %4791 = vrcp.f32 %v2100_v43  ;;  %v2029_v39 = vadd.f32 1.0, %v4770_v13  ;;  %v2502_v43 = vld [vmem:[%s7305_s3 + $0x368] sm:$0xff] }
 0x200   :  { %v4774_v17 = vpop.eup %4773  ;;  %v2705_v40 = vpop.permute.xlu1 %2704  ;;  %4793 = vrcp.f32 %v2099_v12 }
 0x201   :  { %3504 = vst.msk [vmem:[%s7306_s4 + $0x330] sm:$0xff] %vm3401_vm1, %v3359_v9  ;;  %v4776_v52 = vpop.eup %4775  ;;  %v3290_v8 = vmul.f32 %v2705_v40, %v2426_v49  ;;  %2864 = vperm.xlu1 %4236, %v4766_v26   ;;  %4795 = vrcp.f32 %v2030_v46  ;;  %v2102_v28 = vadd.f32 1.0, %v4774_v17 }
 0x202   :  { %v2700_v38 = vpop.permute.xlu0 %2699  ;;  %v4778_v6 = vpop.eup %4777  ;;  %4797 = vrcp.f32 %v2029_v39  ;;  %v2101_v51 = vadd.f32 1.0, %v4776_v52  ;;  %v2504_v39 = vld [vmem:[%s7305_s3 + $0x378] sm:$0xff] }
 0x203   :  { %v3289_v48 = vmul.f32 %v2700_v38, %v2425_v24  ;;  %2859 = vperm.xlu0 %4235, %v4772_v4   ;;  %v4780_v56 = vpop.eup %4779  ;;  %3435 = vst.msk [vmem:[%s7306_s4 + $0x108] sm:$0xff] %vm3401_vm1, %v3290_v8  ;;  %4799 = vpow2.f32 %v3836_v21  ;;  %v2032_v54 = vadd.f32 1.0, %v4778_v6  ;;  %v2431_v4 = vld [vmem:[%s7305_s3 + $0x130] sm:$0xff] }
 0x204   :  { %v4782_v55 = vpop.eup %4781  ;;  %v3065_v20 = vpop.permute.xlu1 %3064  ;;  %4801 = vrcp.f32 %v2102_v28  ;;  %v2503_v8 = vld [vmem:[%s7305_s3 + $0x370] sm:$0xff] }
 0x205   :  { %3434 = vst.msk [vmem:[%s7306_s4 + $0x100] sm:$0xff] %vm3401_vm1, %v3289_v48  ;;  %v4784_v0 = vpop.eup %4783  ;;  %v3362_v58 = vmul.f32 %v3065_v20, %v2498_v18  ;;  %3224 = vperm.xlu1 %4236, %v4780_v56   ;;  %4803 = vrcp.f32 %v2101_v51  ;;  %v2434_v56 = vld [vmem:[%s7305_s3 + $0x148] sm:$0xff] }
 0x206   :  { %v3060_v32 = vpop.permute.xlu0 %3059  ;;  %v4786_v62 = vpop.eup %4785  ;;  %v2031_v41 = vadd.f32 1.0, %v4784_v0  ;;  %4805 = vrcp.f32 %v2032_v54  ;;  %v2506_v51 = vld [vmem:[%s7305_s3 + $0x388] sm:$0xff] }
 0x207   :  { %v3361_v27 = vmul.f32 %v3060_v32, %v2497_v53  ;;  %3219 = vperm.xlu0 %4235, %v4782_v55   ;;  %v4788_v45 = vpop.eup %4787  ;;  %3507 = vst.msk [vmem:[%s7306_s4 + $0x348] sm:$0xff] %vm3401_vm1, %v3362_v58  ;;  %v2433_v53 = vld [vmem:[%s7305_s3 + $0x140] sm:$0xff] }
 0x208   :  { %v2715_v30 = vpop.permute.xlu1 %2714  ;;  %v4790_v36 = vpop.eup %4789  ;;  %4807 = vrcp.f32 %v2031_v41  ;;  %v2505_v58 = vld [vmem:[%s7305_s3 + $0x380] sm:$0xff] }
 0x209   :  { %3506 = vst.msk [vmem:[%s7306_s4 + $0x340] sm:$0xff] %vm3401_vm1, %v3361_v27  ;;  %v3292_v19 = vmul.f32 %v2715_v30, %v2428_v16  ;;  %2874 = vperm.xlu1 %4236, %v4786_v62   ;;  %v4792_v25 = vpop.eup %4791  ;;  %v2104_v5 = vadd.f32 1.0, %v4790_v36 }
 0x20a   :  { %v2710_v59 = vpop.permute.xlu0 %2709  ;;  %v4794_v14 = vpop.eup %4793 }
 0x20b   :  { %v3291_v50 = vmul.f32 %v2710_v59, %v2427_v3  ;;  %2869 = vperm.xlu0 %4235, %v4788_v45   ;;  %3437 = vst.msk [vmem:[%s7306_s4 + $0x118] sm:$0xff] %vm3401_vm1, %v3292_v19  ;;  %v4796_v29 = vpop.eup %4795  ;;  %4809 = vrcp.f32 %v2104_v5  ;;  %v2436_v45 = vld [vmem:[%s7305_s3 + $0x158] sm:$0xff]  ;;  %v2435_v3 = vld [vmem:[%s7305_s3 + $0x150] sm:$0xff]  ;;  %v2437_v5 = vld [vmem:[%s7305_s3 + $0x160] sm:$0xff] }
 0x20c   :  { %v3075_v33 = vpop.permute.xlu1 %3074  ;;  %v4798_v31 = vpop.eup %4797  ;;  %v2508_v19 = vld [vmem:[%s7305_s3 + $0x398] sm:$0xff]  ;;  %v2507_v59 = vld [vmem:[%s7305_s3 + $0x390] sm:$0xff] }
 0x20d   :  { %3436 = vst.msk [vmem:[%s7306_s4 + $0x110] sm:$0xff] %vm3401_vm1, %v3291_v50  ;;  %v3364_v37 = vmul.f32 %v3075_v33, %v2500_v57  ;;  %3234 = vperm.xlu1 %4236, %v4792_v25   ;;  %v4800_v63 = vpop.eup %4799 }
 0x20e   :  { %v3070_v47 = vpop.permute.xlu0 %3069  ;;  %v2103_v23 = vadd.f32 1.0, %v4800_v63  ;;  %v4802_v35 = vpop.eup %4801 }
 0x20f   :  { %v3363_v61 = vmul.f32 %v3070_v47, %v2499_v22  ;;  %3229 = vperm.xlu0 %4235, %v4794_v14   ;;  %3509 = vst.msk [vmem:[%s7306_s4 + $0x358] sm:$0xff] %vm3401_vm1, %v3364_v37  ;;  %v4804_v44 = vpop.eup %4803  ;;  %v2438_v22 = vld [vmem:[%s7305_s3 + $0x168] sm:$0xff] }
 0x210   :  { %v2725_v34 = vpop.permute.xlu1 %2724  ;;  %4811 = vrcp.f32 %v2103_v23  ;;  %v4806_v13 = vpop.eup %4805  ;;  %v2440_v23 = vld [vmem:[%s7305_s3 + $0x178] sm:$0xff] }
 0x211   :  { %3508 = vst.msk [vmem:[%s7306_s4 + $0x350] sm:$0xff] %vm3401_vm1, %v3363_v61  ;;  %v3294_v10 = vmul.f32 %v2725_v34, %v2430_v42  ;;  %2884 = vperm.xlu1 %4236, %v4796_v29   ;;  %v2510_v61 = vld [vmem:[%s7305_s3 + $0x3a8] sm:$0xff]  ;;  %v2509_v42 = vld [vmem:[%s7305_s3 + $0x3a0] sm:$0xff] }
 0x212   :  { %v2720_v2 = vpop.permute.xlu0 %2719  ;;  %v4808_v49 = vpop.eup %4807 }
 0x213   :  { %v3293_v26 = vmul.f32 %v2720_v2, %v2429_v1  ;;  %2879 = vperm.xlu0 %4235, %v4798_v31   ;;  %3439 = vst.msk [vmem:[%s7306_s4 + $0x128] sm:$0xff] %vm3401_vm1, %v3294_v10  ;;  %v2439_v10 = vld [vmem:[%s7305_s3 + $0x170] sm:$0xff] }
 0x214   :  { %v3085_v12 = vpop.permute.xlu1 %3084 }
 0x215   :  { %3438 = vst.msk [vmem:[%s7306_s4 + $0x120] sm:$0xff] %vm3401_vm1, %v3293_v26  ;;  %v3366_v60 = vmul.f32 %v3085_v12, %v2502_v43  ;;  %3244 = vperm.xlu1 %4236, %v4802_v35   ;;  %v4810_v40 = vpop.eup %4809 }
 0x216   :  { %v3080_v11 = vpop.permute.xlu0 %3079 }
 0x217   :  { %v3365_v9 = vmul.f32 %v3080_v11, %v2501_v15  ;;  %3239 = vperm.xlu0 %4235, %v4804_v44   ;;  %3511 = vst.msk [vmem:[%s7306_s4 + $0x368] sm:$0xff] %vm3401_vm1, %v3366_v60  ;;  %v2512_v44 = vld [vmem:[%s7305_s3 + $0x3b8] sm:$0xff]  ;;  %v2511_v15 = vld [vmem:[%s7305_s3 + $0x3b0] sm:$0xff] }
 0x218   :  { %v2735_v24 = vpop.permute.xlu1 %2734 }
 0x219   :  { %3510 = vst.msk [vmem:[%s7306_s4 + $0x360] sm:$0xff] %vm3401_vm1, %v3365_v9  ;;  %v3296_v17 = vmul.f32 %v2735_v24, %v2432_v7  ;;  %2894 = vperm.xlu1 %4236, %v4806_v13   ;;  %v2442_v9 = vld [vmem:[%s7305_s3 + $0x188] sm:$0xff]  ;;  %v2441_v7 = vld [vmem:[%s7305_s3 + $0x180] sm:$0xff] }
 0x21a   :  { %v2730_v46 = vpop.permute.xlu0 %2729  ;;  %v4812_v6 = vpop.eup %4811 }
 0x21b   :  { %v3295_v52 = vmul.f32 %v2730_v46, %v2431_v4  ;;  %2889 = vperm.xlu0 %4235, %v4808_v49   ;;  %3441 = vst.msk [vmem:[%s7306_s4 + $0x138] sm:$0xff] %vm3401_vm1, %v3296_v17  ;;  %v2514_v46 = vld [vmem:[%s7305_s3 + $0x3c8] sm:$0xff] }
 0x21c   :  { %v3095_v38 = vpop.permute.xlu1 %3094 }
 0x21d   :  { %3440 = vst.msk [vmem:[%s7306_s4 + $0x130] sm:$0xff] %vm3401_vm1, %v3295_v52  ;;  %v3368_v21 = vmul.f32 %v3095_v38, %v2504_v39  ;;  %3254 = vperm.xlu1 %4236, %v4810_v40   ;;  %v2513_v40 = vld [vmem:[%s7305_s3 + $0x3c0] sm:$0xff] }
 0x21e   :  { %v3090_v48 = vpop.permute.xlu0 %3089 }
 0x21f   :  { %v3367_v18 = vmul.f32 %v3090_v48, %v2503_v8  ;;  %3249 = vperm.xlu0 %4235, %v4812_v6   ;;  %3513 = vst.msk [vmem:[%s7306_s4 + $0x378] sm:$0xff] %vm3401_vm1, %v3368_v21  ;;  %v2444_v6 = vld [vmem:[%s7305_s3 + $0x198] sm:$0xff]  ;;  %v2443_v21 = vld [vmem:[%s7305_s3 + $0x190] sm:$0xff] }
 0x220   :  { %v2745_v55 = vpop.permute.xlu1 %2744 }
 0x221   :  { %3512 = vst.msk [vmem:[%s7306_s4 + $0x370] sm:$0xff] %vm3401_vm1, %v3367_v18  ;;  %v3298_v28 = vmul.f32 %v2745_v55, %v2434_v56  ;;  %v2516_v55 = vld [vmem:[%s7305_s3 + $0x3d8] sm:$0xff] }
 0x222   :  { %v2740_v20 = vpop.permute.xlu0 %2739 }
 0x223   :  { %v3297_v0 = vmul.f32 %v2740_v20, %v2433_v53  ;;  %3443 = vst.msk [vmem:[%s7306_s4 + $0x148] sm:$0xff] %vm3401_vm1, %v3298_v28  ;;  %v2515_v28 = vld [vmem:[%s7305_s3 + $0x3d0] sm:$0xff] }
 0x224   :  { %v3105_v32 = vpop.permute.xlu1 %3104 }
 0x225   :  { %3442 = vst.msk [vmem:[%s7306_s4 + $0x140] sm:$0xff] %vm3401_vm1, %v3297_v0  ;;  %v3370_v62 = vmul.f32 %v3105_v32, %v2506_v51  ;;  %v2446_v32 = vld [vmem:[%s7305_s3 + $0x1a8] sm:$0xff] }
 0x226   :  { %v3100_v27 = vpop.permute.xlu0 %3099 }
 0x227   :  { %v3369_v16 = vmul.f32 %v3100_v27, %v2505_v58  ;;  %3515 = vst.msk [vmem:[%s7306_s4 + $0x388] sm:$0xff] %vm3401_vm1, %v3370_v62  ;;  %v2445_v62 = vld [vmem:[%s7305_s3 + $0x1a0] sm:$0xff] }
 0x228   :  { %v2755_v54 = vpop.permute.xlu1 %2754 }
 0x229   :  { %3514 = vst.msk [vmem:[%s7306_s4 + $0x380] sm:$0xff] %vm3401_vm1, %v3369_v16  ;;  %v3300_v30 = vmul.f32 %v2755_v54, %v2436_v45  ;;  %v2518_v54 = vld [vmem:[%s7305_s3 + $0x3e8] sm:$0xff] }
 0x22a   :  { %v2750_v36 = vpop.permute.xlu0 %2749 }
 0x22b   :  { %v3299_v41 = vmul.f32 %v2750_v36, %v2435_v3  ;;  %3445 = vst.msk [vmem:[%s7306_s4 + $0x158] sm:$0xff] %vm3401_vm1, %v3300_v30  ;;  %v2517_v30 = vld [vmem:[%s7305_s3 + $0x3e0] sm:$0xff] }
 0x22c   :  { %v3115_v25 = vpop.permute.xlu1 %3114 }
 0x22d   :  { %3444 = vst.msk [vmem:[%s7306_s4 + $0x150] sm:$0xff] %vm3401_vm1, %v3299_v41  ;;  %v3372_v50 = vmul.f32 %v3115_v25, %v2508_v19  ;;  %v2448_v25 = vld [vmem:[%s7305_s3 + $0x1b8] sm:$0xff] }
 0x22e   :  { %v3110_v57 = vpop.permute.xlu0 %3109 }
 0x22f   :  { %v3371_v14 = vmul.f32 %v3110_v57, %v2507_v59  ;;  %3517 = vst.msk [vmem:[%s7306_s4 + $0x398] sm:$0xff] %vm3401_vm1, %v3372_v50  ;;  %v2447_v50 = vld [vmem:[%s7305_s3 + $0x1b0] sm:$0xff] }
 0x230   :  { %v2765_v33 = vpop.permute.xlu1 %2764 }
 0x231   :  { %3516 = vst.msk [vmem:[%s7306_s4 + $0x390] sm:$0xff] %vm3401_vm1, %v3371_v14  ;;  %v3302_v37 = vmul.f32 %v2765_v33, %v2438_v22  ;;  %v2520_v33 = vld [vmem:[%s7305_s3 + $0x3f8] sm:$0xff] }
 0x232   :  { %v2760_v47 = vpop.permute.xlu0 %2759 }
 0x233   :  { %v3301_v29 = vmul.f32 %v2760_v47, %v2437_v5  ;;  %3447 = vst.msk [vmem:[%s7306_s4 + $0x168] sm:$0xff] %vm3401_vm1, %v3302_v37  ;;  %v2519_v37 = vld [vmem:[%s7305_s3 + $0x3f0] sm:$0xff] }
 0x234   :  { %v3125_v31 = vpop.permute.xlu1 %3124 }
 0x235   :  { %3446 = vst.msk [vmem:[%s7306_s4 + $0x160] sm:$0xff] %vm3401_vm1, %v3301_v29  ;;  %v3374_v1 = vmul.f32 %v3125_v31, %v2510_v61  ;;  %v2450_v31 = vld [vmem:[%s7305_s3 + $0x1c8] sm:$0xff] }
 0x236   :  { %v3120_v63 = vpop.permute.xlu0 %3119 }
 0x237   :  { %v3373_v34 = vmul.f32 %v3120_v63, %v2509_v42  ;;  %3519 = vst.msk [vmem:[%s7306_s4 + $0x3a8] sm:$0xff] %vm3401_vm1, %v3374_v1  ;;  %v2449_v1 = vld [vmem:[%s7305_s3 + $0x1c0] sm:$0xff] }
 0x238   :  { %v2775_v2 = vpop.permute.xlu1 %2774 }
 0x239   :  { %3518 = vst.msk [vmem:[%s7306_s4 + $0x3a0] sm:$0xff] %vm3401_vm1, %v3373_v34  ;;  %v3304_v35 = vmul.f32 %v2775_v2, %v2440_v23  ;;  %v2522_v2 = vld [vmem:[%s7305_s3 + $0x408] sm:$0xff] }
 0x23a   :  { %v2770_v26 = vpop.permute.xlu0 %2769 }
 0x23b   :  { %v3303_v43 = vmul.f32 %v2770_v26, %v2439_v10  ;;  %3449 = vst.msk [vmem:[%s7306_s4 + $0x178] sm:$0xff] %vm3401_vm1, %v3304_v35  ;;  %v2521_v35 = vld [vmem:[%s7305_s3 + $0x400] sm:$0xff] }
 0x23c   :  { %v3135_v12 = vpop.permute.xlu1 %3134 }
 0x23d   :  { %3448 = vst.msk [vmem:[%s7306_s4 + $0x170] sm:$0xff] %vm3401_vm1, %v3303_v43  ;;  %v3376_v60 = vmul.f32 %v3135_v12, %v2512_v44  ;;  %v2452_v12 = vld [vmem:[%s7305_s3 + $0x1d8] sm:$0xff] }
 0x23e   :  { %v3130_v11 = vpop.permute.xlu0 %3129 }
 0x23f   :  { %v3375_v13 = vmul.f32 %v3130_v11, %v2511_v15  ;;  %3521 = vst.msk [vmem:[%s7306_s4 + $0x3b8] sm:$0xff] %vm3401_vm1, %v3376_v60  ;;  %v2451_v60 = vld [vmem:[%s7305_s3 + $0x1d0] sm:$0xff] }
 0x240   :  { %v2785_v49 = vpop.permute.xlu1 %2784 }
 0x241   :  { %3520 = vst.msk [vmem:[%s7306_s4 + $0x3b0] sm:$0xff] %vm3401_vm1, %v3375_v13  ;;  %v3306_v4 = vmul.f32 %v2785_v49, %v2442_v9  ;;  %v2524_v49 = vld [vmem:[%s7305_s3 + $0x418] sm:$0xff] }
 0x242   :  { %v2780_v24 = vpop.permute.xlu0 %2779 }
 0x243   :  { %v3305_v17 = vmul.f32 %v2780_v24, %v2441_v7  ;;  %3451 = vst.msk [vmem:[%s7306_s4 + $0x188] sm:$0xff] %vm3401_vm1, %v3306_v4  ;;  %v2523_v4 = vld [vmem:[%s7305_s3 + $0x410] sm:$0xff] }
 0x244   :  { %v3145_v52 = vpop.permute.xlu1 %3144 }
 0x245   :  { %3450 = vst.msk [vmem:[%s7306_s4 + $0x180] sm:$0xff] %vm3401_vm1, %v3305_v17  ;;  %v3378_v39 = vmul.f32 %v3145_v52, %v2514_v46  ;;  %v2454_v52 = vld [vmem:[%s7305_s3 + $0x1e8] sm:$0xff] }
 0x246   :  { %v3140_v8 = vpop.permute.xlu0 %3139 }
 0x247   :  { %v3377_v38 = vmul.f32 %v3140_v8, %v2513_v40  ;;  %3523 = vst.msk [vmem:[%s7306_s4 + $0x3c8] sm:$0xff] %vm3401_vm1, %v3378_v39  ;;  %v2453_v39 = vld [vmem:[%s7305_s3 + $0x1e0] sm:$0xff] }
 0x248   :  { %v2795_v48 = vpop.permute.xlu1 %2794 }
 0x249   :  { %3522 = vst.msk [vmem:[%s7306_s4 + $0x3c0] sm:$0xff] %vm3401_vm1, %v3377_v38  ;;  %v3308_v18 = vmul.f32 %v2795_v48, %v2444_v6  ;;  %v2526_v48 = vld [vmem:[%s7305_s3 + $0x428] sm:$0xff] }
 0x24a   :  { %v2790_v56 = vpop.permute.xlu0 %2789 }
 0x24b   :  { %v3307_v53 = vmul.f32 %v2790_v56, %v2443_v21  ;;  %3453 = vst.msk [vmem:[%s7306_s4 + $0x198] sm:$0xff] %vm3401_vm1, %v3308_v18  ;;  %v2525_v18 = vld [vmem:[%s7305_s3 + $0x420] sm:$0xff] }
 0x24c   :  { %v3155_v20 = vpop.permute.xlu1 %3154 }
 0x24d   :  { %3452 = vst.msk [vmem:[%s7306_s4 + $0x190] sm:$0xff] %vm3401_vm1, %v3307_v53  ;;  %v3380_v0 = vmul.f32 %v3155_v20, %v2516_v55  ;;  %v2456_v20 = vld [vmem:[%s7305_s3 + $0x1f8] sm:$0xff] }
 0x24e   :  { %v3150_v51 = vpop.permute.xlu0 %3149 }
 0x24f   :  { %v3379_v58 = vmul.f32 %v3150_v51, %v2515_v28  ;;  %3525 = vst.msk [vmem:[%s7306_s4 + $0x3d8] sm:$0xff] %vm3401_vm1, %v3380_v0  ;;  %v2455_v0 = vld [vmem:[%s7305_s3 + $0x1f0] sm:$0xff] }
 0x250   :  { %v2805_v27 = vpop.permute.xlu1 %2804 }
 0x251   :  { %3524 = vst.msk [vmem:[%s7306_s4 + $0x3d0] sm:$0xff] %vm3401_vm1, %v3379_v58  ;;  %v3310_v16 = vmul.f32 %v2805_v27, %v2446_v32  ;;  %v2528_v27 = vld [vmem:[%s7305_s3 + $0x438] sm:$0xff] }
 0x252   :  { %v2800_v45 = vpop.permute.xlu0 %2799 }
 0x253   :  { %v3309_v3 = vmul.f32 %v2800_v45, %v2445_v62  ;;  %3455 = vst.msk [vmem:[%s7306_s4 + $0x1a8] sm:$0xff] %vm3401_vm1, %v3310_v16  ;;  %v2527_v16 = vld [vmem:[%s7305_s3 + $0x430] sm:$0xff] }
 0x254   :  { %v3165_v36 = vpop.permute.xlu1 %3164 }
 0x255   :  { %3454 = vst.msk [vmem:[%s7306_s4 + $0x1a0] sm:$0xff] %vm3401_vm1, %v3309_v3  ;;  %v3382_v41 = vmul.f32 %v3165_v36, %v2518_v54  ;;  %v2458_v36 = vld [vmem:[%s7305_s3 + $0x208] sm:$0xff] }
 0x256   :  { %v3160_v19 = vpop.permute.xlu0 %3159 }
 0x257   :  { %v3381_v59 = vmul.f32 %v3160_v19, %v2517_v30  ;;  %3527 = vst.msk [vmem:[%s7306_s4 + $0x3e8] sm:$0xff] %vm3401_vm1, %v3382_v41  ;;  %v2457_v41 = vld [vmem:[%s7305_s3 + $0x200] sm:$0xff] }
 0x258   :  { %v2815_v57 = vpop.permute.xlu1 %2814 }
 0x259   :  { %3526 = vst.msk [vmem:[%s7306_s4 + $0x3e0] sm:$0xff] %vm3401_vm1, %v3381_v59  ;;  %v3312_v14 = vmul.f32 %v2815_v57, %v2448_v25  ;;  %v2530_v57 = vld [vmem:[%s7305_s3 + $0x448] sm:$0xff] }
 0x25a   :  { %v2810_v22 = vpop.permute.xlu0 %2809 }
 0x25b   :  { %v3311_v5 = vmul.f32 %v2810_v22, %v2447_v50  ;;  %3457 = vst.msk [vmem:[%s7306_s4 + $0x1b8] sm:$0xff] %vm3401_vm1, %v3312_v14  ;;  %v2529_v14 = vld [vmem:[%s7305_s3 + $0x440] sm:$0xff] }
 0x25c   :  { %v3175_v47 = vpop.permute.xlu1 %3174 }
 0x25d   :  { %3456 = vst.msk [vmem:[%s7306_s4 + $0x1b0] sm:$0xff] %vm3401_vm1, %v3311_v5  ;;  %v3384_v29 = vmul.f32 %v3175_v47, %v2520_v33  ;;  %v2460_v47 = vld [vmem:[%s7305_s3 + $0x218] sm:$0xff] }
 0x25e   :  { %v3170_v61 = vpop.permute.xlu0 %3169 }
 0x25f   :  { %v3383_v42 = vmul.f32 %v3170_v61, %v2519_v37  ;;  %3529 = vst.msk [vmem:[%s7306_s4 + $0x3f8] sm:$0xff] %vm3401_vm1, %v3384_v29  ;;  %v2459_v29 = vld [vmem:[%s7305_s3 + $0x210] sm:$0xff] }
 0x260   :  { %v2825_v63 = vpop.permute.xlu1 %2824 }
 0x261   :  { %3528 = vst.msk [vmem:[%s7306_s4 + $0x3f0] sm:$0xff] %vm3401_vm1, %v3383_v42  ;;  %v3314_v34 = vmul.f32 %v2825_v63, %v2450_v31  ;;  %v2532_v63 = vld [vmem:[%s7305_s3 + $0x458] sm:$0xff] }
 0x262   :  { %v2820_v23 = vpop.permute.xlu0 %2819 }
 0x263   :  { %v3313_v10 = vmul.f32 %v2820_v23, %v2449_v1  ;;  %3459 = vst.msk [vmem:[%s7306_s4 + $0x1c8] sm:$0xff] %vm3401_vm1, %v3314_v34  ;;  %v2531_v34 = vld [vmem:[%s7305_s3 + $0x450] sm:$0xff] }
 0x264   :  { %v3185_v26 = vpop.permute.xlu1 %3184 }
 0x265   :  { %3458 = vst.msk [vmem:[%s7306_s4 + $0x1c0] sm:$0xff] %vm3401_vm1, %v3313_v10  ;;  %v3386_v43 = vmul.f32 %v3185_v26, %v2522_v2  ;;  %v2462_v26 = vld [vmem:[%s7305_s3 + $0x228] sm:$0xff] }
 0x266   :  { %v3180_v44 = vpop.permute.xlu0 %3179 }
 0x267   :  { %v3385_v15 = vmul.f32 %v3180_v44, %v2521_v35  ;;  %3531 = vst.msk [vmem:[%s7306_s4 + $0x408] sm:$0xff] %vm3401_vm1, %v3386_v43  ;;  %v2461_v43 = vld [vmem:[%s7305_s3 + $0x220] sm:$0xff] }
 0x268   :  { %v2835_v11 = vpop.permute.xlu1 %2834 }
 0x269   :  { %3530 = vst.msk [vmem:[%s7306_s4 + $0x400] sm:$0xff] %vm3401_vm1, %v3385_v15  ;;  %v3316_v13 = vmul.f32 %v2835_v11, %v2452_v12  ;;  %v2534_v11 = vld [vmem:[%s7305_s3 + $0x468] sm:$0xff] }
 0x26a   :  { %v2830_v9 = vpop.permute.xlu0 %2829 }
 0x26b   :  { %v3315_v7 = vmul.f32 %v2830_v9, %v2451_v60  ;;  %3461 = vst.msk [vmem:[%s7306_s4 + $0x1d8] sm:$0xff] %vm3401_vm1, %v3316_v13  ;;  %v2533_v13 = vld [vmem:[%s7305_s3 + $0x460] sm:$0xff] }
 0x26c   :  { %v3195_v24 = vpop.permute.xlu1 %3194 }
 0x26d   :  { %3460 = vst.msk [vmem:[%s7306_s4 + $0x1d0] sm:$0xff] %vm3401_vm1, %v3315_v7  ;;  %v3388_v17 = vmul.f32 %v3195_v24, %v2524_v49  ;;  %v2464_v24 = vld [vmem:[%s7305_s3 + $0x238] sm:$0xff] }
 0x26e   :  { %v3190_v46 = vpop.permute.xlu0 %3189 }
 0x26f   :  { %v3387_v40 = vmul.f32 %v3190_v46, %v2523_v4  ;;  %3533 = vst.msk [vmem:[%s7306_s4 + $0x418] sm:$0xff] %vm3401_vm1, %v3388_v17  ;;  %v2463_v17 = vld [vmem:[%s7305_s3 + $0x230] sm:$0xff] }
 0x270   :  { %v2845_v8 = vpop.permute.xlu1 %2844 }
 0x271   :  { %3532 = vst.msk [vmem:[%s7306_s4 + $0x410] sm:$0xff] %vm3401_vm1, %v3387_v40  ;;  %v3318_v38 = vmul.f32 %v2845_v8, %v2454_v52  ;;  %v2536_v8 = vld [vmem:[%s7305_s3 + $0x478] sm:$0xff] }
 0x272   :  { %v2840_v6 = vpop.permute.xlu0 %2839 }
 0x273   :  { %v3317_v21 = vmul.f32 %v2840_v6, %v2453_v39  ;;  %3463 = vst.msk [vmem:[%s7306_s4 + $0x1e8] sm:$0xff] %vm3401_vm1, %v3318_v38  ;;  %v2535_v38 = vld [vmem:[%s7305_s3 + $0x470] sm:$0xff] }
 0x274   :  { %v3205_v56 = vpop.permute.xlu1 %3204 }
 0x275   :  { %3462 = vst.msk [vmem:[%s7306_s4 + $0x1e0] sm:$0xff] %vm3401_vm1, %v3317_v21  ;;  %v3390_v53 = vmul.f32 %v3205_v56, %v2526_v48 }
 0x276   :  { %v3200_v55 = vpop.permute.xlu0 %3199 }
 0x277   :  { %v3389_v28 = vmul.f32 %v3200_v55, %v2525_v18  ;;  %3535 = vst.msk [vmem:[%s7306_s4 + $0x428] sm:$0xff] %vm3401_vm1, %v3390_v53 }
 0x278   :  { %v2855_v51 = vpop.permute.xlu1 %2854 }
 0x279   :  { %3534 = vst.msk [vmem:[%s7306_s4 + $0x420] sm:$0xff] %vm3401_vm1, %v3389_v28  ;;  %v3320_v58 = vmul.f32 %v2855_v51, %v2456_v20 }
 0x27a   :  { %v2850_v32 = vpop.permute.xlu0 %2849 }
 0x27b   :  { %v3319_v62 = vmul.f32 %v2850_v32, %v2455_v0  ;;  %3465 = vst.msk [vmem:[%s7306_s4 + $0x1f8] sm:$0xff] %vm3401_vm1, %v3320_v58 }
 0x27c   :  { %v3215_v45 = vpop.permute.xlu1 %3214 }
 0x27d   :  { %3464 = vst.msk [vmem:[%s7306_s4 + $0x1f0] sm:$0xff] %vm3401_vm1, %v3319_v62  ;;  %v3392_v3 = vmul.f32 %v3215_v45, %v2528_v27 }
 0x27e   :  { %v3210_v54 = vpop.permute.xlu0 %3209 }
 0x27f   :  { %v3391_v30 = vmul.f32 %v3210_v54, %v2527_v16  ;;  %3537 = vst.msk [vmem:[%s7306_s4 + $0x438] sm:$0xff] %vm3401_vm1, %v3392_v3 }
 0x280   :  { %v2865_v19 = vpop.permute.xlu1 %2864 }
 0x281   :  { %3536 = vst.msk [vmem:[%s7306_s4 + $0x430] sm:$0xff] %vm3401_vm1, %v3391_v30  ;;  %v3322_v59 = vmul.f32 %v2865_v19, %v2458_v36 }
 0x282   :  { %v2860_v25 = vpop.permute.xlu0 %2859 }
 0x283   :  { %v3321_v50 = vmul.f32 %v2860_v25, %v2457_v41  ;;  %3467 = vst.msk [vmem:[%s7306_s4 + $0x208] sm:$0xff] %vm3401_vm1, %v3322_v59 }
 0x284   :  { %v3225_v22 = vpop.permute.xlu1 %3224 }
 0x285   :  { %3466 = vst.msk [vmem:[%s7306_s4 + $0x200] sm:$0xff] %vm3401_vm1, %v3321_v50  ;;  %v3394_v5 = vmul.f32 %v3225_v22, %v2530_v57 }
 0x286   :  { %v3220_v33 = vpop.permute.xlu0 %3219 }
 0x287   :  { %v3393_v37 = vmul.f32 %v3220_v33, %v2529_v14  ;;  %3539 = vst.msk [vmem:[%s7306_s4 + $0x448] sm:$0xff] %vm3401_vm1, %v3394_v5 }
 0x288   :  { %v2875_v61 = vpop.permute.xlu1 %2874 }
 0x289   :  { %3538 = vst.msk [vmem:[%s7306_s4 + $0x440] sm:$0xff] %vm3401_vm1, %v3393_v37  ;;  %v3324_v42 = vmul.f32 %v2875_v61, %v2460_v47 }
 0x28a   :  { %v2870_v31 = vpop.permute.xlu0 %2869 }
 0x28b   :  { %v3323_v1 = vmul.f32 %v2870_v31, %v2459_v29  ;;  %3469 = vst.msk [vmem:[%s7306_s4 + $0x218] sm:$0xff] %vm3401_vm1, %v3324_v42 }
 0x28c   :  { %v3235_v23 = vpop.permute.xlu1 %3234 }
 0x28d   :  { %3468 = vst.msk [vmem:[%s7306_s4 + $0x210] sm:$0xff] %vm3401_vm1, %v3323_v1  ;;  %v3396_v10 = vmul.f32 %v3235_v23, %v2532_v63 }
 0x28e   :  { %v3230_v2 = vpop.permute.xlu0 %3229 }
 0x28f   :  { %v3395_v35 = vmul.f32 %v3230_v2, %v2531_v34  ;;  %3541 = vst.msk [vmem:[%s7306_s4 + $0x458] sm:$0xff] %vm3401_vm1, %v3396_v10 }
 0x290   :  { %v2885_v44 = vpop.permute.xlu1 %2884 }
 0x291   :  { %3540 = vst.msk [vmem:[%s7306_s4 + $0x450] sm:$0xff] %vm3401_vm1, %v3395_v35  ;;  %v3326_v15 = vmul.f32 %v2885_v44, %v2462_v26 }
 0x292   :  { %v2880_v12 = vpop.permute.xlu0 %2879 }
 0x293   :  { %v3325_v60 = vmul.f32 %v2880_v12, %v2461_v43  ;;  %3471 = vst.msk [vmem:[%s7306_s4 + $0x228] sm:$0xff] %vm3401_vm1, %v3326_v15 }
 0x294   :  { %v3245_v9 = vpop.permute.xlu1 %3244 }
 0x295   :  { %3470 = vst.msk [vmem:[%s7306_s4 + $0x220] sm:$0xff] %vm3401_vm1, %v3325_v60  ;;  %v3398_v7 = vmul.f32 %v3245_v9, %v2534_v11 }
 0x296   :  { %v3240_v49 = vpop.permute.xlu0 %3239 }
 0x297   :  { %v3397_v4 = vmul.f32 %v3240_v49, %v2533_v13  ;;  %3543 = vst.msk [vmem:[%s7306_s4 + $0x468] sm:$0xff] %vm3401_vm1, %v3398_v7 }
 0x298   :  { %v2895_v46 = vpop.permute.xlu1 %2894 }
 0x299   :  { %3542 = vst.msk [vmem:[%s7306_s4 + $0x460] sm:$0xff] %vm3401_vm1, %v3397_v4  ;;  %v3328_v40 = vmul.f32 %v2895_v46, %v2464_v24 }
 0x29a   :  { %v2890_v52 = vpop.permute.xlu0 %2889 }
 0x29b   :  { %v3327_v39 = vmul.f32 %v2890_v52, %v2463_v17  ;;  %3473 = vst.msk [vmem:[%s7306_s4 + $0x238] sm:$0xff] %vm3401_vm1, %v3328_v40 }
 0x29c   :  { %v3255_v6 = vpop.permute.xlu1 %3254 }
 0x29d   :  { %3472 = vst.msk [vmem:[%s7306_s4 + $0x230] sm:$0xff] %vm3401_vm1, %v3327_v39  ;;  %v3400_v21 = vmul.f32 %v3255_v6, %v2536_v8 }
 0x29e   :  { %v3250_v48 = vpop.permute.xlu0 %3249 }
 0x29f   :  { %v3399_v18 = vmul.f32 %v3250_v48, %v2535_v38  ;;  %3545 = vst.msk [vmem:[%s7306_s4 + $0x478] sm:$0xff] %vm3401_vm1, %v3400_v21 }
 0x2a1   :  { %3544 = vst.msk [vmem:[%s7306_s4 + $0x470] sm:$0xff] %vm3401_vm1, %v3399_v18 }

</bundles_post_ra>
